<compile_context>
chip_gen: v6e
topology: v6e:2x2x1
jax: 0.10.0
libtpu: 0.0.40
codegen_flags: <defaults>
</compile_context>

<pallas_src>
import functools

import jax
import jax.numpy as jnp
from jax import lax
from jax.experimental import pallas as pl
from jax.experimental.pallas import tpu as pltpu

# Explicit scoped-VMEM budget (review: do not rely on defaults; stay well under v7x's 64 MiB).
_VMEM_LIMIT = 32 * 1024 * 1024


# ----------------------------------------------------------------------------
# Tiling helpers
# ----------------------------------------------------------------------------
def _pick_row_tile(m, target=1024):
    """Largest row tile that divides m, is a multiple of 8, and is <= target."""
    if m <= target:
        return m
    for t in range(target - (target % 8), 7, -8):
        if m % t == 0:
            return t
    return m


def _pick_tile_h(h, w, target_rows=1024):
    """Largest divisor of h such that (tile_h * w) output rows stay <= target_rows."""
    for th in range(h, 0, -1):
        if h % th == 0 and th * w <= target_rows:
            return th
    return 1


# ----------------------------------------------------------------------------
# Fused 3x3 conv kernel (im2col inside the kernel: 9 shifted dots, f32 accumulate)
# ----------------------------------------------------------------------------
def _conv3x3_kernel(x_ref, w_ref, b_ref, o_ref, *, act, th, wdt):
    cin = x_ref.shape[-1]
    cout = o_ref.shape[-1]
    acc = jnp.zeros((th * wdt, cout), jnp.float32)
    for dy in range(3):
        for dx in range(3):
            xs = x_ref[dy:dy + th, dx:dx + wdt, :].reshape(th * wdt, cin)   # bf16 tile view
            acc = acc + jnp.dot(xs, w_ref[dy, dx], preferred_element_type=jnp.float32)
    acc = acc + b_ref[...]                      # [1, Cout] broadcast, f32
    if act == "relu":
        acc = jnp.maximum(acc, 0.0)             # epilogue in f32 (v5e-friendly)
    o_ref[...] = acc.reshape(th, wdt, cout).astype(o_ref.dtype)


def conv3x3(x, w, b, act="relu", out_dtype=jnp.bfloat16):
    """x: [B,H,W,Cin], w: [3,3,Cin,Cout], b: [Cout].  SAME padding, stride 1."""
    B, H, W, Cin = x.shape
    Cout = w.shape[-1]
    th = _pick_tile_h(H, W)
    nt = H // th

    xb = x.astype(jnp.bfloat16)
    xp = jnp.pad(xb, ((0, 0), (1, 1), (1, 1), (0, 0)))          # [B, H+2, W+2, Cin]
    if nt == 1:
        x_tiles = xp[:, None]                                   # [B, 1, H+2, W+2, Cin]
    else:  # overlapping row tiles (2-row halo) -> standard non-overlapping BlockSpecs
        x_tiles = jnp.stack([xp[:, t * th:t * th + th + 2] for t in range(nt)], axis=1)

    wb = w.astype(jnp.bfloat16)
    bb = b.reshape(1, Cout).astype(jnp.float32)

    out = pl.pallas_call(
        functools.partial(_conv3x3_kernel, act=act, th=th, wdt=W),
        out_shape=jax.ShapeDtypeStruct((B, nt, th, W, Cout), out_dtype),
        grid=(B, nt),
        in_specs=[
            pl.BlockSpec((None, None, th + 2, W + 2, Cin), lambda bi, ti: (bi, ti, 0, 0, 0)),
            pl.BlockSpec((3, 3, Cin, Cout), lambda bi, ti: (0, 0, 0, 0)),
            pl.BlockSpec((1, Cout), lambda bi, ti: (0, 0)),
        ],
        out_specs=pl.BlockSpec((None, None, th, W, Cout), lambda bi, ti: (bi, ti, 0, 0, 0)),
        compiler_params=pltpu.CompilerParams(
            dimension_semantics=("parallel", "parallel"),
            vmem_limit_bytes=_VMEM_LIMIT),
    )(x_tiles, wb, bb)
    return out.reshape(B, H, W, Cout)


def conv_block(x, p):
    x = conv3x3(x, p["w1"], p["b1"], act="relu")
    x = conv3x3(x, p["w2"], p["b2"], act="relu")
    return x


# ----------------------------------------------------------------------------
# Attention gate: out = x * sigmoid(psi(relu(Wg g + Wx x))), M-tiled, psi on VPU
# ----------------------------------------------------------------------------
def _attn_gate_kernel(g_ref, x_ref, wg_ref, bg_ref, wx_ref, bx_ref,
                      wpsi_ref, bpsi_ref, o_ref):
    g1 = jnp.dot(g_ref[...], wg_ref[...], preferred_element_type=jnp.float32) + bg_ref[...]
    x1 = jnp.dot(x_ref[...], wx_ref[...], preferred_element_type=jnp.float32) + bx_ref[...]
    a = jnp.maximum(g1 + x1, 0.0)                                       # [TM, Fint] f32
    # psi as a lane reduction instead of an [TM,Fint]x[Fint,1] MXU matmul.
    logits = jnp.sum(a * wpsi_ref[...], axis=1, keepdims=True) + bpsi_ref[...]
    psi = jax.nn.sigmoid(logits)                                        # [TM, 1] f32
    o_ref[...] = (x_ref[...].astype(jnp.float32) * psi).astype(o_ref.dtype)


def attention_gate(g, x, p):
    B, H, W, Cg = g.shape
    Cx = x.shape[-1]
    Fi = p["wg"].shape[-1]
    M = B * H * W
    tm = _pick_row_tile(M)

    out = pl.pallas_call(
        _attn_gate_kernel,
        out_shape=jax.ShapeDtypeStruct((M, Cx), jnp.bfloat16),
        grid=(M // tm,),
        in_specs=[
            pl.BlockSpec((tm, Cg), lambda i: (i, 0)),
            pl.BlockSpec((tm, Cx), lambda i: (i, 0)),
            pl.BlockSpec((Cg, Fi), lambda i: (0, 0)),
            pl.BlockSpec((1, Fi), lambda i: (0, 0)),
            pl.BlockSpec((Cx, Fi), lambda i: (0, 0)),
            pl.BlockSpec((1, Fi), lambda i: (0, 0)),
            pl.BlockSpec((1, Fi), lambda i: (0, 0)),
            pl.BlockSpec((1, 1), lambda i: (0, 0)),
        ],
        out_specs=pl.BlockSpec((tm, Cx), lambda i: (i, 0)),
        compiler_params=pltpu.CompilerParams(
            dimension_semantics=("parallel",),
            vmem_limit_bytes=_VMEM_LIMIT),
    )(g.reshape(M, Cg).astype(jnp.bfloat16),
      x.reshape(M, Cx).astype(jnp.bfloat16),
      p["wg"].astype(jnp.bfloat16), p["bg"].reshape(1, Fi).astype(jnp.float32),
      p["wx"].astype(jnp.bfloat16), p["bx"].reshape(1, Fi).astype(jnp.float32),
      p["wpsi"].reshape(1, Fi).astype(jnp.float32), p["bpsi"].reshape(1, 1).astype(jnp.float32))
    return out.reshape(B, H, W, Cx)


# ----------------------------------------------------------------------------
# Spatial-transformer warp: separable bilinear sample (clamp-to-edge)
#   row stage:  [TP,H] weighted one-hot (weights folded via jnp.where)  @  img [H, W*C]  (MXU)
#   col stage:  per-pixel x-select + weighted reduce over W             (VPU/XLU)
# ----------------------------------------------------------------------------
def _warp_kernel(img_ref, flow_ref, o_ref, *, H, W, C, TP):
    p0 = pl.program_id(1) * TP
    pidx = p0 + lax.broadcasted_iota(jnp.int32, (TP, 1), 0)             # global pixel index
    gy = (pidx // W).astype(jnp.float32)
    gx = (pidx % W).astype(jnp.float32)

    fl = flow_ref[...]                                                  # [TP, 2] f32
    sy = jnp.clip(gy + fl[:, 0:1], 0.0, H - 1.0)
    sx = jnp.clip(gx + fl[:, 1:2], 0.0, W - 1.0)
    y0f = jnp.floor(sy)
    x0f = jnp.floor(sx)
    wy = sy - y0f
    wx = sx - x0f
    y0 = y0f.astype(jnp.int32)
    x0 = x0f.astype(jnp.int32)
    y1 = jnp.minimum(y0 + 1, H - 1)
    x1 = jnp.minimum(x0 + 1, W - 1)

    # Row interpolation on the MXU: weights folded directly into the selection matrix.
    h_iota = lax.broadcasted_iota(jnp.int32, (TP, H), 1)
    a_rows = jnp.where(h_iota == y0, 1.0 - wy, 0.0) + jnp.where(h_iota == y1, wy, 0.0)
    ry = jnp.dot(a_rows, img_ref[...], preferred_element_type=jnp.float32)   # [TP, W*C]

    # Column interpolation on the VPU (no N=1 MXU matmul).
    w_iota = lax.broadcasted_iota(jnp.int32, (TP, W), 1)
    sel_x = jnp.where(w_iota == x0, 1.0 - wx, 0.0) + jnp.where(w_iota == x1, wx, 0.0)
    if C == 1:
        out = jnp.sum(sel_x * ry, axis=1, keepdims=True)                # [TP, 1]
    else:
        out = jnp.sum(sel_x[:, :, None] * ry.reshape(TP, W, C), axis=1)  # [TP, C]
    o_ref[...] = out.astype(o_ref.dtype)


def bilinear_warp(img, flow):
    """img: [B,H,W,C], flow: [B,H,W,2] (pixel displacements) -> warped [B,H,W,C]."""
    B, H, W, C = img.shape
    HW = H * W
    TP = _pick_row_tile(HW)
    NP = HW // TP
    img2 = img.reshape(B, H, W * C).astype(jnp.float32)
    flow2 = flow.reshape(B, HW, 2).astype(jnp.float32)

    out = pl.pallas_call(
        functools.partial(_warp_kernel, H=H, W=W, C=C, TP=TP),
        out_shape=jax.ShapeDtypeStruct((B, HW, C), jnp.float32),
        grid=(B, NP),
        in_specs=[
            pl.BlockSpec((None, H, W * C), lambda b, t: (b, 0, 0)),
            pl.BlockSpec((None, TP, 2), lambda b, t: (b, t, 0)),
        ],
        out_specs=pl.BlockSpec((None, TP, C), lambda b, t: (b, t, 0)),
        compiler_params=pltpu.CompilerParams(
            dimension_semantics=("parallel", "parallel"),
            vmem_limit_bytes=_VMEM_LIMIT),
    )(img2, flow2)
    return out.reshape(B, H, W, C)


# ----------------------------------------------------------------------------
# Pooling / upsampling glue (plain JAX)
# ----------------------------------------------------------------------------
def maxpool2(x):
    B, H, W, C = x.shape
    return x.reshape(B, H // 2, 2, W // 2, 2, C).max(axis=(2, 4))


def upsample2(x):
    B, H, W, C = x.shape
    # TODO(synk): jax.image.resize 'bilinear' vs torch.nn.Upsample align_corners differs slightly.
    return jax.image.resize(x, (B, 2 * H, 2 * W, C), method="bilinear")


# ----------------------------------------------------------------------------
# Parameter init (deterministic, synthetic)
# ----------------------------------------------------------------------------
def init_params(key, in_c=1, n=1):
    C1, C2, C3 = 8 * n, 16 * n, 32 * n
    keys = iter(jax.random.split(key, 64))

    def cw(cin, cout, scale=0.1):
        return jax.random.normal(next(keys), (3, 3, cin, cout), jnp.float32) * scale

    def lw(cin, cout, scale=0.1):
        return jax.random.normal(next(keys), (cin, cout), jnp.float32) * scale

    def block(cin, cout):
        return {"w1": cw(cin, cout), "b1": jnp.zeros((cout,), jnp.float32),
                "w2": cw(cout, cout), "b2": jnp.zeros((cout,), jnp.float32)}

    def gate(cg, cx, fint):
        return {"wg": lw(cg, fint), "bg": jnp.zeros((fint,), jnp.float32),
                "wx": lw(cx, fint), "bx": jnp.zeros((fint,), jnp.float32),
                "wpsi": lw(fint, 1), "bpsi": jnp.zeros((1,), jnp.float32)}

    return {
        "enc1": block(in_c, C1),
        "enc2": block(C1, C2),
        "bott": block(C2, C3),
        "ag2": gate(C3, C2, C2 // 2),
        "dec2": block(C3 + C2, C2),
        "ag1": gate(C2, C1, C1 // 2),
        "dec1": block(C2 + C1, C1),
        "flow_w": cw(C1, 2, scale=0.01),   # small flow head -> near-identity warp
        "flow_b": jnp.zeros((2,), jnp.float32),
    }


# ----------------------------------------------------------------------------
# flow_register forward:  flow = Attention_UNet(x);  y = warp(x, flow)
# ----------------------------------------------------------------------------
def flow_register_forward(params, x):
    """x: [B,H,W,C] (NHWC).  Returns (warped_image, flow)."""
    e1 = conv_block(x, params["enc1"])            # [B,H,W,C1]      (bf16 activations)
    p1 = maxpool2(e1)
    e2 = conv_block(p1, params["enc2"])           # [B,H/2,W/2,C2]
    p2 = maxpool2(e2)
    bt = conv_block(p2, params["bott"])           # [B,H/4,W/4,C3]

    u2 = upsample2(bt)                            # [B,H/2,W/2,C3]
    a2 = attention_gate(u2, e2, params["ag2"])    # gated skip
    d2 = conv_block(jnp.concatenate([u2, a2], axis=-1), params["dec2"])

    u1 = upsample2(d2)                            # [B,H,W,C2]
    a1 = attention_gate(u1, e1, params["ag1"])
    d1 = conv_block(jnp.concatenate([u1, a1], axis=-1), params["dec1"])

    flow = conv3x3(d1, params["flow_w"], params["flow_b"],
                   act="none", out_dtype=jnp.float32)              # [B,H,W,2]
    y = bilinear_warp(x.astype(jnp.float32), flow)                  # spatial transformer
    return y, flow


if __name__ == "__main__":
    key = jax.random.PRNGKey(0)
    kx, kp = jax.random.split(key)

    B, C, H, W = 2, 1, 16, 16                     # img_size=16, in_c=1, n=1
    x_nchw = jax.random.uniform(kx, (B, C, H, W), jnp.float32)   # PyTorch-style NCHW input
    x = jnp.transpose(x_nchw, (0, 2, 3, 1))       # -> NHWC for the kernels

    params = init_params(kp, in_c=C, n=1)
    y, flow = flow_register_forward(params, x)
    y, flow = jax.block_until_ready((y, flow))

    assert y.shape == (B, H, W, C) and y.dtype == jnp.float32
    assert flow.shape == (B, H, W, 2)
    assert bool(jnp.all(jnp.isfinite(y))) and bool(jnp.all(jnp.isfinite(flow)))
    print("KERNEL_OK")
</pallas_src>

<mosaic_0001>
module attributes {stable_mosaic.version = 11 : i64} {
  func.func @_conv3x3_kernel(%arg0: i32, %arg1: i32, %arg2: memref<1x1x18x18x1xbf16, #tpu.memory_space<vmem>>, %arg3: memref<3x3x1x8xbf16, #tpu.memory_space<vmem>>, %arg4: memref<1x8xf32, #tpu.memory_space<vmem>>, %arg5: memref<1x1x16x16x8xbf16, #tpu.memory_space<vmem>>) attributes {dimension_semantics = [#tpu.dimension_semantics<parallel>, #tpu.dimension_semantics<parallel>], iteration_bounds = array<i64: 2, 1>, scalar_prefetch = 0 : i64, scratch_operands = 0 : i64, tpu.core_type = #tpu.core_type<tc>, window_params = [{transform_indices = @transform_0, window_bounds = array<i64: 1, 1, 18, 18, 1>}, {pipeline_mode = #tpu.pipeline_mode<synchronous>, transform_indices = @transform_1, window_bounds = array<i64: 3, 3, 1, 8>}, {pipeline_mode = #tpu.pipeline_mode<synchronous>, transform_indices = @transform_2, window_bounds = array<i64: 1, 8>}, {transform_indices = @transform_3, window_bounds = array<i64: 1, 1, 16, 16, 8>}]} {
    %cst = arith.constant 0.000000e+00 : f32
    %0 = vector.broadcast %cst : f32 to vector<256x8xf32>
    %c0 = arith.constant 0 : index
    %c0_0 = arith.constant 0 : index
    %c0_1 = arith.constant 0 : index
    %c0_2 = arith.constant 0 : index
    %c0_3 = arith.constant 0 : index
    %1 = vector.load %arg2[%c0, %c0_0, %c0_1, %c0_2, %c0_3] : memref<1x1x18x18x1xbf16, #tpu.memory_space<vmem>>, vector<1x1x16x16x1xbf16>
    %2 = vector.shape_cast %1 : vector<1x1x16x16x1xbf16> to vector<16x16x1xbf16>
    %3 = vector.shape_cast %2 : vector<16x16x1xbf16> to vector<256x1xbf16>
    %c0_4 = arith.constant 0 : index
    %c0_5 = arith.constant 0 : index
    %c0_6 = arith.constant 0 : index
    %c0_7 = arith.constant 0 : index
    %4 = vector.load %arg3[%c0_4, %c0_5, %c0_6, %c0_7] : memref<3x3x1x8xbf16, #tpu.memory_space<vmem>>, vector<1x1x1x8xbf16>
    %5 = vector.shape_cast %4 : vector<1x1x1x8xbf16> to vector<1x8xbf16>
    %cst_8 = arith.constant dense<0.000000e+00> : vector<256x8xf32>
    %6 = tpu.matmul %3, %5, %cst_8 {dimension_numbers = #tpu.dot_dimension_numbers<[1], [0], [0], [1], [0, 0, 1, 1], [], []>} : vector<256x1xbf16>, vector<1x8xbf16>, vector<256x8xf32> -> vector<256x8xf32>
    %7 = arith.addf %0, %6 : vector<256x8xf32>
    %c0_9 = arith.constant 0 : index
    %c0_10 = arith.constant 0 : index
    %c0_11 = arith.constant 0 : index
    %c1 = arith.constant 1 : index
    %c0_12 = arith.constant 0 : index
    %8 = vector.load %arg2[%c0_9, %c0_10, %c0_11, %c1, %c0_12] : memref<1x1x18x18x1xbf16, #tpu.memory_space<vmem>>, vector<1x1x16x16x1xbf16>
    %9 = vector.shape_cast %8 : vector<1x1x16x16x1xbf16> to vector<16x16x1xbf16>
    %10 = vector.shape_cast %9 : vector<16x16x1xbf16> to vector<256x1xbf16>
    %c0_13 = arith.constant 0 : index
    %c1_14 = arith.constant 1 : index
    %c0_15 = arith.constant 0 : index
    %c0_16 = arith.constant 0 : index
    %11 = vector.load %arg3[%c0_13, %c1_14, %c0_15, %c0_16] : memref<3x3x1x8xbf16, #tpu.memory_space<vmem>>, vector<1x1x1x8xbf16>
    %12 = vector.shape_cast %11 : vector<1x1x1x8xbf16> to vector<1x8xbf16>
    %cst_17 = arith.constant dense<0.000000e+00> : vector<256x8xf32>
    %13 = tpu.matmul %10, %12, %cst_17 {dimension_numbers = #tpu.dot_dimension_numbers<[1], [0], [0], [1], [0, 0, 1, 1], [], []>} : vector<256x1xbf16>, vector<1x8xbf16>, vector<256x8xf32> -> vector<256x8xf32>
    %14 = arith.addf %7, %13 : vector<256x8xf32>
    %c0_18 = arith.constant 0 : index
    %c0_19 = arith.constant 0 : index
    %c0_20 = arith.constant 0 : index
    %c2 = arith.constant 2 : index
    %c0_21 = arith.constant 0 : index
    %15 = vector.load %arg2[%c0_18, %c0_19, %c0_20, %c2, %c0_21] : memref<1x1x18x18x1xbf16, #tpu.memory_space<vmem>>, vector<1x1x16x16x1xbf16>
    %16 = vector.shape_cast %15 : vector<1x1x16x16x1xbf16> to vector<16x16x1xbf16>
    %17 = vector.shape_cast %16 : vector<16x16x1xbf16> to vector<256x1xbf16>
    %c0_22 = arith.constant 0 : index
    %c2_23 = arith.constant 2 : index
    %c0_24 = arith.constant 0 : index
    %c0_25 = arith.constant 0 : index
    %18 = vector.load %arg3[%c0_22, %c2_23, %c0_24, %c0_25] : memref<3x3x1x8xbf16, #tpu.memory_space<vmem>>, vector<1x1x1x8xbf16>
    %19 = vector.shape_cast %18 : vector<1x1x1x8xbf16> to vector<1x8xbf16>
    %cst_26 = arith.constant dense<0.000000e+00> : vector<256x8xf32>
    %20 = tpu.matmul %17, %19, %cst_26 {dimension_numbers = #tpu.dot_dimension_numbers<[1], [0], [0], [1], [0, 0, 1, 1], [], []>} : vector<256x1xbf16>, vector<1x8xbf16>, vector<256x8xf32> -> vector<256x8xf32>
    %21 = arith.addf %14, %20 : vector<256x8xf32>
    %c0_27 = arith.constant 0 : index
    %c0_28 = arith.constant 0 : index
    %c1_29 = arith.constant 1 : index
    %c0_30 = arith.constant 0 : index
    %c0_31 = arith.constant 0 : index
    %22 = vector.load %arg2[%c0_27, %c0_28, %c1_29, %c0_30, %c0_31] : memref<1x1x18x18x1xbf16, #tpu.memory_space<vmem>>, vector<1x1x16x16x1xbf16>
    %23 = vector.shape_cast %22 : vector<1x1x16x16x1xbf16> to vector<16x16x1xbf16>
    %24 = vector.shape_cast %23 : vector<16x16x1xbf16> to vector<256x1xbf16>
    %c1_32 = arith.constant 1 : index
    %c0_33 = arith.constant 0 : index
    %c0_34 = arith.constant 0 : index
    %c0_35 = arith.constant 0 : index
    %25 = vector.load %arg3[%c1_32, %c0_33, %c0_34, %c0_35] : memref<3x3x1x8xbf16, #tpu.memory_space<vmem>>, vector<1x1x1x8xbf16>
    %26 = vector.shape_cast %25 : vector<1x1x1x8xbf16> to vector<1x8xbf16>
    %cst_36 = arith.constant dense<0.000000e+00> : vector<256x8xf32>
    %27 = tpu.matmul %24, %26, %cst_36 {dimension_numbers = #tpu.dot_dimension_numbers<[1], [0], [0], [1], [0, 0, 1, 1], [], []>} : vector<256x1xbf16>, vector<1x8xbf16>, vector<256x8xf32> -> vector<256x8xf32>
    %28 = arith.addf %21, %27 : vector<256x8xf32>
    %c0_37 = arith.constant 0 : index
    %c0_38 = arith.constant 0 : index
    %c1_39 = arith.constant 1 : index
    %c1_40 = arith.constant 1 : index
    %c0_41 = arith.constant 0 : index
    %29 = vector.load %arg2[%c0_37, %c0_38, %c1_39, %c1_40, %c0_41] : memref<1x1x18x18x1xbf16, #tpu.memory_space<vmem>>, vector<1x1x16x16x1xbf16>
    %30 = vector.shape_cast %29 : vector<1x1x16x16x1xbf16> to vector<16x16x1xbf16>
    %31 = vector.shape_cast %30 : vector<16x16x1xbf16> to vector<256x1xbf16>
    %c1_42 = arith.constant 1 : index
    %c1_43 = arith.constant 1 : index
    %c0_44 = arith.constant 0 : index
    %c0_45 = arith.constant 0 : index
    %32 = vector.load %arg3[%c1_42, %c1_43, %c0_44, %c0_45] : memref<3x3x1x8xbf16, #tpu.memory_space<vmem>>, vector<1x1x1x8xbf16>
    %33 = vector.shape_cast %32 : vector<1x1x1x8xbf16> to vector<1x8xbf16>
    %cst_46 = arith.constant dense<0.000000e+00> : vector<256x8xf32>
    %34 = tpu.matmul %31, %33, %cst_46 {dimension_numbers = #tpu.dot_dimension_numbers<[1], [0], [0], [1], [0, 0, 1, 1], [], []>} : vector<256x1xbf16>, vector<1x8xbf16>, vector<256x8xf32> -> vector<256x8xf32>
    %35 = arith.addf %28, %34 : vector<256x8xf32>
    %c0_47 = arith.constant 0 : index
    %c0_48 = arith.constant 0 : index
    %c1_49 = arith.constant 1 : index
    %c2_50 = arith.constant 2 : index
    %c0_51 = arith.constant 0 : index
    %36 = vector.load %arg2[%c0_47, %c0_48, %c1_49, %c2_50, %c0_51] : memref<1x1x18x18x1xbf16, #tpu.memory_space<vmem>>, vector<1x1x16x16x1xbf16>
    %37 = vector.shape_cast %36 : vector<1x1x16x16x1xbf16> to vector<16x16x1xbf16>
    %38 = vector.shape_cast %37 : vector<16x16x1xbf16> to vector<256x1xbf16>
    %c1_52 = arith.constant 1 : index
    %c2_53 = arith.constant 2 : index
    %c0_54 = arith.constant 0 : index
    %c0_55 = arith.constant 0 : index
    %39 = vector.load %arg3[%c1_52, %c2_53, %c0_54, %c0_55] : memref<3x3x1x8xbf16, #tpu.memory_space<vmem>>, vector<1x1x1x8xbf16>
    %40 = vector.shape_cast %39 : vector<1x1x1x8xbf16> to vector<1x8xbf16>
    %cst_56 = arith.constant dense<0.000000e+00> : vector<256x8xf32>
    %41 = tpu.matmul %38, %40, %cst_56 {dimension_numbers = #tpu.dot_dimension_numbers<[1], [0], [0], [1], [0, 0, 1, 1], [], []>} : vector<256x1xbf16>, vector<1x8xbf16>, vector<256x8xf32> -> vector<256x8xf32>
    %42 = arith.addf %35, %41 : vector<256x8xf32>
    %c0_57 = arith.constant 0 : index
    %c0_58 = arith.constant 0 : index
    %c2_59 = arith.constant 2 : index
    %c0_60 = arith.constant 0 : index
    %c0_61 = arith.constant 0 : index
    %43 = vector.load %arg2[%c0_57, %c0_58, %c2_59, %c0_60, %c0_61] : memref<1x1x18x18x1xbf16, #tpu.memory_space<vmem>>, vector<1x1x16x16x1xbf16>
    %44 = vector.shape_cast %43 : vector<1x1x16x16x1xbf16> to vector<16x16x1xbf16>
    %45 = vector.shape_cast %44 : vector<16x16x1xbf16> to vector<256x1xbf16>
    %c2_62 = arith.constant 2 : index
    %c0_63 = arith.constant 0 : index
    %c0_64 = arith.constant 0 : index
    %c0_65 = arith.constant 0 : index
    %46 = vector.load %arg3[%c2_62, %c0_63, %c0_64, %c0_65] : memref<3x3x1x8xbf16, #tpu.memory_space<vmem>>, vector<1x1x1x8xbf16>
    %47 = vector.shape_cast %46 : vector<1x1x1x8xbf16> to vector<1x8xbf16>
    %cst_66 = arith.constant dense<0.000000e+00> : vector<256x8xf32>
    %48 = tpu.matmul %45, %47, %cst_66 {dimension_numbers = #tpu.dot_dimension_numbers<[1], [0], [0], [1], [0, 0, 1, 1], [], []>} : vector<256x1xbf16>, vector<1x8xbf16>, vector<256x8xf32> -> vector<256x8xf32>
    %49 = arith.addf %42, %48 : vector<256x8xf32>
    %c0_67 = arith.constant 0 : index
    %c0_68 = arith.constant 0 : index
    %c2_69 = arith.constant 2 : index
    %c1_70 = arith.constant 1 : index
    %c0_71 = arith.constant 0 : index
    %50 = vector.load %arg2[%c0_67, %c0_68, %c2_69, %c1_70, %c0_71] : memref<1x1x18x18x1xbf16, #tpu.memory_space<vmem>>, vector<1x1x16x16x1xbf16>
    %51 = vector.shape_cast %50 : vector<1x1x16x16x1xbf16> to vector<16x16x1xbf16>
    %52 = vector.shape_cast %51 : vector<16x16x1xbf16> to vector<256x1xbf16>
    %c2_72 = arith.constant 2 : index
    %c1_73 = arith.constant 1 : index
    %c0_74 = arith.constant 0 : index
    %c0_75 = arith.constant 0 : index
    %53 = vector.load %arg3[%c2_72, %c1_73, %c0_74, %c0_75] : memref<3x3x1x8xbf16, #tpu.memory_space<vmem>>, vector<1x1x1x8xbf16>
    %54 = vector.shape_cast %53 : vector<1x1x1x8xbf16> to vector<1x8xbf16>
    %cst_76 = arith.constant dense<0.000000e+00> : vector<256x8xf32>
    %55 = tpu.matmul %52, %54, %cst_76 {dimension_numbers = #tpu.dot_dimension_numbers<[1], [0], [0], [1], [0, 0, 1, 1], [], []>} : vector<256x1xbf16>, vector<1x8xbf16>, vector<256x8xf32> -> vector<256x8xf32>
    %56 = arith.addf %49, %55 : vector<256x8xf32>
    %c0_77 = arith.constant 0 : index
    %c0_78 = arith.constant 0 : index
    %c2_79 = arith.constant 2 : index
    %c2_80 = arith.constant 2 : index
    %c0_81 = arith.constant 0 : index
    %57 = vector.load %arg2[%c0_77, %c0_78, %c2_79, %c2_80, %c0_81] : memref<1x1x18x18x1xbf16, #tpu.memory_space<vmem>>, vector<1x1x16x16x1xbf16>
    %58 = vector.shape_cast %57 : vector<1x1x16x16x1xbf16> to vector<16x16x1xbf16>
    %59 = vector.shape_cast %58 : vector<16x16x1xbf16> to vector<256x1xbf16>
    %c2_82 = arith.constant 2 : index
    %c2_83 = arith.constant 2 : index
    %c0_84 = arith.constant 0 : index
    %c0_85 = arith.constant 0 : index
    %60 = vector.load %arg3[%c2_82, %c2_83, %c0_84, %c0_85] : memref<3x3x1x8xbf16, #tpu.memory_space<vmem>>, vector<1x1x1x8xbf16>
    %61 = vector.shape_cast %60 : vector<1x1x1x8xbf16> to vector<1x8xbf16>
    %cst_86 = arith.constant dense<0.000000e+00> : vector<256x8xf32>
    %62 = tpu.matmul %59, %61, %cst_86 {dimension_numbers = #tpu.dot_dimension_numbers<[1], [0], [0], [1], [0, 0, 1, 1], [], []>} : vector<256x1xbf16>, vector<1x8xbf16>, vector<256x8xf32> -> vector<256x8xf32>
    %63 = arith.addf %56, %62 : vector<256x8xf32>
    %c0_87 = arith.constant 0 : index
    %c0_88 = arith.constant 0 : index
    %64 = vector.load %arg4[%c0_87, %c0_88] : memref<1x8xf32, #tpu.memory_space<vmem>>, vector<1x8xf32>
    %65 = vector.broadcast %64 : vector<1x8xf32> to vector<256x8xf32>
    %66 = arith.addf %63, %65 : vector<256x8xf32>
    %cst_89 = arith.constant 0.000000e+00 : f32
    %67 = vector.broadcast %cst_89 : f32 to vector<256x8xf32>
    %68 = arith.maximumf %66, %67 : vector<256x8xf32>
    %69 = vector.shape_cast %68 : vector<256x8xf32> to vector<16x16x8xf32>
    %70 = arith.truncf %69 : vector<16x16x8xf32> to vector<16x16x8xbf16>
    %c0_90 = arith.constant 0 : index
    %c0_91 = arith.constant 0 : index
    %c0_92 = arith.constant 0 : index
    %c0_93 = arith.constant 0 : index
    %c0_94 = arith.constant 0 : index
    %71 = vector.load %arg5[%c0_90, %c0_91, %c0_92, %c0_93, %c0_94] : memref<1x1x16x16x8xbf16, #tpu.memory_space<vmem>>, vector<1x1x16x16x8xbf16>
    %72 = vector.shape_cast %71 : vector<1x1x16x16x8xbf16> to vector<16x16x8xbf16>
    %73 = vector.shape_cast %70 : vector<16x16x8xbf16> to vector<1x1x16x16x8xbf16>
    tpu.vector_store %arg5[%c0_90, %c0_91, %c0_92, %c0_93, %c0_94], %73 {strides = array<i32>} : memref<1x1x16x16x8xbf16, #tpu.memory_space<vmem>>, vector<1x1x16x16x8xbf16>,
    return
  }
  func.func @transform_0(%arg0: i32, %arg1: i32) -> (i32, i32, i32, i32, i32) {
    %c0_i32 = arith.constant 0 : i32
    %c0_i32_0 = arith.constant 0 : i32
    %c0_i32_1 = arith.constant 0 : i32
    %c0_i32_2 = arith.constant 0 : i32
    return %arg0, %arg1, %c0_i32, %c0_i32_0, %c0_i32_1 : i32, i32, i32, i32, i32
  }
  func.func @transform_1(%arg0: i32, %arg1: i32) -> (i32, i32, i32, i32) {
    %c0_i32 = arith.constant 0 : i32
    %c0_i32_0 = arith.constant 0 : i32
    %c0_i32_1 = arith.constant 0 : i32
    %c0_i32_2 = arith.constant 0 : i32
    %c0_i32_3 = arith.constant 0 : i32
    return %c0_i32, %c0_i32_0, %c0_i32_1, %c0_i32_2 : i32, i32, i32, i32
  }
  func.func @transform_2(%arg0: i32, %arg1: i32) -> (i32, i32) {
    %c0_i32 = arith.constant 0 : i32
    %c0_i32_0 = arith.constant 0 : i32
    %c0_i32_1 = arith.constant 0 : i32
    return %c0_i32, %c0_i32_0 : i32, i32
  }
  func.func @transform_3(%arg0: i32, %arg1: i32) -> (i32, i32, i32, i32, i32) {
    %c0_i32 = arith.constant 0 : i32
    %c0_i32_0 = arith.constant 0 : i32
    %c0_i32_1 = arith.constant 0 : i32
    %c0_i32_2 = arith.constant 0 : i32
    return %arg0, %arg1, %c0_i32, %c0_i32_0, %c0_i32_1 : i32, i32, i32, i32, i32
  }
}

</mosaic_0001>

<bundles_post_ra>
// kernel: tpu_custom_call.1
= control target key start
LH: loop header
LB: loop body
LE: loop exit
PB: predicated region body
PF: predicated region fallthrough
CT: control target
= control target key end

     0   :  { %s6290_s12 = smov 0   ;;  %s6292_s13 = smov 0   ;;  %s8974_s0 = inlined_call_operand.vmem [shape: bf16[2,1,18,18,1], index: 0, kind: input, shape index: {}]   ;;  %s8975_s1 = inlined_call_operand.vmem [shape: bf16[3,3,1,8], index: 1, kind: input, shape index: {}]   ;;  %s8976_s2 = inlined_call_operand.vmem [shape: f32[1,8], index: 2, kind: input, shape index: {}]   ;;  %s8977_s3 = inlined_call_operand.vmem [shape: bf16[2,1,16,16,8], index: 3, kind: output, shape index: {}]  }
   0x1   :  { %s6294_s14 = smov 0  }
   0x2 LB: > { %s25_s15 = sadd.s32 1, %s6263_s13  ;;  %p5097_p0 = scmp.ge.s32.totalorder %s6267_s14, 1  ;;  %s6267_s14 = sphi %s6294_s14, %s13_s14   ;;  %s6263_s13 = sphi %s6292_s13, %s9239_s13   ;;  %s6259_s12 = sphi %s6290_s12, %s9238_s12  }
   0x3   : > { %p27_p1 = scmp.ge.s32.totalorder %s25_s15, 2  ;;  %p157_p2 = scmp.lt.s32.totalorder %s6267_s14, 3 }
   0x5   : > { %s9241_s15 = smov (%p27_p1, %s25_s15), 0  ;;  %p158_p3 = pnand %p5097_p0, %p157_p2 }
   0x7   : > { %161 = sbr.rel (%p158_p3) target bundleno = 559 (0x22f), region = 32 }
   0xc   : > { %v5101_v0 = vld [vmem:[%s8975_s1 + $0x1] sm:$0x1]  ;;  %vm743_vm0 = vcmask 1040384   ;;  %p189_p4 = scmp.lt.s32.totalorder %s6259_s12, 1  ;;  %v6269_v1 = vmov 0   ;;  %vm694_vm3 = vcmask 7168  }
   0xd   : > { %v6311_v2 = vsel %vm743_vm0, 65535, %v6269_v1  ;;  %v240_v4 = vld [vmem:[%s8975_s1] sm:$0x1]  ;;  %v5182_v5 = vld [vmem:[%s8975_s1 + $0x2] sm:$0x1]  ;;  %vm1250_vm5 = vcmask 1042432  }
   0xe   : > { %9007 = vst [vmem:[#allocation2_spill] sm:$0xff] %v6311_v2  ;;  %v747_v3 = vand.u32 %v5101_v0, %v6311_v2  ;;  %s9243_s12 = smov (!%p189_p4, %s6259_s12), 1  ;;  %v6323_v6 = vand.u32 %v6311_v2, %v240_v4  ;;  %v6326_v7 = vand.u32 %v5182_v5, %v6311_v2  ;;  %vm257_vm1 = vsmask.f32 3328  ;;  %v5247_v8 = vld [vmem:[%s8975_s1 + $0x3] sm:$0x1] }
   0xf   : > { %s6166_s22 = smul.u32 216, %s9243_s12  ;;  %vm258_vm2 = vsmask.f32 7440  ;;  %v5328_v9 = vld [vmem:[%s8975_s1 + $0x4] sm:$0x1]  ;;  %v6366_v21 = vand.u32 %v5247_v8, %v6311_v2  ;;  %vm1251_vm6 = vcmask 1046532  }
  0x10   : > { %6164 = vmatprep.subr.bf16.mxu1 %v747_v3  ;;  %5858 = vmatprep.subr.bf16.mxu0 %v747_v3  ;;  %v6369_v22 = vand.u32 %v5328_v9, %v6311_v2  ;;  %vm6384_vm4 = vmor %vm257_vm1, %vm258_vm2  ;;  %s5672_s17 = sshll.u32 %s9243_s12, 7  ;;  %vm4968_vm8 = vcmask 60416  }
  0x11   : > { %6165 = vmatpush3.bf16.msra.mxu1 %v747_v3  ;;  %5859 = vmatpush3.bf16.msra.mxu0 %v747_v3  ;;  %s6332_s25 = scalar_lea.vmem %s8974_s0, %s6166_s22  ;;  %vm6650_vm7 = vmor %vm1250_vm5, %vm1251_vm6  ;;  %s8795_s19 = scalar_lea.vmem %s8977_s3, %s5672_s17 }
  0x12   : > { %5892 = vmatprep.subr.bf16.mxu1 %v6323_v6  ;;  %5926 = vmatprep.subr.bf16.mxu0 %v6326_v7  ;;  %v6343_v10 = vld [vmem:[%s6332_s25] sm:$0xf]  ;;  %v6346_v11 = vld [vmem:[%s6332_s25 + $0x4] sm:$0xf]  ;;  %v6349_v12 = vld [vmem:[%s6332_s25 + $0x8] sm:$0x1] }
  0x13   : > { %v261_v13 = vshrl.u32 %v6343_v10, 16  ;;  %v264_v14 = vshll.u32 %v6343_v10, 16  ;;  %v270_v15 = vshll.u32 %v6346_v11, 16  ;;  %v274_v16 = vshrl.u32 %v6346_v11, 16  ;;  %v6356_v17 = vld [vmem:[%s6332_s25 + $0x60] sm:$0xf] }
  0x14   : > { %v280_v18 = vshll.u32 %v6349_v12, 16  ;;  %v6360_v19 = vld [vmem:[%s6332_s25 + $0x64] sm:$0xf]  ;;  %v6363_v20 = vld [vmem:[%s6332_s25 + $0x68] sm:$0x1]  ;;  %v453_v28 = vshrl.u32 %v6356_v17, 16 }
  0x15   : > { %v263_v23 = vrot.slane %v261_v13, 4  ;;  %v266_v24 = vrot.slane %v264_v14, 5  ;;  %v272_v25 = vrot.slane %v270_v15, 5  ;;  %v276_v26 = vrot.slane %v274_v16, 4  ;;  %v6377_v35 = vld [vmem:[%s6332_s25 + $0xc] sm:$0xf] }
  0x16   : > { %v282_v27 = vrot.slane %v280_v18, 5  ;;  %v456_v29 = vshll.u32 %v6356_v17, 16  ;;  %v462_v30 = vshll.u32 %v6360_v19, 16  ;;  %v466_v33 = vshrl.u32 %v6360_v19, 16  ;;  %v6380_v36 = vld [vmem:[%s6332_s25 + $0x10] sm:$0xf] }
  0x17   : > { %v267_v31 = vor.u32 %v266_v24, %v263_v23  ;;  %v277_v32 = vor.u32 %v276_v26, %v272_v25  ;;  %v472_v34 = vshll.u32 %v6363_v20, 16  ;;  %v455_v39 = vrot.slane %v453_v28, 4  ;;  %v6390_v47 = vld [vmem:[%s6332_s25 + $0x14] sm:$0x1]  ;;  %v226_v59 = vld [vmem:[%s6332_s25 + $0x6c] sm:$0xf] }
  0x18   : > { %v458_v40 = vrot.slane %v456_v29, 5  ;;  %v464_v41 = vrot.slane %v462_v30, 5  ;;  %v468_v44 = vrot.slane %v466_v33, 4  ;;  %v285_v48 = vshrl.u32 %v6377_v35, 16  ;;  %v6403_v0 = vld [vmem:[%s6332_s25 + $0x70] sm:$0xf] }
  0x19   : > { %v268_v42 = vrot.slane %v267_v31, 4  ;;  %v278_v43 = vrot.slane %v277_v32, 4  ;;  %v474_v45 = vrot.slane %v472_v34, 5  ;;  %v288_v49 = vshll.u32 %v6377_v35, 16  ;;  %v6411_v8 = vld [vmem:[%s6332_s25 + $0x74] sm:$0x1] }
  0x1a   : > { %v459_v46 = vor.u32 %v458_v40, %v455_v39  ;;  %v294_v50 = vshll.u32 %v6380_v36, 16  ;;  %v469_v53 = vor.u32 %v468_v44, %v464_v41  ;;  %v298_v54 = vshrl.u32 %v6380_v36, 16  ;;  %v6416_v16 = vld [vmem:[%s6332_s25 + $0x18] sm:$0xf]  ;;  %v6422_v30 = vld [vmem:[%s6332_s25 + $0x1c] sm:$0xf] }
  0x1b   : > { %v273_v51 = vsel %vm6384_vm4, %v268_v42, %v272_v25  ;;  %v283_v52 = vsel %vm6384_vm4, %v278_v43, %v282_v27  ;;  %v287_v57 = vrot.slane %v285_v48, 4  ;;  %v290_v58 = vrot.slane %v288_v49, 5  ;;  %v6428_v34 = vld [vmem:[%s6332_s25 + $0x20] sm:$0x1]  ;;  %v228_v44 = vld [vmem:[%s6332_s25 + $0x78] sm:$0xf] }
  0x1c   : > { %v5102_v55 = vcombine.low %v273_v51, %v283_v52  ;;  %v460_v56 = vrot.slane %v459_v46, 4  ;;  %v470_v60 = vrot.slane %v469_v53, 4  ;;  %v296_v61 = vrot.slane %v294_v50, 5 }
  0x1d   : > { %v300_v62 = vrot.slane %v298_v54, 4  ;;  %v304_v63 = vshll.u32 %v6390_v47, 16  ;;  %v291_v3 = vor.u32 %v290_v58, %v287_v57  ;;  %v477_v15 = vshrl.u32 %v226_v59, 16  ;;  %v6439_v54 = vld [vmem:[%s6332_s25 + $0x7c] sm:$0xf] }
  0x1e   : > { %5860 = vmatprep.mubr.msk.bf16.mxu0 %vm694_vm3, %v5102_v55  ;;  %v465_v1 = vsel %vm6384_vm4, %v460_v56, %v464_v41  ;;  %v475_v9 = vsel %vm6384_vm4, %v470_v60, %v474_v45  ;;  %v480_v24 = vshll.u32 %v226_v59, 16  ;;  %v486_v25 = vshll.u32 %v6403_v0, 16  ;;  %9010 = vst [vmem:[#allocation3_spill] sm:$0xff] %v6439_v54 }
  0x1f   : > { %v301_v13 = vor.u32 %v300_v62, %v296_v61  ;;  %v306_v14 = vrot.slane %v304_v63, 5  ;;  %v5110_v18 = vcombine.low %v465_v1, %v475_v9  ;;  %v292_v23 = vrot.slane %v291_v3, 4  ;;  %v6444_v63 = vld [vmem:[%s6332_s25 + $0x80] sm:$0x1] }
  0x20   : > { %v479_v27 = vrot.slane %v477_v15, 4  ;;  %v490_v28 = vshrl.u32 %v6403_v0, 16  ;;  %v496_v29 = vshll.u32 %v6411_v8, 16  ;;  %v482_v32 = vrot.slane %v480_v24, 5  ;;  %9011 = vst [vmem:[#allocation4_spill] sm:$0xff] %v6444_v63 }
  0x21   : > { %v302_v26 = vrot.slane %v301_v13, 4  ;;  %5876 = vmatprep.mubr.msk.bf16.mxu1 %vm694_vm3, %v5110_v18  ;;  %v297_v31 = vsel %vm6384_vm4, %v292_v23, %v296_v61  ;;  %v488_v33 = vrot.slane %v486_v25, 5  ;;  %v309_v39 = vshrl.u32 %v6416_v16, 16  ;;  %v6457_v24 = vld [vmem:[%s6332_s25 + $0x28] sm:$0xf] }
  0x22   : > { %v492_v41 = vrot.slane %v490_v28, 4  ;;  %v498_v42 = vrot.slane %v496_v29, 5  ;;  %v312_v43 = vshll.u32 %v6416_v16, 16  ;;  %v483_v46 = vor.u32 %v482_v32, %v479_v27 }
  0x23   : > { %v307_v40 = vsel %vm6384_vm4, %v302_v26, %v306_v14  ;;  %v311_v48 = vrot.slane %v309_v39, 4  ;;  %v318_v49 = vshll.u32 %v6422_v30, 16  ;;  %v322_v52 = vshrl.u32 %v6422_v30, 16  ;;  %v6450_v14 = vld [vmem:[%s6332_s25 + $0x24] sm:$0xf] }
  0x24   : > { %v5103_v45 = vcombine.low %v297_v31, %v307_v40  ;;  %v493_v50 = vor.u32 %v492_v41, %v488_v33  ;;  %v314_v51 = vrot.slane %v312_v43, 5  ;;  %v328_v53 = vshll.u32 %v6428_v34, 16 }
  0x25   : > { %v484_v55 = vrot.slane %v483_v46, 4  ;;  %v320_v56 = vrot.slane %v318_v49, 5  ;;  %v501_v57 = vshrl.u32 %v228_v44, 16  ;;  %v504_v58 = vshll.u32 %v228_v44, 16  ;;  %v6470_v44 = vld [vmem:[%s6332_s25 + $0x84] sm:$0xf] }
  0x26   : > { %5861 = vmatmul.mubr.msk.bf16.vlgmr.msra.gmra.mxu0 %vm694_vm3, %v5103_v45  ;;  %v494_v59 = vrot.slane %v493_v50, 4  ;;  %v315_v60 = vor.u32 %v314_v51, %v311_v48  ;;  %v324_v61 = vrot.slane %v322_v52, 4  ;;  %v330_v62 = vrot.slane %v328_v53, 5  ;;  %v6477_v50 = vld [vmem:[%s6332_s25 + $0x88] sm:$0xf] }
  0x27   : > { %5927 = vmatpush3.bf16.msra.mxu0 %v6326_v7  ;;  %v489_v1 = vsel %vm6384_vm4, %v484_v55, %v488_v33  ;;  %v503_v3 = vrot.slane %v501_v57, 4  ;;  %v506_v9 = vrot.slane %v504_v58, 5  ;;  %v510_v13 = vshll.u32 %v6439_v54, 16  ;;  %v6463_v33 = vld [vmem:[%s6332_s25 + $0x2c] sm:$0x1] }
  0x28   : > { %5994 = vmatprep.subr.bf16.mxu0 %v6369_v22  ;;  %v499_v7 = vsel %vm6384_vm4, %v494_v59, %v498_v42  ;;  %v316_v15 = vrot.slane %v315_v60, 4  ;;  %v325_v18 = vor.u32 %v324_v61, %v320_v56  ;;  %v514_v23 = vshrl.u32 %v6439_v54, 16  ;;  %v6484_v58 = vld [vmem:[%s6332_s25 + $0x8c] sm:$0x1] }
  0x29   : > { %v5111_v25 = vcombine.low %v489_v1, %v499_v7  ;;  %v507_v26 = vor.u32 %v506_v9, %v503_v3  ;;  %v512_v27 = vrot.slane %v510_v13, 5  ;;  %v520_v28 = vshll.u32 %v6444_v63, 16  ;;  %v6492_v3 = vld [vmem:[%s6332_s25 + $0x30] sm:$0xf] }
  0x2a   : > { %v321_v29 = vsel %vm6384_vm4, %v316_v15, %v320_v56  ;;  %v326_v31 = vrot.slane %v325_v18, 4  ;;  %v516_v32 = vrot.slane %v514_v23, 4  ;;  %v333_v39 = vshrl.u32 %v6450_v14, 16  ;;  %v6497_v18 = vld [vmem:[%s6332_s25 + $0x34] sm:$0xf] }
  0x2b   : > { %5877 = vmatmul.mubr.msk.bf16.vlgmr.msra.gmra.mxu1 %vm694_vm3, %v5111_v25  ;;  %v508_v40 = vrot.slane %v507_v26, 4  ;;  %v522_v41 = vrot.slane %v520_v28, 5  ;;  %v336_v42 = vshll.u32 %v6450_v14, 16  ;;  %v342_v43 = vshll.u32 %v6457_v24, 16 }
  0x2c   : > { %5893 = vmatpush3.bf16.msra.mxu1 %v6323_v6  ;;  %v331_v45 = vsel %vm6384_vm4, %v326_v31, %v330_v62  ;;  %v517_v46 = vor.u32 %v516_v32, %v512_v27  ;;  %v335_v48 = vrot.slane %v333_v39, 4  ;;  %v346_v49 = vshrl.u32 %v6457_v24, 16 }
  0x2d   : > { %v5104_v51 = vcombine.low %v321_v29, %v331_v45  ;;  %v513_v52 = vsel %vm6384_vm4, %v508_v40, %v512_v27  ;;  %v338_v53 = vrot.slane %v336_v42, 5  ;;  %v344_v55 = vrot.slane %v342_v43, 5  ;;  %5960 = vmatprep.subr.bf16.mxu1 %v6366_v21  ;;  %v6510_v45 = vld [vmem:[%s6332_s25 + $0x90] sm:$0xf] }
  0x2e   : > { %v518_v6 = vrot.slane %v517_v46, 4  ;;  %v348_v56 = vrot.slane %v346_v49, 4  ;;  %v352_v57 = vshll.u32 %v6463_v33, 16  ;;  %v525_v59 = vshrl.u32 %v6470_v44, 16 }
  0x2f   : > { %5864 = vmatprep.mubr.msk.bf16.mxu0 %vm694_vm3, %v5104_v51  ;;  %v339_v60 = vor.u32 %v338_v53, %v335_v48  ;;  %v528_v61 = vshll.u32 %v6470_v44, 16  ;;  %v534_v62 = vshll.u32 %v6477_v50, 16  ;;  %v538_v1 = vshrl.u32 %v6477_v50, 16 }
  0x30   : > { %v523_v9 = vsel %vm6384_vm4, %v518_v6, %v522_v41  ;;  %v349_v13 = vor.u32 %v348_v56, %v344_v55  ;;  %v354_v7 = vrot.slane %v352_v57, 5  ;;  %v527_v15 = vrot.slane %v525_v59, 4  ;;  %v6505_v41 = vld [vmem:[%s6332_s25 + $0x38] sm:$0x1] }
  0x31   : > { %v5112_v23 = vcombine.low %v513_v52, %v523_v9  ;;  %v340_v25 = vrot.slane %v339_v60, 4  ;;  %v530_v26 = vrot.slane %v528_v61, 5  ;;  %v536_v27 = vrot.slane %v534_v62, 5  ;;  %v6515_v52 = vld [vmem:[%s6332_s25 + $0x94] sm:$0xf] }
  0x32   : > { %v350_v28 = vrot.slane %v349_v13, 4  ;;  %v540_v29 = vrot.slane %v538_v1, 4  ;;  %v544_v31 = vshll.u32 %v6484_v58, 16  ;;  %v357_v32 = vshrl.u32 %v6492_v3, 16  ;;  %v6524_v9 = vld [vmem:[%s6332_s25 + $0x98] sm:$0x1] }
  0x33   : > { %5880 = vmatprep.mubr.msk.bf16.mxu1 %vm694_vm3, %v5112_v23  ;;  %v345_v39 = vsel %vm6384_vm4, %v340_v25, %v344_v55  ;;  %v531_v40 = vor.u32 %v530_v26, %v527_v15  ;;  %v360_v42 = vshll.u32 %v6492_v3, 16  ;;  %v366_v43 = vshll.u32 %v6497_v18, 16  ;;  %9012 = vst [vmem:[#allocation5_spill] sm:$0xff] %v6524_v9  ;;  %v6529_v15 = vld [vmem:[%s6332_s25 + $0x3c] sm:$0xf] }
  0x34   : > { %v355_v46 = vsel %vm6384_vm4, %v350_v28, %v354_v7  ;;  %v541_v48 = vor.u32 %v540_v29, %v536_v27  ;;  %v546_v49 = vrot.slane %v544_v31, 5  ;;  %v359_v51 = vrot.slane %v357_v32, 4  ;;  %v6534_v29 = vld [vmem:[%s6332_s25 + $0x40] sm:$0xf] }
  0x35   : > { %v5105_v53 = vcombine.low %v345_v39, %v355_v46  ;;  %v532_v55 = vrot.slane %v531_v40, 4  ;;  %v362_v6 = vrot.slane %v360_v42, 5  ;;  %v368_v56 = vrot.slane %v366_v43, 5 }
  0x36   : > { %v542_v57 = vrot.slane %v541_v48, 4  ;;  %v370_v59 = vshrl.u32 %v6497_v18, 16  ;;  %v376_v60 = vshll.u32 %v6505_v41, 16  ;;  %v549_v61 = vshrl.u32 %v6510_v45, 16 }
  0x37   : > { %5865 = vmatmul.mubr.msk.bf16.gmra.mxu0 %vm694_vm3, %v5105_v53  ;;  %v537_v62 = vsel %vm6384_vm4, %v532_v55, %v536_v27  ;;  %v363_v1 = vor.u32 %v362_v6, %v359_v51  ;;  %v552_v13 = vshll.u32 %v6510_v45, 16  ;;  %v558_v7 = vshll.u32 %v6515_v52, 16  ;;  %v6543_v51 = vld [vmem:[%s6332_s25 + $0x44] sm:$0x1]  ;;  %v6548_v6 = vld [vmem:[%s6332_s25 + $0x9c] sm:$0xf] }
  0x38   : > { %v547_v23 = vsel %vm6384_vm4, %v542_v57, %v546_v49  ;;  %v372_v25 = vrot.slane %v370_v59, 4  ;;  %v378_v26 = vrot.slane %v376_v60, 5  ;;  %v551_v28 = vrot.slane %v549_v61, 4  ;;  %9013 = vst [vmem:[#allocation6_spill] sm:$0xff] %v6548_v6 }
  0x39   : > { %v5113_v27 = vcombine.low %v537_v62, %v547_v23  ;;  %v364_v31 = vrot.slane %v363_v1, 4  ;;  %v554_v32 = vrot.slane %v552_v13, 5  ;;  %v560_v39 = vrot.slane %v558_v7, 5  ;;  %v6552_v7 = vld [vmem:[%s6332_s25 + $0xa0] sm:$0xf] }
  0x3a   : > { %v373_v40 = vor.u32 %v372_v25, %v368_v56  ;;  %v562_v42 = vshrl.u32 %v6515_v52, 16  ;;  %v568_v43 = vshll.u32 %v6524_v9, 16  ;;  %v381_v46 = vshrl.u32 %v6529_v15, 16  ;;  %9014 = vst [vmem:[#allocation7_spill] sm:$0xff] %v6552_v7  ;;  %v1203_v9 = vld [vmem:[%s6332_s25 + $0xc] sm:$0xe] }
  0x3b   : > { %5881 = vmatmul.mubr.msk.bf16.gmra.mxu1 %vm694_vm3, %v5113_v27  ;;  %v369_v48 = vsel %vm6384_vm4, %v364_v31, %v368_v56  ;;  %v555_v49 = vor.u32 %v554_v32, %v551_v28  ;;  %v384_v53 = vshll.u32 %v6529_v15, 16  ;;  %v390_v55 = vshll.u32 %v6534_v29, 16  ;;  %v6558_v27 = vld [vmem:[%s6332_s25 + $0xa4] sm:$0x1]  ;;  %v6562_v32 = vld [vmem:[%s6332_s25 + $0x48] sm:$0xf] }
  0x3c   : > { %v374_v57 = vrot.slane %v373_v40, 4  ;;  %v564_v59 = vrot.slane %v562_v42, 4  ;;  %v570_v60 = vrot.slane %v568_v43, 5  ;;  %v383_v61 = vrot.slane %v381_v46, 4  ;;  %9015 = vst [vmem:[#allocation8_spill] sm:$0xff] %v6558_v27 }
  0x3d   : > { %v556_v62 = vrot.slane %v555_v49, 4  ;;  %v386_v1 = vrot.slane %v384_v53, 5  ;;  %v392_v13 = vrot.slane %v390_v55, 5  ;;  %v394_v56 = vshrl.u32 %v6534_v29, 16 }
  0x3e   : > { %v379_v23 = vsel %vm6384_vm4, %v374_v57, %v378_v26  ;;  %v565_v25 = vor.u32 %v564_v59, %v560_v39  ;;  %v400_v28 = vshll.u32 %v6543_v51, 16  ;;  %v573_v31 = vshrl.u32 %v6548_v6, 16 }
  0x3f   : > { %v5106_v40 = vcombine.low %v369_v48, %v379_v23  ;;  %v561_v42 = vsel %vm6384_vm4, %v556_v62, %v560_v39  ;;  %v387_v43 = vor.u32 %v386_v1, %v383_v61  ;;  %v396_v46 = vrot.slane %v394_v56, 4  ;;  %v6571_v23 = vld [vmem:[%s6332_s25 + $0x4c] sm:$0xf]  ;;  %v6577_v1 = vld [vmem:[%s6332_s25 + $0x50] sm:$0x1] }
  0x40   : > { %v566_v49 = vrot.slane %v565_v25, 4  ;;  %v402_v53 = vrot.slane %v400_v28, 5  ;;  %v575_v26 = vrot.slane %v573_v31, 4  ;;  %v576_v55 = vshll.u32 %v6548_v6, 16 }
  0x41   : > { %5868 = vmatprep.mubr.msk.bf16.mxu0 %vm694_vm3, %v5106_v40  ;;  %v388_v57 = vrot.slane %v387_v43, 4  ;;  %v397_v59 = vor.u32 %v396_v46, %v392_v13  ;;  %v582_v5 = vshll.u32 %v6552_v7, 16  ;;  %v586_v48 = vshrl.u32 %v6552_v7, 16  ;;  %v6583_v43 = vld [vmem:[%s6332_s25 + $0xa8] sm:$0xf] }
  0x42   : > { %v571_v39 = vsel %vm6384_vm4, %v566_v49, %v570_v60  ;;  %v578_v61 = vrot.slane %v576_v55, 5  ;;  %v592_v62 = vshll.u32 %v6558_v27, 16  ;;  %v405_v56 = vshrl.u32 %v6562_v32, 16  ;;  %9016 = vst [vmem:[#allocation9_spill] sm:$0xff] %v6583_v43 }
  0x43   : > { %v5114_v25 = vcombine.low %v561_v42, %v571_v39  ;;  %v393_v28 = vsel %vm6384_vm4, %v388_v57, %v392_v13  ;;  %v398_v31 = vrot.slane %v397_v59, 4  ;;  %v584_v40 = vrot.slane %v582_v5, 5 }
  0x44   : > { %v579_v46 = vor.u32 %v578_v61, %v575_v26  ;;  %v588_v38 = vrot.slane %v586_v48, 4  ;;  %v594_v60 = vrot.slane %v592_v62, 5  ;;  %v407_v49 = vrot.slane %v405_v56, 4  ;;  %v6593_v48 = vld [vmem:[%s6332_s25 + $0xac] sm:$0xf] }
  0x45   : > { %5884 = vmatprep.mubr.msk.bf16.mxu1 %vm694_vm3, %v5114_v25  ;;  %v403_v55 = vsel %vm6384_vm4, %v398_v31, %v402_v53  ;;  %v408_v42 = vshll.u32 %v6562_v32, 16  ;;  %v414_v39 = vshll.u32 %v6571_v23, 16  ;;  %v418_v13 = vshrl.u32 %v6571_v23, 16  ;;  %9017 = vst [vmem:[#allocation10_spill] sm:$0xff] %v6593_v48  ;;  %v6596_v25 = vld [vmem:[%s6332_s25 + $0xb0] sm:$0x1] }
  0x46   : > { %v5107_v57 = vcombine.low %v393_v28, %v403_v55  ;;  %v580_v5 = vrot.slane %v579_v46, 4  ;;  %v589_v59 = vor.u32 %v588_v38, %v584_v40  ;;  %v424_v26 = vshll.u32 %v6577_v1, 16  ;;  %9018 = vst [vmem:[#allocation11_spill] sm:$0xff] %v6596_v25 }
  0x47   : > { %v410_v61 = vrot.slane %v408_v42, 5  ;;  %v416_v62 = vrot.slane %v414_v39, 5  ;;  %v420_v56 = vrot.slane %v418_v13, 4  ;;  %v597_v53 = vshrl.u32 %v6583_v43, 16  ;;  %v6605_v13 = vld [vmem:[%s6332_s25 + $0x54] sm:$0xf] }
  0x48   : > { %5869 = vmatmul.mubr.msk.bf16.gmra.mxu0 %vm694_vm3, %v5107_v57  ;;  %v585_v28 = vsel %vm6384_vm4, %v580_v5, %v584_v40  ;;  %v590_v31 = vrot.slane %v589_v59, 4  ;;  %v426_v38 = vrot.slane %v424_v26, 5  ;;  %v600_v46 = vshll.u32 %v6583_v43, 16  ;;  %v6612_v59 = vld [vmem:[%s6332_s25 + $0x58] sm:$0xf] }
  0x49   : > { %v411_v55 = vor.u32 %v410_v61, %v407_v49  ;;  %v421_v4 = vor.u32 %v420_v56, %v416_v62  ;;  %v599_v42 = vrot.slane %v597_v53, 4  ;;  %v606_v39 = vshll.u32 %v6593_v48, 16  ;;  %v6615_v53 = vld [vmem:[%s6332_s25 + $0x5c] sm:$0x1] }
  0x4a   : > { %v595_v57 = vsel %vm6384_vm4, %v590_v31, %v594_v60  ;;  %v602_v2 = vrot.slane %v600_v46, 5  ;;  %v610_v40 = vshrl.u32 %v6593_v48, 16  ;;  %v616_v5 = vshll.u32 %v6596_v25, 16  ;;  %v1202_v25 = vld [vmem:[%s6332_s25] sm:$0xe] }
  0x4b   : > { %v5115_v49 = vcombine.low %v585_v28, %v595_v57  ;;  %v412_v26 = vrot.slane %v411_v55, 4  ;;  %v422_v61 = vrot.slane %v421_v4, 4  ;;  %v608_v56 = vrot.slane %v606_v39, 5  ;;  %v6626_v55 = vld [vmem:[%s6332_s25 + $0xb4] sm:$0xf] }
  0x4c   : > { %v603_v63 = vor.u32 %v602_v2, %v599_v42  ;;  %v612_v43 = vrot.slane %v610_v40, 4  ;;  %v618_v27 = vrot.slane %v616_v5, 5  ;;  %v429_v60 = vshrl.u32 %v6605_v13, 16  ;;  %9019 = vst [vmem:[#allocation12_spill] sm:$0xff] %v6626_v55  ;;  %v6629_v40 = vld [vmem:[%s6332_s25 + $0xb8] sm:$0xf] }
  0x4d   : > { %5885 = vmatmul.mubr.msk.bf16.gmra.mxu1 %vm694_vm3, %v5115_v49  ;;  %v417_v31 = vsel %vm6384_vm4, %v412_v26, %v416_v62  ;;  %v427_v28 = vsel %vm6384_vm4, %v422_v61, %v426_v38  ;;  %v432_v4 = vshll.u32 %v6605_v13, 16  ;;  %v438_v46 = vshll.u32 %v6612_v59, 16  ;;  %v6634_v38 = vld [vmem:[%s6332_s25 + $0xbc] sm:$0x1] }
  0x4e   : > { %v5108_v2 = vcombine.low %v417_v31, %v427_v28  ;;  %v604_v42 = vrot.slane %v603_v63, 4  ;;  %v613_v39 = vor.u32 %v612_v43, %v608_v56  ;;  %v431_v57 = vrot.slane %v429_v60, 4 }
  0x4f   : > { %v434_v5 = vrot.slane %v432_v4, 5  ;;  %v440_v49 = vrot.slane %v438_v46, 5  ;;  %v442_v62 = vshrl.u32 %v6612_v59, 16  ;;  %v448_v26 = vshll.u32 %v6615_v53, 16 }
  0x50   : > { %5872 = vmatprep.mubr.msk.bf16.mxu0 %vm694_vm3, %v5108_v2  ;;  %v609_v61 = vsel %vm6384_vm4, %v604_v42, %v608_v56  ;;  %v614_v31 = vrot.slane %v613_v39, 4  ;;  %v621_v63 = vshrl.u32 %v6626_v55, 16  ;;  %v624_v43 = vshll.u32 %v6626_v55, 16 }
  0x51   : > { %v435_v60 = vor.u32 %v434_v5, %v431_v57  ;;  %v444_v28 = vrot.slane %v442_v62, 4  ;;  %v450_v4 = vrot.slane %v448_v26, 5  ;;  %v630_v46 = vshll.u32 %v6629_v40, 16 }
  0x52   : > { %v619_v48 = vsel %vm6384_vm4, %v614_v31, %v618_v27  ;;  %v623_v54 = vrot.slane %v621_v63, 4  ;;  %v626_v2 = vrot.slane %v624_v43, 5  ;;  %v634_v6 = vshrl.u32 %v6629_v40, 16 }
  0x53   : > { %v5116_v56 = vcombine.low %v609_v61, %v619_v48  ;;  %v436_v42 = vrot.slane %v435_v60, 4  ;;  %v445_v39 = vor.u32 %v444_v28, %v440_v49  ;;  %v632_v7 = vrot.slane %v630_v46, 5  ;;  %v1204_v60 = vld [vmem:[%s6332_s25 + $0x18] sm:$0xe] }
  0x54   : > { %v627_v55 = vor.u32 %v626_v2, %v623_v54  ;;  %v636_v57 = vrot.slane %v634_v6, 4  ;;  %v640_v5 = vshll.u32 %v6634_v38, 16  ;;  %v5166_v27 = vrot.slane %v1202_v25, 9 }
  0x55   : > { %5888 = vmatprep.mubr.msk.bf16.mxu1 %vm694_vm3, %v5116_v56  ;;  %v441_v48 = vsel %vm6384_vm4, %v436_v42, %v440_v49  ;;  %v446_v26 = vrot.slane %v445_v39, 4  ;;  %v1255_v61 = vrot.slane %v6346_v11, 5  ;;  %v5135_v54 = vcombine.low %v6377_v35, %v6380_v36 }
  0x56   : > { %v628_v6 = vrot.slane %v627_v55, 4  ;;  %v637_v31 = vor.u32 %v636_v57, %v632_v7  ;;  %v642_v63 = vrot.slane %v640_v5, 5  ;;  %v5167_v43 = vrot.slane %v1203_v9, 9  ;;  %v1205_v5 = vld [vmem:[%s6332_s25 + $0x24] sm:$0xe] }
  0x57   : > { %v451_v25 = vsel %vm6384_vm4, %v446_v26, %v450_v4  ;;  %v1256_v28 = vsel %vm6650_vm7, %v5166_v27, %v1255_v61  ;;  %v1257_v46 = vrot.slane %v1255_v61, 4  ;;  %v9022_v49 = vrot.slane %v6380_v36, 5 }
  0x58   : > { %v5109_v56 = vcombine.low %v441_v48, %v451_v25  ;;  %v633_v42 = vsel %vm6384_vm4, %v628_v6, %v632_v7  ;;  %v638_v55 = vrot.slane %v637_v31, 4  ;;  %v9023_v39 = vrot.slane %v6349_v12, 5 }
  0x59   : > { %v1264_v2 = vrot.slane %v9022_v49, 4  ;;  %v5136_v4 = vcombine.low %v6416_v16, %v6422_v30  ;;  %v5168_v57 = vrot.slane %v1204_v60, 9  ;;  %v5134_v48 = vcombine.low %v6343_v10, %v6346_v11  ;;  %v1206_v60 = vld [vmem:[%s6332_s25 + $0x30] sm:$0xe] }
  0x5a   : > { %v1259_v9 = vsel %vm6650_vm7, %v1257_v46, %v9023_v39  ;;  %5873 = vmatmul.mubr.msk.bf16.gmra.mxu0 %vm694_vm3, %v5109_v56  ;;  %v643_v27 = vsel %vm6384_vm4, %v638_v55, %v642_v63  ;;  %v1269_v12 = vrot.slane %v6422_v30, 5  ;;  %v9024_v61 = vmov %v9022_v49 }
  0x5b   : > { %v5183_v7 = vcombine.low %v1256_v28, %v1259_v9  ;;  %v5117_v26 = vcombine.low %v633_v42, %v643_v27  ;;  %v1263_v16 = vsel %vm6650_vm7, %v5167_v43, %v9024_v61  ;;  %v9025_v6 = vrot.slane %v6390_v47, 5  ;;  %v1207_v28 = vld [vmem:[%s6332_s25 + $0x3c] sm:$0xe] }
  0x5c   : > { %v1272_v63 = vrot.slane %v6428_v34, 5  ;;  %v1270_v10 = vsel %vm6650_vm7, %v5168_v57, %v1269_v12  ;;  %v1271_v11 = vrot.slane %v1269_v12, 4  ;;  %v5169_v30 = vrot.slane %v1205_v5, 9  ;;  %v1209_v12 = vld [vmem:[%s6332_s25 + $0x54] sm:$0xe] }
  0x5d   : > { %v1266_v31 = vsel %vm6650_vm7, %v1264_v2, %v9025_v6  ;;  %5928 = vmatprep.mubr.msk.bf16.mxu0 %vm694_vm3, %v5183_v7  ;;  %v1276_v25 = vrot.slane %v6457_v24, 5  ;;  %5889 = vmatmul.mubr.msk.bf16.gmra.mxu1 %vm694_vm3, %v5117_v26  ;;  %v1279_v47 = vrot.slane %v6463_v33, 5  ;;  %v1283_v43 = vrot.slane %v6497_v18, 5  ;;  %v1208_v2 = vld [vmem:[%s6332_s25 + $0x48] sm:$0xe] }
  0x5e   : > { %5894 = vmatprep.mubr.msk.bf16.mxu1 %vm694_vm3, %v5134_v48  ;;  %v5184_v34 = vcombine.low %v1263_v16, %v1266_v31  ;;  %v1273_v46 = vsel %vm6650_vm7, %v1271_v11, %v1272_v63  ;;  %v5170_v42 = vrot.slane %v1206_v60, 9  ;;  %v1286_v55 = vrot.slane %v6505_v41, 5 }
  0x5f   : > { %v1278_v49 = vrot.slane %v1276_v25, 4  ;;  %v5185_v56 = vcombine.low %v1270_v10, %v1273_v46  ;;  %v1277_v39 = vsel %vm6650_vm7, %v5169_v30, %v1276_v25  ;;  %v1285_v33 = vrot.slane %v1283_v43, 4 }
  0x60   : > { %v5171_v9 = vrot.slane %v1207_v28, 9  ;;  %v1290_v57 = vrot.slane %v6534_v29, 5  ;;  %v1293_v27 = vrot.slane %v6543_v51, 5  ;;  %v5172_v48 = vrot.slane %v1208_v2, 9  ;;  %v1210_v51 = vld [vmem:[%s6332_s25 + $0x60] sm:$0xe] }
  0x61   : > { %v1280_v5 = vsel %vm6650_vm7, %v1278_v49, %v1279_v47  ;;  %v1297_v7 = vrot.slane %v6571_v23, 5  ;;  %v1300_v26 = vrot.slane %v6577_v1, 5  ;;  %v1314_v61 = vrot.slane %v6363_v20, 5  ;;  %v6753_v47 = vld [vmem:[%s6332_s25 + $0x6c] sm:$0xe] }
  0x62   : > { %5929 = vmatmul.mubr.msk.bf16.vlgmr.msra.gmra.mxu0 %vm694_vm3, %v5184_v34  ;;  %v1292_v41 = vrot.slane %v1290_v57, 4  ;;  %v1284_v16 = vsel %vm6650_vm7, %v5170_v42, %v1283_v43  ;;  %v5186_v31 = vcombine.low %v1277_v39, %v1280_v5  ;;  %v1287_v63 = vsel %vm6650_vm7, %v1285_v33, %v1286_v55  ;;  %v6774_v2 = vld [vmem:[%s6332_s25 + $0x78] sm:$0xe] }
  0x63   : > { %5995 = vmatpush3.bf16.msra.mxu0 %v6369_v22  ;;  %5932 = vmatprep.mubr.msk.bf16.mxu0 %vm694_vm3, %v5185_v56  ;;  %v1299_v6 = vrot.slane %v1297_v7, 4  ;;  %v6725_v60 = vsel %vm6650_vm7, %v5171_v9, %v1290_v57  ;;  %v1304_v1 = vrot.slane %v6612_v59, 5  ;;  %v6734_v20 = vsel %vm6650_vm7, %v5172_v48, %v1297_v7  ;;  %v1214_v56 = vld [vmem:[%s6332_s25 + $0x90] sm:$0xe]  ;;  %v1215_v48 = vld [vmem:[%s6332_s25 + $0x9c] sm:$0xe] }
  0x64   : > { %v5173_v22 = vrot.slane %v1209_v12, 9  ;;  %v1307_v10 = vrot.slane %v6615_v53, 5  ;;  %v1311_v11 = vrot.slane %v6360_v19, 5  ;;  %v1294_v35 = vsel %vm6650_vm7, %v1292_v41, %v1293_v27 }
  0x65   : > { %5895 = vmatmul.mubr.msk.bf16.vlgmr.msra.gmra.mxu1 %vm694_vm3, %v5135_v54  ;;  %v6744_v36 = vsel %vm6650_vm7, %v1299_v6, %v1300_v26  ;;  %v1306_v54 = vrot.slane %v1304_v1, 4  ;;  %v5174_v30 = vrot.slane %v1210_v51, 9  ;;  %v5137_v53 = vcombine.low %v6450_v14, %v6457_v24  ;;  %v1213_v14 = vld [vmem:[%s6332_s25 + $0x84] sm:$0xe]  ;;  %v1216_v26 = vld [vmem:[%s6332_s25 + $0xa8] sm:$0xe] }
  0x66   : > { %5961 = vmatpush3.bf16.msra.mxu1 %v6366_v21  ;;  %5898 = vmatprep.mubr.msk.bf16.mxu1 %vm694_vm3, %v5136_v4  ;;  %v5138_v25 = vcombine.low %v6492_v3, %v6497_v18  ;;  %v5187_v21 = vcombine.low %v1284_v16, %v1287_v63  ;;  %v5139_v4 = vcombine.low %v6529_v15, %v6534_v29  ;;  %v1313_v46 = vrot.slane %v1311_v11, 4  ;;  %v9026_v51 = vld [vmem:[#allocation5_spill] sm:$0xff]  ;;  %v9027_v63 = vld [vmem:[#allocation7_spill] sm:$0xff] }
  0x67   : > { %v5140_v43 = vcombine.low %v6562_v32, %v6571_v23  ;;  %v5141_v28 = vcombine.low %v6605_v13, %v6612_v59  ;;  %v5142_v34 = vcombine.low %v6356_v17, %v6360_v19  ;;  %v5188_v24 = vcombine.low %v6725_v60, %v1294_v35  ;;  %v9028_v60 = vld [vmem:[#allocation6_spill] sm:$0xff] }
  0x68   : > { %v5189_v3 = vcombine.low %v6734_v20, %v6744_v36  ;;  %v6767_v18 = vsel %vm6650_vm7, %v5173_v22, %v1304_v1  ;;  %v6771_v49 = vsel %vm6650_vm7, %v1306_v54, %v1307_v10  ;;  %v6780_v42 = vsel %vm6650_vm7, %v5174_v30, %v1311_v11  ;;  %v9029_v22 = vld [vmem:[#allocation3_spill] sm:$0xff]  ;;  %v5286_v1 = vld [vmem:[%s6332_s25 + $0x24] sm:$0xf] }
  0x69   : > { %v5175_v55 = vrot.slane %v6753_v47, 9  ;;  %v1318_v39 = vrot.slane %v6403_v0, 5  ;;  %v5145_v33 = vcombine.low %v6470_v44, %v6477_v50  ;;  %v1321_v9 = vrot.slane %v6411_v8, 5  ;;  %v9032_v47 = vld [vmem:[#allocation9_spill] sm:$0xff] }
  0x6a   : > { %5933 = vmatmul.mubr.msk.bf16.gmra.mxu0 %vm694_vm3, %v5186_v31  ;;  %v5177_v57 = vrot.slane %v1213_v14, 9  ;;  %v1332_v5 = vrot.slane %v6477_v50, 5  ;;  %v1335_v27 = vrot.slane %v6484_v58, 5  ;;  %v5190_v7 = vcombine.low %v6767_v18, %v6771_v49 }
  0x6b   : > { %5936 = vmatprep.mubr.msk.bf16.mxu0 %vm694_vm3, %v5187_v21  ;;  %v6795_v12 = vsel %vm6650_vm7, %v1313_v46, %v1314_v61  ;;  %v5176_v0 = vrot.slane %v6774_v2, 9  ;;  %v5178_v16 = vrot.slane %v1214_v56, 9  ;;  %v1339_v6 = vrot.slane %v6515_v52, 5  ;;  %v9031_v21 = vld [vmem:[#allocation10_spill] sm:$0xff]  ;;  %v6850_v46 = vld [vmem:[%s6332_s25 + $0x10] sm:$0xf] }
  0x6c   : > { %v6804_v8 = vsel %vm6650_vm7, %v5177_v57, %v1332_v5  ;;  %v1334_v58 = vrot.slane %v1332_v5, 4  ;;  %v1320_v61 = vrot.slane %v1318_v39, 4  ;;  %v1342_v31 = vrot.slane %v9026_v51, 5  ;;  %v9033_v57 = vld [vmem:[#allocation11_spill] sm:$0xff] }
  0x6d   : > { %5899 = vmatmul.mubr.msk.bf16.gmra.mxu1 %vm694_vm3, %v5137_v53  ;;  %v5179_v20 = vrot.slane %v1215_v48, 9  ;;  %v1325_v10 = vrot.slane %v9029_v22, 5  ;;  %v6818_v35 = vsel %vm6650_vm7, %v5178_v16, %v1339_v6  ;;  %v1341_v36 = vrot.slane %v1339_v6, 4  ;;  %v9030_v53 = vld [vmem:[#allocation8_spill] sm:$0xff] }
  0x6e   : > { %5902 = vmatprep.mubr.msk.bf16.mxu1 %vm694_vm3, %v5138_v25  ;;  %v6814_v11 = vsel %vm6650_vm7, %v1334_v58, %v1335_v27  ;;  %v1346_v30 = vrot.slane %v9027_v63, 5  ;;  %v1349_v25 = vrot.slane %v9030_v53, 5  ;;  %v5180_v2 = vrot.slane %v1216_v26, 9  ;;  %v5280_v27 = vld [vmem:[%s6332_s25 + $0xc] sm:$0xf]  ;;  %v9034_v6 = vld [vmem:[#allocation12_spill] sm:$0xff] }
  0x6f   : > { %v5194_v54 = vcombine.low %v6804_v8, %v6814_v11  ;;  %v6828_v14 = vsel %vm6650_vm7, %v1341_v36, %v1342_v31  ;;  %v1353_v56 = vrot.slane %v9031_v21, 5  ;;  %v1356_v5 = vrot.slane %v9033_v57, 5  ;;  %v1217_v31 = vld [vmem:[%s6332_s25 + $0xb4] sm:$0xe] }
  0x70   : > { %v5195_v48 = vcombine.low %v6818_v35, %v6828_v14  ;;  %v6838_v58 = vsel %vm6650_vm7, %v5179_v20, %v1346_v30  ;;  %v1348_v16 = vrot.slane %v1346_v30, 4  ;;  %v1327_v26 = vrot.slane %v1325_v10, 4  ;;  %v9035_v36 = vld [vmem:[#allocation4_spill] sm:$0xff] }
  0x71   : > { %v1328_v53 = vrot.slane %v9035_v36, 5  ;;  %v1355_v57 = vrot.slane %v1353_v56, 4  ;;  %v6854_v20 = vsel %vm6650_vm7, %v5175_v55, %v1318_v39  ;;  %v2070_v51 = vshll.u32 %v5280_v27, 16  ;;  %v5393_v36 = vld [vmem:[%s8975_s1 + $0x5] sm:$0x1] }
  0x72   : > { %5937 = vmatmul.mubr.msk.bf16.gmra.mxu0 %vm694_vm3, %v5188_v24  ;;  %v6847_v24 = vsel %vm6650_vm7, %v5180_v2, %v1353_v56  ;;  %v6858_v30 = vsel %vm6650_vm7, %v1348_v16, %v1349_v25  ;;  %v5191_v55 = vcombine.low %v6780_v42, %v6795_v12  ;;  %v6871_v39 = vsel %vm6650_vm7, %v1320_v61, %v1321_v9  ;;  %v6880_v56 = vld [vmem:[%s6332_s25 + $0x14] sm:$0x1]  ;;  %v5284_v9 = vld [vmem:[%s6332_s25 + $0x1c] sm:$0xf]  ;;  %v5458_v12 = vld [vmem:[%s8975_s1 + $0x6] sm:$0x1] }
  0x73   : > { %5940 = vmatprep.mubr.msk.bf16.mxu0 %vm694_vm3, %v5189_v3  ;;  %v2067_v3 = vshrl.u32 %v5280_v27, 16  ;;  %v6877_v2 = vsel %vm6650_vm7, %v1355_v57, %v1356_v5  ;;  %v5283_v27 = vld [vmem:[%s6332_s25 + $0x18] sm:$0xf]  ;;  %v6889_v15 = vsel %vm6650_vm7, %v5176_v0, %v1325_v10  ;;  %v2076_v42 = vshll.u32 %v6850_v46, 16  ;;  %v9036_v0 = vld [vmem:[#allocation2_spill] sm:$0xff] }
  0x74   : > { %v6901_v32 = vsel %vm6650_vm7, %v1327_v26, %v1328_v53  ;;  %v5181_v23 = vrot.slane %v1217_v31, 9  ;;  %v6905_v61 = vand.u32 %v5393_v36, %v9036_v0  ;;  %v2072_v5 = vrot.slane %v2070_v51, 5 }
  0x75   : > { %5903 = vmatmul.mubr.msk.bf16.gmra.mxu1 %vm694_vm3, %v5139_v4  ;;  %v1360_v4 = vrot.slane %v6629_v40, 5  ;;  %v2069_v10 = vrot.slane %v2067_v3, 4  ;;  %v6907_v16 = vrot.slane %v2076_v42, 5  ;;  %v2091_v57 = vshrl.u32 %v5283_v27, 16  ;;  %v5285_v42 = vld [vmem:[%s6332_s25 + $0x20] sm:$0x1] }
  0x76   : > { %5906 = vmatprep.mubr.msk.bf16.mxu1 %vm694_vm3, %v5140_v43  ;;  %v2080_v43 = vshrl.u32 %v6850_v46, 16  ;;  %v1363_v29 = vrot.slane %v6634_v38, 5  ;;  %6028 = vmatprep.subr.bf16.mxu1 %v6905_v61  ;;  %v2094_v26 = vshll.u32 %v5283_v27, 16  ;;  %v2100_v31 = vshll.u32 %v5284_v9, 16 }
  0x77   : > { %v1362_v53 = vrot.slane %v1360_v4, 4  ;;  %v2086_v51 = vshll.u32 %v6880_v56, 16  ;;  %v2093_v3 = vrot.slane %v2091_v57, 4  ;;  %v2104_v36 = vshrl.u32 %v5284_v9, 16  ;;  %v6928_v9 = vld [vmem:[%s6332_s25 + $0x28] sm:$0xf] }
  0x78   : > { %v2082_v25 = vrot.slane %v2080_v43, 4  ;;  %v5192_v38 = vcombine.low %v6854_v20, %v6871_v39  ;;  %v2096_v27 = vrot.slane %v2094_v26, 5  ;;  %v6921_v43 = vrot.slane %v2100_v31, 5  ;;  %v6240_v31 = vld [vmem:[%s6332_s25 + $0x6c] sm:$0xf] }
  0x79   : > { %v6924_v18 = vand.u32 %v5458_v12, %v9036_v0  ;;  %v2073_v49 = vor.u32 %v2072_v5, %v2069_v10  ;;  %v2106_v41 = vrot.slane %v2104_v36, 4  ;;  %v5193_v20 = vcombine.low %v6889_v15, %v6901_v32  ;;  %v5289_v5 = vld [vmem:[%s6332_s25 + $0x30] sm:$0xf] }
  0x7a   : > { %5941 = vmatmul.mubr.msk.bf16.gmra.mxu0 %vm694_vm3, %v5190_v7  ;;  %v2083_v7 = vor.u32 %v2082_v25, %v6907_v16  ;;  %v6938_v39 = vsel %vm6650_vm7, %v5181_v23, %v1360_v4  ;;  %v2097_v12 = vor.u32 %v2096_v27, %v2093_v3  ;;  %v6942_v25 = vld [vmem:[%s6332_s25 + $0x2c] sm:$0x1]  ;;  %v2118_v10 = vshll.u32 %v5286_v1, 16  ;;  %v6955_v4 = vld [vmem:[%s6332_s25 + $0x34] sm:$0xf] }
  0x7b   : > { %5944 = vmatprep.mubr.msk.bf16.mxu0 %vm694_vm3, %v5191_v55  ;;  %v2115_v55 = vshrl.u32 %v5286_v1, 16  ;;  %6062 = vmatprep.subr.bf16.mxu0 %v6924_v18  ;;  %v6951_v13 = vsel %vm6650_vm7, %v1362_v53, %v1363_v29  ;;  %v2088_v59 = vrot.slane %v2086_v51, 5  ;;  %v2110_v15 = vshll.u32 %v5285_v42, 16  ;;  %v5292_v29 = vld [vmem:[%s6332_s25 + $0x3c] sm:$0xf] }
  0x7c   : > { %v2120_v32 = vrot.slane %v2118_v10, 5  ;;  %v2124_v23 = vshll.u32 %v6928_v9, 16  ;;  %v2128_v17 = vshrl.u32 %v6928_v9, 16  ;;  %v2074_v19 = vrot.slane %v2073_v49, 4  ;;  %v6241_v53 = vld [vmem:[%s6332_s25 + $0x70] sm:$0xf] }
  0x7d   : > { %5907 = vmatmul.mubr.msk.bf16.gmra.mxu1 %vm694_vm3, %v5141_v28  ;;  %v2107_v28 = vor.u32 %v2106_v41, %v6921_v43  ;;  %v2117_v1 = vrot.slane %v2115_v55, 4  ;;  %v2098_v57 = vrot.slane %v2097_v12, 4  ;;  %v2134_v26 = vshll.u32 %v6942_v25, 16  ;;  %v6242_v41 = vld [vmem:[%s6332_s25 + $0x78] sm:$0xf] }
  0x7e   : > { %5910 = vmatprep.mubr.msk.bf16.mxu1 %vm694_vm3, %v5142_v34  ;;  %v2084_v34 = vrot.slane %v2083_v7, 4  ;;  %v5143_v51 = vcombine.low %v6240_v31, %v6241_v53  ;;  %v5144_v3 = vcombine.low %v6242_v41, %v9029_v22  ;;  %v2139_v36 = vshrl.u32 %v5289_v5, 16  ;;  %v5295_v41 = vld [vmem:[%s6332_s25 + $0x48] sm:$0xf]  ;;  %v6992_v12 = vld [vmem:[%s6332_s25 + $0x4c] sm:$0xf] }
  0x7f   : > { %v2142_v42 = vshll.u32 %v5289_v5, 16  ;;  %v2108_v27 = vrot.slane %v2107_v28, 4  ;;  %v2112_v49 = vrot.slane %v2110_v15, 5  ;;  %v2148_v7 = vshll.u32 %v6955_v4, 16  ;;  %v6974_v5 = vld [vmem:[%s6332_s25 + $0x38] sm:$0x1] }
  0x80   : > { %v2152_v55 = vshrl.u32 %v6955_v4, 16  ;;  %v2121_v10 = vor.u32 %v2120_v32, %v2117_v1  ;;  %v6971_v31 = vrot.slane %v2124_v23, 5  ;;  %v2130_v22 = vrot.slane %v2128_v17, 4 }
  0x81   : > { %v2079_v28 = vsel %vm6384_vm4, %v2074_v19, %v6907_v16  ;;  %v6982_v15 = vrot.slane %v2134_v26, 5  ;;  %v2141_v53 = vrot.slane %v2139_v36, 4  ;;  %v2089_v1 = vsel %vm6384_vm4, %v2084_v34, %v2088_v59  ;;  %v7005_v36 = vld [vmem:[%s6332_s25 + $0x44] sm:$0x1] }
  0x82   : > { %5945 = vmatmul.mubr.msk.bf16.gmra.mxu0 %vm694_vm3, %v5192_v38  ;;  %v6977_v38 = vld [vmem:[%s6332_s25 + $0x40] sm:$0xf]  ;;  %v2103_v32 = vsel %vm6384_vm4, %v2098_v57, %v6921_v43  ;;  %v2163_v23 = vshrl.u32 %v5292_v29, 16  ;;  %v2166_v17 = vshll.u32 %v5292_v29, 16  ;;  %v2113_v16 = vsel %vm6384_vm4, %v2108_v27, %v2112_v49 }
  0x83   : > { %5948 = vmatprep.mubr.msk.bf16.mxu0 %vm694_vm3, %v5193_v20  ;;  %v2144_v20 = vrot.slane %v2142_v42, 5  ;;  %v6997_v19 = vrot.slane %v2148_v7, 5  ;;  %v2154_v26 = vrot.slane %v2152_v55, 4  ;;  %v7000_v59 = vrot.slane %v2121_v10, 4 }
  0x84   : > { %v2131_v34 = vor.u32 %v2130_v22, %v6971_v31  ;;  %v2165_v43 = vrot.slane %v2163_v23, 4  ;;  %v2168_v57 = vrot.slane %v2166_v17, 5  ;;  %v2176_v27 = vshrl.u32 %v6977_v38, 16  ;;  %v7020_v23 = vld [vmem:[%s6332_s25 + $0x50] sm:$0x1] }
  0x85   : > { %5911 = vmatmul.mubr.msk.bf16.gmra.mxu1 %vm694_vm3, %v5143_v51  ;;  %v2172_v51 = vshll.u32 %v6977_v38, 16  ;;  %v2145_v29 = vor.u32 %v2144_v20, %v2141_v53  ;;  %v7010_v49 = vcombine.low %v2079_v28, %v2089_v1  ;;  %v7012_v7 = vcombine.low %v2103_v32, %v2113_v16  ;;  %v7025_v28 = vld [vmem:[%s6332_s25 + $0x58] sm:$0xf] }
  0x86   : > { %5914 = vmatprep.mubr.msk.bf16.mxu1 %vm694_vm3, %v5144_v3  ;;  %v2158_v3 = vshll.u32 %v6974_v5, 16  ;;  %v2187_v55 = vshrl.u32 %v5295_v41, 16  ;;  %v2190_v10 = vshll.u32 %v5295_v41, 16  ;;  %v2155_v22 = vor.u32 %v2154_v26, %v6997_v19 }
  0x87   : > { %v7007_v42 = vrot.slane %v2172_v51, 5  ;;  %v2169_v53 = vor.u32 %v2168_v57, %v2165_v43  ;;  %v2178_v20 = vrot.slane %v2176_v27, 4  ;;  %v2196_v17 = vshll.u32 %v6992_v12, 16  ;;  %v5298_v51 = vld [vmem:[%s6332_s25 + $0x54] sm:$0xf] }
  0x88   : > { %v2132_v8 = vrot.slane %v2131_v34, 4  ;;  %v2182_v11 = vshll.u32 %v7005_v36, 16  ;;  %v2192_v41 = vrot.slane %v2190_v10, 5  ;;  %v2127_v1 = vsel %vm6384_vm4, %v7000_v59, %v6971_v31  ;;  %v5301_v43 = vld [vmem:[%s6332_s25 + $0x60] sm:$0xf] }
  0x89   : > { %v2146_v32 = vrot.slane %v2145_v29, 4  ;;  %v2160_v16 = vrot.slane %v2158_v3, 5  ;;  %v2200_v26 = vshrl.u32 %v6992_v12, 16  ;;  %v2179_v35 = vor.u32 %v2178_v20, %v7007_v42  ;;  %v7052_v27 = vld [vmem:[%s6332_s25 + $0x5c] sm:$0x1] }
  0x8a   : > { %5949 = vmatmul.mubr.msk.bf16.gmra.mxu0 %vm694_vm3, %v5194_v54  ;;  %v2189_v54 = vrot.slane %v2187_v55, 4  ;;  %v7042_v14 = vrot.slane %v2196_v17, 5  ;;  %v2214_v34 = vshll.u32 %v5298_v51, 16  ;;  %v9037_v31 = vcombine.low %v6510_v45, %v6515_v52  ;;  %v7056_v10 = vld [vmem:[%s6332_s25 + $0x64] sm:$0xf] }
  0x8b   : > { %5952 = vmatprep.mubr.msk.bf16.mxu0 %vm694_vm3, %v5195_v48  ;;  %v2211_v48 = vshrl.u32 %v5298_v51, 16  ;;  %v2156_v59 = vrot.slane %v2155_v22, 4  ;;  %v2170_v57 = vrot.slane %v2169_v53, 4  ;;  %v2202_v29 = vrot.slane %v2200_v26, 4  ;;  %v7078_v26 = vld [vmem:[%s6332_s25 + $0x70] sm:$0xf] }
  0x8c   : > { %v2220_v44 = vshll.u32 %v7025_v28, 16  ;;  %v2184_v50 = vrot.slane %v2182_v11, 5  ;;  %v2206_v3 = vshll.u32 %v7020_v23, 16  ;;  %v2224_v55 = vshrl.u32 %v7025_v28, 16 }
  0x8d   : > { %5915 = vmatmul.mubr.msk.bf16.gmra.mxu1 %vm694_vm3, %v5145_v33  ;;  %v2193_v33 = vor.u32 %v2192_v41, %v2189_v54  ;;  %v2137_v45 = vsel %vm6384_vm4, %v2132_v8, %v6982_v15  ;;  %v2151_v52 = vsel %vm6384_vm4, %v2146_v32, %v6997_v19  ;;  %v2213_v22 = vrot.slane %v2211_v48, 4  ;;  %v5304_v54 = vld [vmem:[%s6332_s25 + $0x6c] sm:$0xf] }
  0x8e   : > { %5918 = vmatprep.mubr.msk.bf16.mxu1 %vm694_vm3, %v9037_v31  ;;  %v2216_v53 = vrot.slane %v2214_v34, 5  ;;  %v2180_v20 = vrot.slane %v2179_v35, 4  ;;  %v2203_v17 = vor.u32 %v2202_v29, %v7042_v14  ;;  %v7065_v51 = vrot.slane %v2220_v44, 5 }
  0x8f   : > { %v2226_v11 = vrot.slane %v2224_v55, 4  ;;  %v9038_v41 = vcombine.low %v6838_v58, %v6858_v30  ;;  %v2161_v15 = vsel %vm6384_vm4, %v2156_v59, %v2160_v16  ;;  %v2175_v19 = vsel %vm6384_vm4, %v2170_v57, %v7007_v42 }
  0x90   : > { %v2235_v8 = vshrl.u32 %v5301_v43, 16  ;;  %v2238_v32 = vshll.u32 %v5301_v43, 16  ;;  %v9039_v35 = vcombine.low %v6847_v24, %v6877_v2  ;;  %v2194_v48 = vrot.slane %v2193_v33, 4 }
  0x91   : > { %v2208_v58 = vrot.slane %v2206_v3, 5  ;;  %v2244_v30 = vshll.u32 %v7056_v10, 16  ;;  %v2248_v16 = vshrl.u32 %v7056_v10, 16  ;;  %v2217_v34 = vor.u32 %v2216_v53, %v2213_v22 }
  0x92   : > { %5953 = vmatmul.mubr.msk.bf16.gmra.mxu0 %vm694_vm3, %v9038_v41  ;;  %v2230_v31 = vshll.u32 %v7052_v27, 16  ;;  %v2237_v42 = vrot.slane %v2235_v8, 4  ;;  %v2240_v59 = vrot.slane %v2238_v32, 5  ;;  %v9040_v43 = vcombine.low %v9028_v60, %v9027_v63  ;;  %v7105_v60 = vld [vmem:[%s6332_s25 + $0x68] sm:$0x1]  ;;  %v6208_v8 = vld [vmem:[%s6332_s25 + $0xc] sm:$0xff]  }
  0x93   : > { %5956 = vmatprep.mubr.msk.bf16.mxu0 %vm694_vm3, %v9039_v35  ;;  %v2185_v24 = vsel %vm6384_vm4, %v2180_v20, %v2184_v50  ;;  %v2204_v2 = vrot.slane %v2203_v17, 4  ;;  %v2227_v57 = vor.u32 %v2226_v11, %v7065_v51  ;;  %v7094_v29 = vrot.slane %v2244_v30, 5  ;;  %v7120_v17 = vld [vmem:[%s6332_s25 + $0x7c] sm:$0xf] }
  0x94   : > { %v9041_v44 = vcombine.low %v9032_v47, %v9031_v21  ;;  %v7100_v33 = vcombine.low %v2127_v1, %v2137_v45  ;;  %v7102_v63 = vcombine.low %v2151_v52, %v2161_v15  ;;  %v2250_v3 = vrot.slane %v2248_v16, 4  ;;  %v5307_v21 = vld [vmem:[%s6332_s25 + $0x78] sm:$0xf]  ;;  %9042 = vst [vmem:[#allocation5_spill] sm:$0xff] %v7120_v17 }
  0x95   : > { %5919 = vmatmul.mubr.msk.bf16.gmra.mxu1 %vm694_vm3, %v9040_v43  ;;  %v2259_v50 = vshrl.u32 %v5304_v54, 16  ;;  %v2241_v55 = vor.u32 %v2240_v59, %v2237_v42  ;;  %v2262_v22 = vshll.u32 %v5304_v54, 16  ;;  %v2268_v53 = vshll.u32 %v7078_v26, 16 }
  0x96   : > { %5922 = vmatprep.mubr.msk.bf16.mxu1 %vm694_vm3, %v9041_v44  ;;  %v2272_v20 = vshrl.u32 %v7078_v26, 16  ;;  %v7110_v47 = vcombine.low %v2175_v19, %v2185_v24  ;;  %v2199_v1 = vsel %vm6384_vm4, %v2194_v48, %v7042_v14  ;;  %v7115_v45 = vrot.slane %v2217_v34, 4  ;;  %v7129_v19 = vld [vmem:[%s6332_s25 + $0x74] sm:$0x1]  ;;  %v7147_v24 = vld [vmem:[%s6332_s25 + $0x88] sm:$0xf] }
  0x97   : > { %v7117_v52 = vrot.slane %v2230_v31, 5  ;;  %v2209_v11 = vsel %vm6384_vm4, %v2204_v2, %v2208_v58  ;;  %v7124_v54 = vrot.slane %v2227_v57, 4  ;;  %v2251_v41 = vor.u32 %v2250_v3, %v7094_v29  ;;  %9044 = vst [vmem:[#allocation7_spill] sm:$0xff] %v7147_v24 }
  0x98   : > { %v2254_v15 = vshll.u32 %v7105_v60, 16  ;;  %v9043_v14 = vcombine.low %v6938_v39, %v6951_v13  ;;  %v2261_v32 = vrot.slane %v2259_v50, 4  ;;  %v2264_v35 = vrot.slane %v2262_v22, 5  ;;  %v5310_v39 = vld [vmem:[%s6332_s25 + $0x84] sm:$0xf] }
  0x99   : > { %v2283_v48 = vshrl.u32 %v5307_v21, 16  ;;  %v2286_v58 = vshll.u32 %v5307_v21, 16  ;;  %v7138_v30 = vrot.slane %v2241_v55, 4  ;;  %v7140_v16 = vrot.slane %v2268_v53, 5  ;;  %v7160_v50 = vld [vmem:[%s6332_s25 + $0x80] sm:$0x1] }
  0x9a   : > { %5957 = vmatmul.mubr.msk.bf16.gmra.mxu0 %vm694_vm3, %v9043_v14  ;;  %v2274_v34 = vrot.slane %v2272_v20, 4  ;;  %v2292_v31 = vshll.u32 %v7120_v17, 16  ;;  %v2278_v13 = vshll.u32 %v7129_v19, 16  ;;  %v2296_v43 = vshrl.u32 %v7120_v17, 16  ;;  %9046 = vst [vmem:[#allocation6_spill] sm:$0xff] %v7160_v50 }
  0x9b   : > { %5996 = vmatprep.mubr.msk.bf16.mxu0 %vm694_vm3, %v7010_v49  ;;  %v2285_v42 = vrot.slane %v2283_v48, 4  ;;  %v2288_v59 = vrot.slane %v2286_v58, 5  ;;  %v9045_v49 = vcombine.low %v9034_v6, %v6629_v40  ;;  %v7153_v2 = vcombine.low %v2199_v1, %v2209_v11  ;;  %v5313_v1 = vld [vmem:[%s6332_s25 + $0x90] sm:$0xf]  ;;  %v6210_v48 = vld [vmem:[%s6332_s25 + $0x24] sm:$0xff]  }
  0x9c   : > { %v2223_v57 = vsel %vm6384_vm4, %v7115_v45, %v7065_v51  ;;  %v2252_v44 = vrot.slane %v2251_v41, 4  ;;  %v2256_v3 = vrot.slane %v2254_v15, 5  ;;  %v2265_v40 = vor.u32 %v2264_v35, %v2261_v32  ;;  %v6209_v45 = vld [vmem:[%s6332_s25 + $0x18] sm:$0xff]  }
  0x9d   : > { %5923 = vmatmul.mubr.msk.bf16.gmra.mxu1 %vm694_vm3, %v9045_v49  ;;  %v7163_v6 = vrot.slane %v2292_v31, 5  ;;  %v2298_v55 = vrot.slane %v2296_v43, 4  ;;  %v2307_v22 = vshrl.u32 %v5310_v39, 16  ;;  %v2233_v53 = vsel %vm6384_vm4, %v7124_v54, %v7117_v52  ;;  %v7184_v52 = vld [vmem:[%s6332_s25 + $0x8c] sm:$0x1] }
  0x9e   : > { %5962 = vmatprep.mubr.msk.bf16.mxu1 %vm694_vm3, %v6208_v8  ;;  %v2247_v51 = vsel %vm6384_vm4, %v7138_v30, %v7094_v29  ;;  %v2310_v20 = vshll.u32 %v5310_v39, 16  ;;  %v2316_v21 = vshll.u32 %v7147_v24, 16  ;;  %v2275_v11 = vor.u32 %v2274_v34, %v7140_v16  ;;  %v7181_v8 = vld [vmem:[%s6332_s25 + $0x94] sm:$0xf]  ;;  %9048 = vst [vmem:[#allocation8_spill] sm:$0xff] %v7184_v52 }
  0x9f   : > { %v7177_v41 = vrot.slane %v2278_v13, 5  ;;  %v2289_v15 = vor.u32 %v2288_v59, %v2285_v42  ;;  %v2302_v14 = vshll.u32 %v7160_v50, 16  ;;  %9047 = vst [vmem:[#allocation3_spill] sm:$0xff] %v7181_v8  ;;  %v2309_v54 = vrot.slane %v2307_v22, 4  ;;  %v7213_v22 = vld [vmem:[%s6332_s25 + $0xa0] sm:$0xf] }
  0xa0   : > { %v2312_v32 = vrot.slane %v2310_v20, 5  ;;  %v7186_v29 = vrot.slane %v2316_v21, 5  ;;  %v2320_v35 = vshrl.u32 %v7147_v24, 16  ;;  %v2257_v58 = vsel %vm6384_vm4, %v2252_v44, %v2256_v3  ;;  %v5316_v3 = vld [vmem:[%s6332_s25 + $0x9c] sm:$0xf]  ;;  %9049 = vst [vmem:[#allocation10_spill] sm:$0xff] %v7213_v22 }
  0xa1   : > { %v7194_v30 = vrot.slane %v2265_v40, 4  ;;  %v2299_v34 = vor.u32 %v2298_v55, %v7163_v6  ;;  %v2331_v31 = vshrl.u32 %v5313_v1, 16  ;;  %v2334_v42 = vshll.u32 %v5313_v1, 16  ;;  %v7222_v1 = vld [vmem:[%s6332_s25 + $0x98] sm:$0x1] }
  0xa2   : > { %5997 = vmatmul.mubr.msk.bf16.vlgmr.msra.gmra.mxu0 %vm694_vm3, %v7012_v7  ;;  %v2313_v39 = vor.u32 %v2312_v32, %v2309_v54  ;;  %v2322_v13 = vrot.slane %v2320_v35, 4  ;;  %v2340_v7 = vshll.u32 %v7181_v8, 16  ;;  %v7201_v59 = vrot.slane %v2275_v11, 4  ;;  %9050 = vst [vmem:[#allocation9_spill] sm:$0xff] %v7222_v1 }
  0xa3   : > { %6063 = vmatpush3.bf16.msra.mxu0 %v6924_v18  ;;  %6000 = vmatprep.mubr.msk.bf16.mxu0 %vm694_vm3, %v7100_v33  ;;  %v2326_v43 = vshll.u32 %v7184_v52, 16  ;;  %v2333_v49 = vrot.slane %v2331_v31, 4  ;;  %v2344_v44 = vshrl.u32 %v7181_v8, 16  ;;  %v7207_v18 = vrot.slane %v2289_v15, 4  ;;  %v5319_v31 = vld [vmem:[%s6332_s25 + $0xa8] sm:$0xf] }
  0xa4   : > { %v7209_v40 = vrot.slane %v2302_v14, 5  ;;  %v2323_v33 = vor.u32 %v2322_v13, %v7186_v29  ;;  %v2336_v55 = vrot.slane %v2334_v42, 5  ;;  %v7217_v20 = vrot.slane %v2299_v34, 4  ;;  %v7245_v13 = vld [vmem:[%s6332_s25 + $0xac] sm:$0xf]  ;;  %v6212_v42 = vld [vmem:[%s6332_s25 + $0x3c] sm:$0xff]  }
  0xa5   : > { %5963 = vmatmul.mubr.msk.bf16.vlgmr.msra.gmra.mxu1 %vm694_vm3, %v6209_v45  ;;  %v7219_v21 = vrot.slane %v2313_v39, 4  ;;  %v7224_v45 = vrot.slane %v2340_v7, 5  ;;  %v2346_v11 = vrot.slane %v2344_v44, 4  ;;  %v7226_v15 = vcombine.low %v2223_v57, %v2233_v53  ;;  %v6211_v39 = vld [vmem:[%s6332_s25 + $0x30] sm:$0xff]   ;;  %9051 = vst [vmem:[#allocation11_spill] sm:$0xff] %v7245_v13  ;;  %v6213_v8 = vld [vmem:[%s6332_s25 + $0x48] sm:$0xff]  }
  0xa6   : > { %6029 = vmatpush3.bf16.msra.mxu1 %v6905_v61  ;;  %5966 = vmatprep.mubr.msk.bf16.mxu1 %vm694_vm3, %v6210_v48  ;;  %v2337_v14 = vor.u32 %v2336_v55, %v2333_v49  ;;  %v2355_v54 = vshrl.u32 %v5316_v3, 16  ;;  %v2358_v32 = vshll.u32 %v5316_v3, 16  ;;  %v7228_v61 = vcombine.low %v2247_v51, %v2257_v58  ;;  %v7267_v44 = vld [vmem:[%s6332_s25 + $0xa4] sm:$0x1] }
  0xa7   : > { %v7234_v48 = vrot.slane %v2326_v43, 5  ;;  %v2364_v34 = vshll.u32 %v7213_v22, 16  ;;  %v7239_v57 = vrot.slane %v2323_v33, 4  ;;  %v2347_v53 = vor.u32 %v2346_v11, %v7224_v45  ;;  %9052 = vst [vmem:[#allocation12_spill] sm:$0xff] %v7267_v44  ;;  %v7274_v11 = vld [vmem:[%s6332_s25 + $0xb0] sm:$0x1] }
  0xa8   : > { %v2350_v51 = vshll.u32 %v7222_v1, 16  ;;  %v2368_v58 = vshrl.u32 %v7213_v22, 16  ;;  %v7271_v3 = vrot.slane %v2337_v14, 4  ;;  %v2357_v33 = vrot.slane %v2355_v54, 4  ;;  %9053 = vst [vmem:[#allocation4_spill] sm:$0xff] %v7274_v11 }
  0xa9   : > { %v2360_v55 = vrot.slane %v2358_v32, 5  ;;  %v2379_v43 = vshrl.u32 %v5319_v31, 16  ;;  %v7276_v35 = vrot.slane %v2364_v34, 5  ;;  %v2382_v7 = vshll.u32 %v5319_v31, 16  ;;  %v5322_v22 = vld [vmem:[%s6332_s25 + $0xb4] sm:$0xf] }
  0xaa   : > { %6001 = vmatmul.mubr.msk.bf16.gmra.mxu0 %vm694_vm3, %v7102_v63  ;;  %v2370_v49 = vrot.slane %v2368_v58, 4  ;;  %v2388_v63 = vshll.u32 %v7245_v13, 16  ;;  %v7285_v14 = vrot.slane %v2347_v53, 4  ;;  %v2352_v54 = vrot.slane %v2350_v51, 5  ;;  %v7288_v34 = vld [vmem:[%s6332_s25 + $0xb8] sm:$0xf] }
  0xab   : > { %6004 = vmatprep.mubr.msk.bf16.mxu0 %vm694_vm3, %v7110_v47  ;;  %v2329_v47 = vsel %vm6384_vm4, %v7239_v57, %v7234_v48  ;;  %v2381_v32 = vrot.slane %v2379_v43, 4  ;;  %9054 = vst [vmem:[#allocation2_spill] sm:$0xff] %v7288_v34  ;;  %v2374_v31 = vshll.u32 %v7267_v44, 16  ;;  %v2384_v58 = vrot.slane %v2382_v7, 5  ;;  %v7300_v53 = vld [vmem:[%s6332_s25 + $0xbc] sm:$0x1] }
  0xac   : > { %v7292_v1 = vrot.slane %v2388_v63, 5  ;;  %v2343_v48 = vsel %vm6384_vm4, %v7271_v3, %v7224_v45  ;;  %v2361_v57 = vor.u32 %v2360_v55, %v2357_v33  ;;  %v2403_v51 = vshrl.u32 %v5322_v22, 16  ;;  %v7309_v3 = vld [vmem:[%s6332_s25 + $0xc4] sm:$0xf] }
  0xad   : > { %5967 = vmatmul.mubr.msk.bf16.gmra.mxu1 %vm694_vm3, %v6211_v39  ;;  %v2392_v39 = vshrl.u32 %v7245_v13, 16  ;;  %v2406_v43 = vshll.u32 %v5322_v22, 16  ;;  %v2398_v7 = vshll.u32 %v7274_v11, 16  ;;  %v2412_v63 = vshll.u32 %v7288_v34, 16  ;;  %v5325_v13 = vld [vmem:[%s6332_s25 + $0xc0] sm:$0xf] }
  0xae   : > { %5970 = vmatprep.mubr.msk.bf16.mxu1 %vm694_vm3, %v6212_v42  ;;  %v2371_v42 = vor.u32 %v2370_v49, %v7276_v35  ;;  %v2385_v52 = vor.u32 %v2384_v58, %v2381_v32  ;;  %v2405_v24 = vrot.slane %v2403_v51, 4  ;;  %v2416_v45 = vshrl.u32 %v7288_v34, 16  ;;  %v6214_v22 = vld [vmem:[%s6332_s25 + $0x54] sm:$0xff]  }
  0xaf   : > { %v2394_v44 = vrot.slane %v2392_v39, 4  ;;  %v2408_v50 = vrot.slane %v2406_v43, 5  ;;  %v2353_v49 = vsel %vm6384_vm4, %v7285_v14, %v2352_v54  ;;  %v2376_v33 = vrot.slane %v2374_v31, 5  ;;  %v7327_v31 = vld [vmem:[%s6332_s25 + $0xc8] sm:$0x1] }
  0xb0   : > { %v7318_v39 = vrot.slane %v2412_v63, 5  ;;  %v2418_v58 = vrot.slane %v2416_v45, 4  ;;  %v2422_v51 = vshll.u32 %v7300_v53, 16  ;;  %v2427_v43 = vshrl.u32 %v5325_v13, 16 }
  0xb1   : > { %v2395_v55 = vor.u32 %v2394_v44, %v7292_v1  ;;  %v2409_v32 = vor.u32 %v2408_v50, %v2405_v24  ;;  %v2372_v34 = vrot.slane %v2371_v42, 4  ;;  %v2430_v11 = vshll.u32 %v5325_v13, 16 }
  0xb2   : > { %6005 = vmatmul.mubr.msk.bf16.gmra.mxu0 %vm694_vm3, %v7153_v2  ;;  %v2362_v2 = vrot.slane %v2361_v57, 4  ;;  %v2436_v17 = vshll.u32 %v7309_v3, 16  ;;  %v2386_v14 = vrot.slane %v2385_v52, 4  ;;  %v2400_v54 = vrot.slane %v2398_v7, 5 }
  0xb3   : > { %6008 = vmatprep.mubr.msk.bf16.mxu0 %vm694_vm3, %v7226_v15  ;;  %v2419_v44 = vor.u32 %v2418_v58, %v7318_v39  ;;  %v2429_v15 = vrot.slane %v2427_v43, 4  ;;  %v2396_v24 = vrot.slane %v2395_v55, 4  ;;  %v2432_v50 = vrot.slane %v2430_v11, 5  ;;  %v5364_v43 = vld [vmem:[%s6332_s25 + $0x30] sm:$0xe] }
  0xb4   : > { %v7330_v63 = vrot.slane %v2436_v17, 5  ;;  %v2440_v13 = vshrl.u32 %v7309_v3, 16  ;;  %v9055_v52 = vsel %vm6384_vm4, %v7201_v59, %v7177_v41  ;;  %v9056_v57 = vsel %vm6384_vm4, %v7194_v30, %v7140_v16  ;;  %v6215_v30 = vld [vmem:[%s6332_s25 + $0x60] sm:$0xff]  }
  0xb5   : > { %5971 = vmatmul.mubr.msk.bf16.gmra.mxu1 %vm694_vm3, %v6213_v8  ;;  %v5539_v8 = vld [vmem:[%s8975_s1 + $0x7] sm:$0x1]  ;;  %v5337_v11 = vcombine.low %v9056_v57, %v9055_v52  ;;  %v2410_v17 = vrot.slane %v2409_v32, 4  ;;  %v2420_v42 = vrot.slane %v2419_v44, 4  ;;  %v2424_v7 = vrot.slane %v2422_v51, 5 }
  0xb6   : > { %5974 = vmatprep.mubr.msk.bf16.mxu1 %vm694_vm3, %v6214_v22  ;;  %v9057_v45 = vsel %vm6384_vm4, %v7217_v20, %v7209_v40  ;;  %v9058_v41 = vsel %vm6384_vm4, %v7207_v18, %v7163_v6  ;;  %v2433_v22 = vor.u32 %v2432_v50, %v2429_v15  ;;  %v2442_v55 = vrot.slane %v2440_v13, 4  ;;  %v5604_v18 = vld [vmem:[%s8975_s1 + $0x8] sm:$0x1]  ;;  %v5363_v20 = vld [vmem:[%s6332_s25 + $0x24] sm:$0xe] }
  0xb7   : > { %v5338_v59 = vcombine.low %v9058_v41, %v9057_v45  ;;  %v2446_v16 = vshll.u32 %v7327_v31, 16  ;;  %v9059_v32 = vsel %vm6384_vm4, %v7219_v21, %v7186_v29  ;;  %v7363_v51 = vcombine.low %v2343_v48, %v2353_v49  ;;  %v6216_v29 = vld [vmem:[%s6332_s25 + $0x6c] sm:$0xff]   ;;  %v5365_v13 = vld [vmem:[%s6332_s25 + $0x3c] sm:$0xe] }
  0xb8   : > { %v5339_v58 = vcombine.low %v9059_v32, %v2329_v47  ;;  %v2367_v40 = vsel %vm6384_vm4, %v2362_v2, %v7276_v35  ;;  %v7369_v6 = vand.u32 %v5539_v8, %v9036_v0  ;;  %v2377_v21 = vsel %vm6384_vm4, %v2372_v34, %v2376_v33  ;;  %v7387_v49 = vld [vmem:[%s6332_s25 + $0xc] sm:$0xe] }
  0xb9   : > { %v2391_v35 = vsel %vm6384_vm4, %v2386_v14, %v7292_v1  ;;  %v2401_v47 = vsel %vm6384_vm4, %v2396_v24, %v2400_v54  ;;  %v2443_v48 = vor.u32 %v2442_v55, %v7330_v63  ;;  %v2425_v34 = vsel %vm6384_vm4, %v2420_v42, %v2424_v7  ;;  %v5367_v55 = vld [vmem:[%s6332_s25 + $0x54] sm:$0xe] }
  0xba   : > { %6009 = vmatmul.mubr.msk.bf16.gmra.mxu0 %vm694_vm3, %v7228_v61  ;;  %v2415_v61 = vsel %vm6384_vm4, %v2410_v17, %v7318_v39  ;;  %v7395_v33 = vrot.slane %v2433_v22, 4  ;;  %v2810_v1 = vrot.slane %v6850_v46, 5  ;;  %6096 = vmatprep.subr.bf16.mxu1 %v7369_v6  ;;  %v7402_v14 = vrot.slane %v2446_v16, 5  ;;  %v6217_v16 = vld [vmem:[%s6332_s25 + $0x78] sm:$0xff]  }
  0xbb   : > { %6012 = vmatprep.mubr.msk.bf16.mxu0 %vm694_vm3, %v5337_v11  ;;  %v7400_v2 = vrot.slane %v2443_v48, 4  ;;  %v7405_v54 = vand.u32 %v5604_v18, %v9036_v0  ;;  %v5379_v44 = vrot.slane %v5363_v20, 9  ;;  %v7408_v39 = vcombine.low %v2367_v40, %v2377_v21  ;;  %v5366_v11 = vld [vmem:[%s6332_s25 + $0x48] sm:$0xe]  ;;  %v6224_v46 = vld [vmem:[%s6332_s25 + $0x18] sm:$0xff]  }
  0xbc   : > { %v7410_v15 = vcombine.low %v2391_v35, %v2401_v47  ;;  %v5377_v24 = vrot.slane %v7387_v49, 9  ;;  %v2824_v50 = vrot.slane %v6928_v9, 5  ;;  %v7416_v8 = vcombine.low %v2415_v61, %v2425_v34  ;;  %v6218_v20 = vld [vmem:[%s6332_s25 + $0x84] sm:$0xff]   ;;  %v5368_v35 = vld [vmem:[%s6332_s25 + $0x60] sm:$0xe] }
  0xbd   : > { %5975 = vmatmul.mubr.msk.bf16.gmra.mxu1 %vm694_vm3, %v6215_v30  ;;  %v2813_v0 = vrot.slane %v6880_v56, 5  ;;  %6130 = vmatprep.subr.bf16.mxu0 %v7405_v54  ;;  %v2827_v52 = vrot.slane %v6942_v25, 5  ;;  %v5380_v57 = vrot.slane %v5364_v43, 9  ;;  %v2439_v9 = vsel %vm6384_vm4, %v7395_v33, %v7330_v63 }
  0xbe   : > { %5978 = vmatprep.mubr.msk.bf16.mxu1 %vm694_vm3, %v6216_v29  ;;  %v7428_v17 = vrot.slane %v2810_v1, 4  ;;  %v7432_v42 = vsel %vm6650_vm7, %v5379_v44, %v2824_v50  ;;  %v2826_v7 = vrot.slane %v2824_v50, 4  ;;  %v2449_v25 = vsel %vm6384_vm4, %v7400_v2, %v7402_v14  ;;  %v6223_v14 = vld [vmem:[%s6332_s25 + $0xc0] sm:$0xff]  }
  0xbf   : > { %v2831_v45 = vrot.slane %v6955_v4, 5  ;;  %v2834_v41 = vrot.slane %v6974_v5, 5  ;;  %v5381_v22 = vrot.slane %v5365_v13, 9  ;;  %v2838_v32 = vrot.slane %v6977_v38, 5  ;;  %v5370_v13 = vld [vmem:[%s6332_s25 + $0x78] sm:$0xe] }
  0xc0   : > { %v7444_v30 = vsel %vm6650_vm7, %v2826_v7, %v2827_v52  ;;  %v2841_v40 = vrot.slane %v7005_v36, 5  ;;  %v5382_v18 = vrot.slane %v5366_v11, 9  ;;  %v2845_v21 = vrot.slane %v6992_v12, 5 }
  0xc1   : > { %v5396_v4 = vcombine.low %v7432_v42, %v7444_v30  ;;  %v7454_v5 = vsel %vm6650_vm7, %v5380_v57, %v2831_v45  ;;  %v2833_v29 = vrot.slane %v2831_v45, 4  ;;  %v7461_v38 = vsel %vm6650_vm7, %v5381_v22, %v2838_v32  ;;  %v5371_v22 = vld [vmem:[%s6332_s25 + $0x84] sm:$0xe] }
  0xc2   : > { %6013 = vmatmul.mubr.msk.bf16.gmra.mxu0 %vm694_vm3, %v5338_v59  ;;  %v2840_v36 = vrot.slane %v2838_v32, 4  ;;  %v2848_v59 = vrot.slane %v7020_v23, 5  ;;  %v5383_v47 = vrot.slane %v5367_v55, 9  ;;  %v7470_v61 = vsel %vm6650_vm7, %v5382_v18, %v2845_v21  ;;  %v6219_v18 = vld [vmem:[%s6332_s25 + $0x90] sm:$0xff]  }
  0xc3   : > { %6016 = vmatprep.mubr.msk.bf16.mxu0 %vm694_vm3, %v5339_v58  ;;  %v7466_v48 = vsel %vm6650_vm7, %v2833_v29, %v2834_v41  ;;  %v2847_v12 = vrot.slane %v2845_v21, 4  ;;  %v2852_v34 = vrot.slane %v7025_v28, 5  ;;  %v5369_v58 = vld [vmem:[%s6332_s25 + $0x6c] sm:$0xe]  ;;  %v2855_v44 = vrot.slane %v7052_v27, 5  ;;  %v9060_v29 = vld [vmem:[#allocation5_spill] sm:$0xff] }
  0xc4   : > { %v5397_v43 = vcombine.low %v7454_v5, %v7466_v48  ;;  %v7479_v23 = vsel %vm6650_vm7, %v2840_v36, %v2841_v40  ;;  %v5384_v50 = vrot.slane %v5368_v35, 9  ;;  %v2859_v7 = vrot.slane %v7056_v10, 5  ;;  %v5372_v35 = vld [vmem:[%s6332_s25 + $0x90] sm:$0xe]  ;;  %v9070_v27 = vld [vmem:[#allocation2_spill] sm:$0xff] }
  0xc5   : > { %5979 = vmatmul.mubr.msk.bf16.gmra.mxu1 %vm694_vm3, %v6217_v16  ;;  %v5398_v28 = vcombine.low %v7461_v38, %v7479_v23  ;;  %v7488_v52 = vsel %vm6650_vm7, %v2847_v12, %v2848_v59  ;;  %v7492_v57 = vsel %vm6650_vm7, %v5383_v47, %v2852_v34  ;;  %v2854_v11 = vrot.slane %v2852_v34, 4  ;;  %v9061_v59 = vld [vmem:[#allocation6_spill] sm:$0xff] }
  0xc6   : > { %5982 = vmatprep.mubr.msk.bf16.mxu1 %vm694_vm3, %v6218_v20  ;;  %v2862_v45 = vrot.slane %v7105_v60, 5  ;;  %v5385_v41 = vrot.slane %v5369_v58, 9  ;;  %v2866_v16 = vrot.slane %v7078_v26, 5  ;;  %v2869_v32 = vrot.slane %v7129_v19, 5  ;;  %v6220_v26 = vld [vmem:[%s6332_s25 + $0x9c] sm:$0xff]   ;;  %v6221_v20 = vld [vmem:[%s6332_s25 + $0xa8] sm:$0xff]  }
  0xc7   : > { %v7501_v55 = vsel %vm6650_vm7, %v2854_v11, %v2855_v44  ;;  %v5386_v40 = vrot.slane %v5370_v13, 9  ;;  %v7510_v10 = vsel %vm6650_vm7, %v5384_v50, %v2859_v7  ;;  %v2861_v60 = vrot.slane %v2859_v7, 4  ;;  %v9062_v44 = vld [vmem:[#allocation7_spill] sm:$0xff]  ;;  %v5373_v13 = vld [vmem:[%s6332_s25 + $0x9c] sm:$0xe] }
  0xc8   : > { %v2873_v21 = vrot.slane %v9060_v29, 5  ;;  %v7519_v19 = vsel %vm6650_vm7, %v5385_v41, %v2866_v16  ;;  %v2868_v36 = vrot.slane %v2866_v16, 4  ;;  %v2876_v47 = vrot.slane %v9061_v59, 5  ;;  %v5376_v11 = vld [vmem:[%s6332_s25 + $0xc0] sm:$0xe] }
  0xc9   : > { %v5387_v12 = vrot.slane %v5371_v22, 9  ;;  %v7526_v34 = vsel %vm6650_vm7, %v2861_v60, %v2862_v45  ;;  %v2880_v50 = vrot.slane %v9062_v44, 5  ;;  %v5388_v45 = vrot.slane %v5372_v35, 9  ;;  %v5374_v22 = vld [vmem:[%s6332_s25 + $0xa8] sm:$0xe]  ;;  %v9065_v35 = vld [vmem:[#allocation9_spill] sm:$0xff] }
  0xca   : > { %6017 = vmatmul.mubr.msk.bf16.gmra.mxu0 %vm694_vm3, %v7363_v51  ;;  %v7530_v51 = vsel %vm6650_vm7, %v5386_v40, %v2873_v21  ;;  %v2875_v58 = vrot.slane %v2873_v21, 4  ;;  %v7538_v7 = vsel %vm6650_vm7, %v2868_v36, %v2869_v32  ;;  %v2890_v36 = vrot.slane %v9065_v35, 5  ;;  %v5375_v44 = vld [vmem:[%s6332_s25 + $0xb4] sm:$0xe] }
  0xcb   : > { %6020 = vmatprep.mubr.msk.bf16.mxu0 %vm694_vm3, %v7408_v39  ;;  %v9063_v39 = vld [vmem:[#allocation8_spill] sm:$0xff]  ;;  %v7551_v60 = vsel %vm6650_vm7, %v5387_v12, %v2880_v50  ;;  %v2882_v32 = vrot.slane %v2880_v50, 4  ;;  %v5389_v59 = vrot.slane %v5373_v13, 9  ;;  %v9066_v12 = vld [vmem:[#allocation10_spill] sm:$0xff]  ;;  %v5390_v16 = vrot.slane %v5374_v22, 9  ;;  %v9068_v13 = vld [vmem:[#allocation11_spill] sm:$0xff] }
  0xcc   : > { %v2883_v41 = vrot.slane %v9063_v39, 5  ;;  %v7547_v40 = vsel %vm6650_vm7, %v2875_v58, %v2876_v47  ;;  %v2894_v58 = vrot.slane %v9066_v12, 5  ;;  %v9067_v50 = vld [vmem:[#allocation12_spill] sm:$0xff]  ;;  %v2901_v29 = vrot.slane %v9068_v13, 5 }
  0xcd   : > { %5983 = vmatmul.mubr.msk.bf16.gmra.mxu1 %vm694_vm3, %v6219_v18  ;;  %v9064_v18 = vld [vmem:[#allocation3_spill] sm:$0xff]  ;;  %v2897_v39 = vrot.slane %v9067_v50, 5  ;;  %v9069_v12 = vld [vmem:[#allocation4_spill] sm:$0xff]  ;;  %v5391_v22 = vrot.slane %v5375_v44, 9  ;;  %v2814_v63 = vsel %vm6650_vm7, %v7428_v17, %v2813_v0  ;;  %v6244_v17 = vld [vmem:[%s6332_s25 + $0x20] sm:$0x1] }
  0xce   : > { %5986 = vmatprep.mubr.msk.bf16.mxu1 %vm694_vm3, %v6220_v26  ;;  %v2887_v21 = vrot.slane %v9064_v18, 5  ;;  %v7561_v47 = vsel %vm6650_vm7, %v2882_v32, %v2883_v41  ;;  %v7576_v41 = vsel %vm6650_vm7, %v5389_v59, %v2894_v58  ;;  %v2896_v32 = vrot.slane %v2894_v58, 4  ;;  %v6222_v26 = vld [vmem:[%s6332_s25 + $0xb4] sm:$0xff]  }
  0xcf   : > { %v2904_v50 = vrot.slane %v9069_v12, 5  ;;  %v2903_v13 = vrot.slane %v2901_v29, 4  ;;  %v2908_v59 = vrot.slane %v9070_v27, 5  ;;  %v5392_v58 = vrot.slane %v5376_v11, 9 }
  0xd0   : > { %v7569_v18 = vsel %vm6650_vm7, %v5388_v45, %v2887_v21  ;;  %v2889_v35 = vrot.slane %v2887_v21, 4  ;;  %v7588_v21 = vsel %vm6650_vm7, %v5390_v16, %v2901_v29  ;;  %v2915_v11 = vrot.slane %v7309_v3, 5 }
  0xd1   : > { %v7604_v27 = vsel %vm6650_vm7, %v2903_v13, %v2904_v50  ;;  %v2910_v29 = vrot.slane %v2908_v59, 4  ;;  %v2811_v3 = vsel %vm6650_vm7, %v5377_v24, %v2810_v1  ;;  %v6226_v13 = vld [vmem:[%s6332_s25 + $0x30] sm:$0xff]  }
  0xd2   : > { %6021 = vmatmul.mubr.msk.bf16.gmra.mxu0 %vm694_vm3, %v7410_v15  ;;  %v7584_v45 = vsel %vm6650_vm7, %v2889_v35, %v2890_v36  ;;  %v7597_v15 = vsel %vm6650_vm7, %v2896_v32, %v2897_v39  ;;  %v2911_v36 = vrot.slane %v7300_v53, 5  ;;  %v2918_v39 = vrot.slane %v7327_v31, 5  ;;  %v5362_v31 = vld [vmem:[%s6332_s25 + $0x18] sm:$0xe] }
  0xd3   : > { %6024 = vmatprep.mubr.msk.bf16.mxu0 %vm694_vm3, %v7416_v8  ;;  %v7608_v8 = vsel %vm6650_vm7, %v5391_v22, %v2908_v59  ;;  %v7648_v33 = vsel %vm6650_vm7, %v5392_v58, %v2915_v11  ;;  %v2917_v1 = vrot.slane %v2915_v11, 4  ;;  %v5378_v24 = vrot.slane %v5362_v31, 9  ;;  %v6225_v22 = vld [vmem:[%s6332_s25 + $0x24] sm:$0xff]   ;;  %v5491_v59 = vld [vmem:[%s6332_s25 + $0x18] sm:$0xf] }
  0xd4   : > { %v7636_v2 = vsel %vm6650_vm7, %v2910_v29, %v2911_v36  ;;  %v5394_v0 = vcombine.low %v2811_v3, %v2814_v63  ;;  %v5492_v58 = vld [vmem:[%s6332_s25 + $0x1c] sm:$0xf]  ;;  %v5494_v29 = vld [vmem:[%s6332_s25 + $0x24] sm:$0xf]  ;;  %v3622_v11 = vshrl.u32 %v5491_v59, 16 }
  0xd5   : > { %5987 = vmatmul.mubr.msk.bf16.gmra.mxu1 %vm694_vm3, %v6221_v20  ;;  %v5344_v20 = vcombine.low %v2439_v9, %v2449_v25  ;;  %v7653_v56 = vsel %vm6650_vm7, %v2917_v1, %v2918_v39  ;;  %v2820_v25 = vrot.slane %v6244_v17, 5  ;;  %v3625_v39 = vshll.u32 %v5491_v59, 16  ;;  %v6228_v1 = vld [vmem:[%s6332_s25 + $0x48] sm:$0xff]  }
  0xd6   : > { %5990 = vmatprep.mubr.msk.bf16.mxu1 %vm694_vm3, %v6222_v26  ;;  %v6243_v26 = vld [vmem:[%s6332_s25 + $0x1c] sm:$0xf]  ;;  %v3631_v3 = vshll.u32 %v5492_v58, 16  ;;  %v3635_v31 = vshrl.u32 %v5492_v58, 16 }
  0xd7   : > { %v2817_v35 = vrot.slane %v6243_v26, 5  ;;  %v3646_v26 = vshrl.u32 %v5494_v29, 16 }
  0xd8   : > { %v3637_v17 = vrot.slane %v3635_v31, 4 }
  0xd9   : > { %v2819_v9 = vrot.slane %v2817_v35, 4  ;;  %v2818_v12 = vsel %vm6650_vm7, %v5378_v24, %v2817_v35  ;;  %v3649_v35 = vshll.u32 %v5494_v29, 16  ;;  %v3624_v24 = vrot.slane %v3622_v11, 4 }
  0xda   : > { %6025 = vmatmul.mubr.msk.bf16.gmra.mxu0 %vm694_vm3, %v5344_v20  ;;  %v7675_v20 = vld [vmem:[%s6332_s25 + $0x28] sm:$0xf]  ;;  %v3648_v42 = vrot.slane %v3646_v26, 4 }
  0xdb   : > { %6064 = vmatprep.mubr.msk.bf16.mxu0 %vm694_vm3, %v6224_v46  ;;  %v2821_v50 = vsel %vm6650_vm7, %v2819_v9, %v2820_v25  ;;  %v3655_v63 = vshll.u32 %v7675_v20, 16  ;;  %v3659_v46 = vshrl.u32 %v7675_v20, 16  ;;  %v7688_v9 = vrot.slane %v3631_v3, 5 }
  0xdc   : > { %v5395_v36 = vcombine.low %v2818_v12, %v2821_v50  ;;  %v4365_v25 = vrot.slane %v5492_v58, 5  ;;  %v7692_v12 = vld [vmem:[%s6332_s25 + $0x2c] sm:$0x1]  ;;  %v3651_v30 = vrot.slane %v3649_v35, 5  ;;  %v7702_v58 = vld [vmem:[%s6332_s25 + $0x34] sm:$0xf] }
  0xdd   : > { %5991 = vmatmul.mubr.msk.bf16.gmra.mxu1 %vm694_vm3, %v6223_v14  ;;  %v5493_v14 = vld [vmem:[%s6332_s25 + $0x20] sm:$0x1]  ;;  %v7697_v50 = vrot.slane %v3655_v63, 5  ;;  %v3638_v11 = vor.u32 %v3637_v17, %v7688_v9  ;;  %v3665_v31 = vshll.u32 %v7692_v12, 16  ;;  %v4372_v63 = vrot.slane %v7675_v20, 5 }
  0xde   : > { %6030 = vmatprep.mubr.msk.bf16.mxu1 %vm694_vm3, %v5394_v0  ;;  %v3627_v0 = vrot.slane %v3625_v39, 5  ;;  %v4367_v39 = vrot.slane %v4365_v25, 4  ;;  %v4368_v3 = vrot.slane %v5493_v14, 5  ;;  %v3652_v35 = vor.u32 %v3651_v30, %v3648_v42  ;;  %v5500_v30 = vld [vmem:[%s6332_s25 + $0x3c] sm:$0xf] }
  0xdf   : > { %v3639_v23 = vrot.slane %v3638_v11, 4  ;;  %v4374_v32 = vrot.slane %v4372_v63, 4  ;;  %v7741_v11 = vld [vmem:[%s6332_s25 + $0x38] sm:$0x1] }
  0xe0   : > { %v3628_v59 = vor.u32 %v3627_v0, %v3624_v24  ;;  %v3683_v24 = vshrl.u32 %v7702_v58, 16  ;;  %v6230_v0 = vld [vmem:[%s6332_s25 + $0x60] sm:$0xff]  }
  0xe2   : > { %6065 = vmatmul.mubr.msk.bf16.vlgmr.msra.gmra.mxu0 %vm694_vm3, %v6225_v22  ;;  %v3661_v22 = vrot.slane %v3659_v46, 4  ;;  %v3629_v17 = vrot.slane %v3628_v59, 4  ;;  %v4375_v59 = vrot.slane %v7692_v12, 5 }
  0xe3   : > { %6131 = vmatpush3.bf16.msra.mxu0 %v7405_v54  ;;  %6068 = vmatprep.mubr.msk.bf16.mxu0 %vm694_vm3, %v6226_v13  ;;  %v6227_v54 = vld [vmem:[%s6332_s25 + $0x3c] sm:$0xff]   ;;  %v5497_v13 = vld [vmem:[%s6332_s25 + $0x30] sm:$0xf] }
  0xe4   : > { %v3670_v46 = vshrl.u32 %v5497_v13, 16  ;;  %v3662_v5 = vor.u32 %v3661_v22, %v7697_v50  ;;  %v3673_v48 = vshll.u32 %v5497_v13, 16  ;;  %v3653_v13 = vrot.slane %v3652_v35, 4 }
  0xe5   : > { %6031 = vmatmul.mubr.msk.bf16.vlgmr.msra.gmra.mxu1 %vm694_vm3, %v5395_v36  ;;  %v3641_v36 = vshll.u32 %v5493_v14, 16  ;;  %v3694_v35 = vshrl.u32 %v5500_v30, 16  ;;  %v3634_v12 = vsel %vm6384_vm4, %v3629_v17, %v7688_v9  ;;  %v3689_v17 = vshll.u32 %v7741_v11, 16 }
  0xe6   : > { %6097 = vmatpush3.bf16.msra.mxu1 %v7369_v6  ;;  %6034 = vmatprep.mubr.msk.bf16.mxu1 %vm694_vm3, %v5396_v4  ;;  %v5572_v6 = vld [vmem:[%s6332_s25 + $0x18] sm:$0xe]  ;;  %v7695_v4 = vpop.f32.mrf.mxu0  ;;  %v3658_v9 = vsel %vm6384_vm4, %v3653_v13, %v7697_v50  ;;  %v4379_v13 = vrot.slane %v7702_v58, 5 }
  0xe7   : > { %v5588_v29 = vrot.slane %v5572_v6, 9  ;;  %v3643_v20 = vrot.slane %v3641_v36, 5  ;;  %v3667_v6 = vrot.slane %v3665_v31, 5  ;;  %v3672_v36 = vrot.slane %v3670_v46, 4 }
  0xe8   : > { %v7719_v14 = vpop.f32.mrf.mxu0  ;;  %v3685_v31 = vrot.slane %v3683_v24, 4  ;;  %v7809_v16 = vrot.slane %v3689_v17, 5  ;;  %v4381_v44 = vrot.slane %v4379_v13, 4 }
  0xe9   : > { %v7727_v38 = vsel %vm6650_vm7, %v5588_v29, %v4365_v25  ;;  %v3663_v29 = vrot.slane %v3662_v5, 4  ;;  %v3644_v46 = vsel %vm6384_vm4, %v3639_v23, %v3643_v20  ;;  %v7754_v5 = vld [vmem:[%s6332_s25 + $0x40] sm:$0xf]  ;;  %v9075_v20 = vcombine.low %v7492_v57, %v7501_v55  ;;  %v6231_v23 = vld [vmem:[%s6332_s25 + $0x6c] sm:$0xff]  }
  0xea   : > { %6069 = vmatmul.mubr.msk.bf16.gmra.mxu0 %vm694_vm3, %v6227_v54  ;;  %v5573_v54 = vld [vmem:[%s6332_s25 + $0x24] sm:$0xe]  ;;  %v7738_v25 = vpop.f32.mrf.mxu0  ;;  %v3703_v57 = vshll.u32 %v7754_v5, 16  ;;  %v3707_v55 = vshrl.u32 %v7754_v5, 16 }
  0xeb   : > { %6072 = vmatprep.mubr.msk.bf16.mxu0 %vm694_vm3, %v6228_v1  ;;  %v7710_v26 = vpop.f32.mrf.mxu1  ;;  %v6229_v1 = vld [vmem:[%s6332_s25 + $0x54] sm:$0xff]   ;;  %v5589_v42 = vrot.slane %v5573_v54, 9  ;;  %v3697_v54 = vshll.u32 %v5500_v30, 16  ;;  %v5574_v30 = vld [vmem:[%s6332_s25 + $0x30] sm:$0xe] }
  0xec   : > { %9071 = vst [vmem:[#allocation5_spill] sm:$0xff] %v7710_v26  ;;  %v7783_v50 = vpop.f32.mrf.mxu0 }
  0xed   : > { %6035 = vmatmul.mubr.msk.bf16.gmra.mxu1 %vm694_vm3, %v5397_v43  ;;  %v3679_v43 = vshll.u32 %v7702_v58, 16  ;;  %v7734_v22 = vpop.f32.mrf.mxu1  ;;  %v7767_v24 = vsel %vm6650_vm7, %v5589_v42, %v4372_v63  ;;  %v3668_v63 = vsel %vm6384_vm4, %v3663_v29, %v3667_v6  ;;  %v7797_v29 = vcombine.low %v3634_v12, %v3644_v46  ;;  %v7813_v46 = vld [vmem:[%s6332_s25 + $0x58] sm:$0xf] }
  0xee   : > { %6038 = vmatprep.mubr.msk.bf16.mxu1 %vm694_vm3, %v5398_v28  ;;  %v7731_v28 = vsel %vm6650_vm7, %v4367_v39, %v4368_v3  ;;  %9072 = vst [vmem:[#allocation6_spill] sm:$0xff] %v7734_v22  ;;  %v3675_v39 = vrot.slane %v3673_v48, 5  ;;  %v9073_v48 = vcombine.low %v7470_v61, %v7488_v52  ;;  %v5503_v61 = vld [vmem:[%s6332_s25 + $0x48] sm:$0xf]  ;;  %v7776_v52 = vld [vmem:[%s6332_s25 + $0x4c] sm:$0xf]  ;;  %v7799_v58 = vcombine.low %v3658_v9, %v3668_v63 }
  0xef   : > { %v7743_v3 = vrot.slane %v3679_v43, 5  ;;  %v7760_v43 = vpop.f32.mrf.mxu1  ;;  %v3721_v49 = vshll.u32 %v5503_v61, 16  ;;  %v3727_v53 = vshll.u32 %v7776_v52, 16  ;;  %v3731_v6 = vshrl.u32 %v7776_v52, 16  ;;  %v7819_v63 = vld [vmem:[%s6332_s25 + $0x44] sm:$0x1] }
  0xf0   : > { %9074 = vst [vmem:[#allocation7_spill] sm:$0xff] %v7760_v43  ;;  %v3676_v42 = vor.u32 %v3675_v39, %v3672_v36  ;;  %v4382_v12 = vrot.slane %v7741_v11, 5  ;;  %v5575_v39 = vld [vmem:[%s6332_s25 + $0x3c] sm:$0xe]  ;;  %v9078_v22 = vcombine.low %v7510_v10, %v7526_v34 }
  0xf1   : > { %v7795_v36 = vpop.f32.mrf.mxu1  ;;  %v7824_v43 = vrot.slane %v3727_v53, 5  ;;  %v3733_v11 = vrot.slane %v3731_v6, 4  ;;  %v9080_v53 = vcombine.low %v7519_v19, %v7538_v7  ;;  %v4386_v19 = vrot.slane %v7754_v5, 5  ;;  %v6234_v7 = vld [vmem:[%s6332_s25 + $0x90] sm:$0xff]   ;;  %v5509_v5 = vld [vmem:[%s6332_s25 + $0x60] sm:$0xf] }
  0xf2   : > { %6073 = vmatmul.mubr.msk.bf16.gmra.mxu0 %vm694_vm3, %v6229_v1  ;;  %v3699_v1 = vrot.slane %v3697_v54, 5  ;;  %9076 = vst [vmem:[#allocation8_spill] sm:$0xff] %v7795_v36  ;;  %v3723_v36 = vrot.slane %v3721_v49, 5  ;;  %v6233_v49 = vld [vmem:[%s6332_s25 + $0x84] sm:$0xff]   ;;  %v5591_v34 = vrot.slane %v5575_v39, 9 }
  0xf3   : > { %6076 = vmatprep.mubr.msk.bf16.mxu0 %vm694_vm3, %v6230_v0  ;;  %v7771_v0 = vsel %vm6650_vm7, %v4374_v32, %v4375_v59  ;;  %v3686_v32 = vor.u32 %v3685_v31, %v7743_v3  ;;  %v6232_v59 = vld [vmem:[%s6332_s25 + $0x78] sm:$0xff]   ;;  %v5590_v31 = vrot.slane %v5574_v30, 9 }
  0xf5   : > { %6039 = vmatmul.mubr.msk.bf16.gmra.mxu1 %vm694_vm3, %v9073_v48  ;;  %v3696_v48 = vrot.slane %v3694_v35, 4  ;;  %v5506_v35 = vld [vmem:[%s6332_s25 + $0x54] sm:$0xf]  ;;  %v7816_v9 = vrot.slane %v3686_v32, 4 }
  0xf6   : > { %6042 = vmatprep.mubr.msk.bf16.mxu1 %vm694_vm3, %v9075_v20  ;;  %v3718_v20 = vshrl.u32 %v5503_v61, 16  ;;  %v7807_v61 = vrot.slane %v3676_v42, 4  ;;  %v3709_v42 = vrot.slane %v3707_v55, 4  ;;  %v3755_v55 = vshrl.u32 %v7813_v46, 16 }
  0xf7   : > { %v7805_v54 = vpop.f32.mrf.mxu0  ;;  %v3700_v30 = vor.u32 %v3699_v1, %v3696_v48  ;;  %v3742_v1 = vshrl.u32 %v5506_v35, 16  ;;  %v3745_v48 = vshll.u32 %v5506_v35, 16 }
  0xf8   : > { %9077 = vst [vmem:[#allocation3_spill] sm:$0xff] %v7805_v54  ;;  %v3720_v17 = vrot.slane %v3718_v20, 4  ;;  %v7854_v20 = vsel %vm6650_vm7, %v4381_v44, %v4382_v12  ;;  %v3734_v44 = vor.u32 %v3733_v11, %v7824_v43  ;;  %v4393_v11 = vrot.slane %v7776_v52, 5  ;;  %v7881_v54 = vld [vmem:[%s6332_s25 + $0x5c] sm:$0x1] }
  0xf9   : > { %v7842_v10 = vpop.f32.mrf.mxu0  ;;  %v3744_v26 = vrot.slane %v3742_v1, 4  ;;  %v9084_v52 = vcombine.low %v7530_v51, %v7547_v40  ;;  %v9086_v51 = vcombine.low %v7551_v60, %v7561_v47  ;;  %v6235_v40 = vld [vmem:[%s6332_s25 + $0x9c] sm:$0xff]   ;;  %v4400_v60 = vrot.slane %v7813_v46, 5 }
  0xfa   : > { %6077 = vmatmul.mubr.msk.bf16.gmra.mxu0 %vm694_vm3, %v6231_v23  ;;  %v7821_v23 = vrot.slane %v3703_v57, 5  ;;  %v3751_v57 = vshll.u32 %v7813_v46, 16  ;;  %9081 = vst [vmem:[#allocation10_spill] sm:$0xff] %v7842_v10  ;;  %v3747_v10 = vrot.slane %v3745_v48, 5 }
  0xfb   : > { %6080 = vmatprep.mubr.msk.bf16.mxu0 %vm694_vm3, %v6232_v59  ;;  %v7830_v32 = vpop.f32.mrf.mxu1  ;;  %v7833_v59 = vld [vmem:[%s6332_s25 + $0x50] sm:$0x1]  ;;  %v7874_v39 = vpop.f32.mrf.mxu0 }
  0xfc   : > { %9079 = vst [vmem:[#allocation9_spill] sm:$0xff] %v7830_v32  ;;  %v3710_v35 = vor.u32 %v3709_v42, %v7821_v23  ;;  %v7864_v32 = vrot.slane %v3700_v30, 4  ;;  %v7871_v6 = vrot.slane %v3751_v57, 5  ;;  %v3757_v42 = vrot.slane %v3755_v55, 4  ;;  %9083 = vst [vmem:[#allocation11_spill] sm:$0xff] %v7874_v39 }
  0xfd   : > { %6043 = vmatmul.mubr.msk.bf16.gmra.mxu1 %vm694_vm3, %v9078_v22  ;;  %v7850_v22 = vsel %vm6650_vm7, %v5590_v31, %v4379_v13  ;;  %v3724_v13 = vor.u32 %v3723_v36, %v3720_v17  ;;  %v3737_v31 = vshll.u32 %v7833_v59, 16  ;;  %v7869_v12 = vpop.f32.mrf.mxu1  ;;  %v4388_v30 = vrot.slane %v4386_v19, 4  ;;  %v5576_v57 = vld [vmem:[%s6332_s25 + $0x48] sm:$0xe] }
  0xfe   : > { %6046 = vmatprep.mubr.msk.bf16.mxu1 %vm694_vm3, %v9080_v53  ;;  %v3713_v53 = vshll.u32 %v7819_v63, 16  ;;  %9082 = vst [vmem:[#allocation12_spill] sm:$0xff] %v7869_v12  ;;  %v4389_v17 = vrot.slane %v7819_v63, 5  ;;  %v3711_v1 = vrot.slane %v3710_v35, 4  ;;  %v3766_v55 = vshrl.u32 %v5509_v5, 16 }
  0xff   : > { %v7887_v12 = vsel %vm6650_vm7, %v5591_v34, %v4386_v19  ;;  %v3725_v36 = vrot.slane %v3724_v13, 4  ;;  %v3735_v39 = vrot.slane %v3734_v44, 4  ;;  %v3739_v63 = vrot.slane %v3737_v31, 5  ;;  %v7902_v13 = vld [vmem:[%s6332_s25 + $0x64] sm:$0xf]  ;;  %v7909_v44 = vpop.f32.mrf.mxu0 }
 0x100   : > { %v3715_v48 = vrot.slane %v3713_v53, 5  ;;  %v3706_v35 = vsel %vm6384_vm4, %v7864_v32, %v7821_v23  ;;  %v3748_v53 = vor.u32 %v3747_v10, %v3744_v26  ;;  %v3758_v34 = vor.u32 %v3757_v42, %v7871_v6  ;;  %9087 = vst [vmem:[#allocation2_spill] sm:$0xff] %v7909_v44  ;;  %v5577_v10 = vld [vmem:[%s6332_s25 + $0x54] sm:$0xe]  ;;  %v6239_v44 = vld [vmem:[%s6332_s25 + $0xcc] sm:$0xff]  }
 0x101   : > { %v3761_v19 = vshll.u32 %v7881_v54, 16  ;;  %v7913_v31 = vsel %vm6650_vm7, %v4388_v30, %v4389_v17  ;;  %v5592_v23 = vrot.slane %v5576_v57, 9  ;;  %v4395_v26 = vrot.slane %v4393_v11, 4 }
 0x102   : > { %6081 = vmatmul.mubr.msk.bf16.gmra.mxu0 %vm694_vm3, %v6233_v49  ;;  %v3769_v49 = vshll.u32 %v5509_v5, 16  ;;  %v4396_v32 = vrot.slane %v7833_v59, 5  ;;  %v6236_v5 = vld [vmem:[%s6332_s25 + $0xa8] sm:$0xff]   ;;  %v3716_v42 = vsel %vm6384_vm4, %v3711_v1, %v3715_v48  ;;  %v3768_v47 = vrot.slane %v3766_v55, 4 }
 0x103   : > { %6084 = vmatprep.mubr.msk.bf16.mxu0 %vm694_vm3, %v6234_v7  ;;  %v7893_v7 = vpop.f32.mrf.mxu1  ;;  %v3740_v30 = vsel %vm6384_vm4, %v3735_v39, %v3739_v63  ;;  %v3775_v17 = vshll.u32 %v7902_v13, 16  ;;  %v3779_v59 = vshrl.u32 %v7902_v13, 16  ;;  %v3759_v1 = vrot.slane %v3758_v34, 4  ;;  %v7931_v55 = vld [vmem:[%s6332_s25 + $0x68] sm:$0x1] }
 0x104   : > { %9085 = vst [vmem:[#allocation4_spill] sm:$0xff] %v7893_v7  ;;  %v3749_v7 = vrot.slane %v3748_v53, 4  ;;  %v3763_v46 = vrot.slane %v3761_v19, 5  ;;  %v5593_v48 = vrot.slane %v5577_v10, 9  ;;  %v9090_v39 = vsel %vm6384_vm4, %v7816_v9, %v7809_v16  ;;  %v5512_v19 = vld [vmem:[%s6332_s25 + $0x6c] sm:$0xf] }
 0x105   : > { %6047 = vmatmul.mubr.msk.bf16.gmra.mxu1 %vm694_vm3, %v9084_v52  ;;  %v3771_v52 = vrot.slane %v3769_v49, 5  ;;  %v7928_v57 = vpop.f32.mrf.mxu1  ;;  %v7952_v53 = vsel %vm6650_vm7, %v5592_v23, %v4393_v11  ;;  %v7956_v34 = vsel %vm6650_vm7, %v4395_v26, %v4396_v32  ;;  %v7959_v16 = vcombine.low %v3706_v35, %v3716_v42  ;;  %v5578_v32 = vld [vmem:[%s6332_s25 + $0x60] sm:$0xe]  ;;  %v5518_v42 = vld [vmem:[%s6332_s25 + $0x84] sm:$0xf] }
 0x106   : > { %6050 = vmatprep.mubr.msk.bf16.mxu1 %vm694_vm3, %v9086_v51  ;;  %v3730_v51 = vsel %vm6384_vm4, %v3725_v36, %v7824_v43  ;;  %9088 = vst [vmem:[#allocation13_spill] sm:$0xff] %v7928_v57  ;;  %v9091_v36 = vsel %vm6384_vm4, %v7807_v61, %v7743_v3  ;;  %v4402_v3 = vrot.slane %v4400_v60, 4  ;;  %v4403_v61 = vrot.slane %v7881_v54, 5 }
 0x107   : > { %v7946_v49 = vcombine.low %v9091_v36, %v9090_v39  ;;  %9092 = vst [vmem:[#allocation15_spill] sm:$0xff] %v7959_v16  ;;  %v3772_v9 = vor.u32 %v3771_v52, %v3768_v47  ;;  %v7966_v10 = vcombine.low %v3730_v51, %v3740_v30  ;;  %v7968_v11 = vrot.slane %v3775_v17, 5 }
 0x108   : > { %v7934_v43 = vpop.f32.mrf.mxu0  ;;  %v7970_v23 = vrot.slane %v3779_v59, 4  ;;  %v3785_v26 = vshll.u32 %v7931_v55, 16  ;;  %v9094_v35 = vcombine.low %v7569_v18, %v7584_v45  ;;  %v3754_v47 = vsel %vm6384_vm4, %v3749_v7, %v7871_v6  ;;  %v5515_v18 = vld [vmem:[%s6332_s25 + $0x78] sm:$0xf] }
 0x109   : > { %9089 = vst [vmem:[#allocation14_spill] sm:$0xff] %v7934_v43  ;;  %9093 = vst [vmem:[#allocation16_spill] sm:$0xff] %v7966_v10  ;;  %v3764_v52 = vsel %vm6384_vm4, %v3759_v1, %v3763_v46  ;;  %v7990_v51 = vsel %vm6650_vm7, %v5593_v48, %v4400_v60  ;;  %v9096_v45 = vcombine.low %v7576_v41, %v7597_v15  ;;  %v3790_v17 = vshrl.u32 %v5512_v19, 16  ;;  %v8002_v1 = vld [vmem:[%s6332_s25 + $0x7c] sm:$0xf]  ;;  %v6238_v60 = vld [vmem:[%s6332_s25 + $0xc0] sm:$0xff]  }
 0x10a   : > { %6085 = vmatmul.mubr.msk.bf16.gmra.mxu0 %vm694_vm3, %v6235_v40  ;;  %v7964_v40 = vld [vmem:[%s6332_s25 + $0x70] sm:$0xf]  ;;  %v7997_v30 = vpop.f32.mrf.mxu0  ;;  %v3793_v59 = vshll.u32 %v5512_v19, 16  ;;  %v8007_v46 = vsel %vm6650_vm7, %v4402_v3, %v4403_v61  ;;  %v8009_v41 = vrot.slane %v3772_v9, 4  ;;  %v5594_v15 = vrot.slane %v5578_v32, 9 }
 0x10b   : > { %6088 = vmatprep.mubr.msk.bf16.mxu0 %vm694_vm3, %v6236_v5  ;;  %v6237_v5 = vld [vmem:[%s6332_s25 + $0xb4] sm:$0xff]   ;;  %9097 = vst [vmem:[#allocation18_spill] sm:$0xff] %v7997_v30  ;;  %v3799_v6 = vshll.u32 %v7964_v40, 16  ;;  %v3803_v7 = vshrl.u32 %v7964_v40, 16  ;;  %v4407_v48 = vrot.slane %v7902_v13, 5  ;;  %v8012_v39 = vcombine.low %v3754_v47, %v3764_v52 }
 0x10c   : > { %v3782_v36 = vor.u32 %v7970_v23, %v7968_v11  ;;  %v8016_v19 = vrot.slane %v3785_v26, 5  ;;  %v3814_v3 = vshrl.u32 %v5515_v18, 16  ;;  %v3817_v61 = vshll.u32 %v5515_v18, 16  ;;  %v8028_v32 = vld [vmem:[%s6332_s25 + $0x88] sm:$0xf]  ;;  %v8031_v23 = vpop.f32.mrf.mxu0 }
 0x10d   : > { %6051 = vmatmul.mubr.msk.bf16.gmra.mxu1 %vm694_vm3, %v9094_v35  ;;  %v7978_v54 = vpop.f32.mrf.mxu1  ;;  %9098 = vst [vmem:[#allocation19_spill] sm:$0xff] %v8012_v39  ;;  %v4410_v35 = vrot.slane %v7931_v55, 5  ;;  %v3823_v13 = vshll.u32 %v8002_v1, 16  ;;  %v3827_v9 = vshrl.u32 %v8002_v1, 16  ;;  %9100 = vst [vmem:[#allocation21_spill] sm:$0xff] %v8031_v23  ;;  %v3792_v55 = vrot.slane %v3790_v17, 4 }
 0x10e   : > { %9095 = vst [vmem:[#allocation17_spill] sm:$0xff] %v7978_v54  ;;  %6054 = vmatprep.mubr.msk.bf16.mxu1 %vm694_vm3, %v9096_v45  ;;  %v8020_v45 = vld [vmem:[%s6332_s25 + $0x74] sm:$0x1]  ;;  %v3795_v26 = vrot.slane %v3793_v59, 5  ;;  %v8033_v47 = vrot.slane %v3799_v6, 5  ;;  %v3805_v52 = vrot.slane %v3803_v7, 4  ;;  %v9101_v18 = vcombine.low %v7588_v21, %v7604_v27  ;;  %v8061_v39 = vpop.f32.mrf.mxu0 }
 0x10f   : > { %v8023_v63 = vpop.f32.mrf.mxu1  ;;  %v4409_v54 = vrot.slane %v4407_v48, 4  ;;  %v8046_v17 = vld [vmem:[%s6332_s25 + $0x80] sm:$0x1]  ;;  %v8049_v59 = vld [vmem:[%s6332_s25 + $0x6c] sm:$0xe]  ;;  %v3838_v6 = vshrl.u32 %v5518_v42, 16 }
 0x110   : > { %9099 = vst [vmem:[#allocation20_spill] sm:$0xff] %v8023_v63  ;;  %v8042_v63 = vsel %vm6650_vm7, %v5594_v15, %v4407_v48  ;;  %v3841_v7 = vshll.u32 %v5518_v42, 16  ;;  %v3851_v57 = vshrl.u32 %v8028_v32, 16  ;;  %v3816_v48 = vrot.slane %v3814_v3, 4  ;;  %9103 = vst [vmem:[#allocation23_spill] sm:$0xff] %v8061_v39 }
 0x111   : > { %v8057_v15 = vpop.f32.mrf.mxu1  ;;  %v3819_v23 = vrot.slane %v3817_v61, 5  ;;  %v8059_v30 = vrot.slane %v3823_v13, 5  ;;  %v3829_v43 = vrot.slane %v3827_v9, 4  ;;  %v9104_v42 = vcombine.low %v7608_v8, %v7636_v2  ;;  %v8080_v2 = vld [vmem:[%s6332_s25 + $0x8c] sm:$0x1] }
 0x112   : > { %6089 = vmatmul.mubr.msk.bf16.gmra.mxu0 %vm694_vm3, %v6237_v5  ;;  %v3809_v5 = vshll.u32 %v8020_v45, 16  ;;  %9102 = vst [vmem:[#allocation22_spill] sm:$0xff] %v8057_v15  ;;  %v3796_v21 = vor.u32 %v3795_v26, %v3792_v55  ;;  %v3806_v27 = vor.u32 %v3805_v52, %v8033_v47  ;;  %v3833_v3 = vshll.u32 %v8046_v17, 16  ;;  %v5580_v55 = vld [vmem:[%s6332_s25 + $0x78] sm:$0xe] }
 0x113   : > { %6092 = vmatprep.mubr.msk.bf16.mxu0 %vm694_vm3, %v6238_v60  ;;  %v3847_v60 = vshll.u32 %v8028_v32, 16  ;;  %v8071_v61 = vrot.slane %v3782_v36, 4  ;;  %v8075_v13 = vsel %vm6650_vm7, %v4409_v54, %v4410_v35  ;;  %v5595_v9 = vrot.slane %v8049_v59, 9  ;;  %v8085_v15 = vpop.f32.mrf.mxu1  ;;  %v5521_v59 = vld [vmem:[%s6332_s25 + $0x90] sm:$0xf] }
 0x114   : > { %v4421_v8 = vrot.slane %v8002_v1, 5  ;;  %v3840_v26 = vrot.slane %v3838_v6, 4  ;;  %v3843_v52 = vrot.slane %v3841_v7, 5  ;;  %9105 = vst [vmem:[#allocation24_spill] sm:$0xff] %v8085_v15  ;;  %v3811_v36 = vrot.slane %v3809_v5, 5 }
 0x115   : > { %6055 = vmatmul.mubr.msk.bf16.gmra.mxu1 %vm694_vm3, %v9101_v18  ;;  %v4414_v18 = vrot.slane %v7964_v40, 5  ;;  %v8083_v40 = vrot.slane %v3847_v60, 5  ;;  %v4417_v39 = vrot.slane %v8020_v45, 5  ;;  %v3820_v54 = vor.u32 %v3819_v23, %v3816_v48  ;;  %v8094_v60 = vld [vmem:[%s6332_s25 + $0x94] sm:$0xf] }
 0x116   : > { %6058 = vmatprep.mubr.msk.bf16.mxu1 %vm694_vm3, %v9104_v42  ;;  %v3853_v42 = vrot.slane %v3851_v57, 4  ;;  %v3830_v35 = vor.u32 %v3829_v43, %v8059_v30  ;;  %v3797_v1 = vrot.slane %v3796_v21, 4  ;;  %v3807_v6 = vrot.slane %v3806_v27, 4 }
 0x117   : > { %v4416_v16 = vrot.slane %v4414_v18, 4  ;;  %v3835_v7 = vrot.slane %v3833_v3, 5  ;;  %v9106_v57 = vcombine.low %v7727_v38, %v7731_v28  ;;  %v5596_v45 = vrot.slane %v5580_v55, 9 }
 0x118   : > { %v4423_v23 = vrot.slane %v4421_v8, 4  ;;  %v4424_v43 = vrot.slane %v8046_v17, 5  ;;  %v3857_v5 = vshll.u32 %v8080_v2, 16  ;;  %v3854_v21 = vor.u32 %v3853_v42, %v8083_v40 }
 0x119   : > { %v3862_v27 = vshrl.u32 %v5521_v59, 16  ;;  %v3865_v3 = vshll.u32 %v5521_v59, 16  ;;  %v9108_v38 = vcombine.low %v7648_v33, %v7653_v56  ;;  %v3821_v28 = vrot.slane %v3820_v54, 4 }
 0x11a   : > { %v8090_v10 = vpop.f32.mrf.mxu0  ;;  %6093 = vmatmul.mubr.msk.bf16.gmra.mxu0 %vm694_vm3, %v6239_v44  ;;  %v3844_v44 = vor.u32 %v3843_v52, %v3840_v26  ;;  %v3831_v55 = vrot.slane %v3830_v35, 4  ;;  %v3871_v17 = vshll.u32 %v8094_v60, 16  ;;  %v3788_v26 = vsel %vm6384_vm4, %v8071_v61, %v8016_v19 }
 0x11b   : > { %6132 = vmatprep.mubr.msk.bf16.mxu0 %vm694_vm3, %v9106_v57  ;;  %v3875_v57 = vshrl.u32 %v8094_v60, 16  ;;  %v3802_v33 = vsel %vm6384_vm4, %v3797_v1, %v8033_v47  ;;  %v8126_v56 = vsel %vm6650_vm7, %v5595_v9, %v4414_v18  ;;  %v8130_v52 = vsel %vm6650_vm7, %v4416_v16, %v4417_v39  ;;  %v5581_v18 = vld [vmem:[%s6332_s25 + $0x84] sm:$0xe]  ;;  %v9147_v37 = vld [vmem:[#allocation24_spill] sm:$0xff] }
 0x11c   : > { %v8102_v48 = vpop.f32.mrf.mxu0  ;;  %v8138_v19 = vsel %vm6650_vm7, %v5596_v45, %v4421_v8  ;;  %v8142_v47 = vsel %vm6650_vm7, %v4423_v23, %v4424_v43  ;;  %v3859_v61 = vrot.slane %v3857_v5, 5  ;;  %v3845_v16 = vrot.slane %v3844_v44, 4  ;;  %v8166_v44 = vld [vmem:[%s6332_s25 + $0x98] sm:$0x1] }
 0x11d   : > { %9107 = vst [vmem:[#allocation25_spill] sm:$0xff] %v8102_v48  ;;  %v8105_v15 = vpop.f32.mrf.mxu1  ;;  %6059 = vmatmul.mubr.msk.bf16.gmra.mxu1 %vm694_vm3, %v9108_v38  ;;  %v3855_v39 = vrot.slane %v3854_v21, 4  ;;  %v3864_v54 = vrot.slane %v3862_v27, 4  ;;  %v3867_v35 = vrot.slane %v3865_v3, 5  ;;  %v3826_v8 = vsel %vm6384_vm4, %v3821_v28, %v8059_v30  ;;  %v5524_v21 = vld [vmem:[%s6332_s25 + $0x9c] sm:$0xf] }
 0x11e   : > { %v8113_v48 = vpop.f32.mrf.mxu0  ;;  %6098 = vmatprep.mubr.msk.bf16.mxu1 %vm694_vm3, %v7797_v29  ;;  %v3812_v29 = vsel %vm6384_vm4, %v3807_v6, %v3811_v36  ;;  %v3836_v36 = vsel %vm6384_vm4, %v3831_v55, %v3835_v7  ;;  %v8154_v1 = vrot.slane %v3871_v17, 5  ;;  %v3877_v6 = vrot.slane %v3875_v57, 4  ;;  %v8197_v57 = vld [vmem:[%s6332_s25 + $0xa0] sm:$0xf] }
 0x11f   : > { %v8132_v42 = vpop.f32.mrf.mxu1  ;;  %v9109_v23 = vcombine.low %v7767_v24, %v7771_v0  ;;  %v5610_v43 = vcombine.low %v7990_v51, %v8007_v46  ;;  %v5611_v5 = vcombine.low %v8042_v63, %v8075_v13  ;;  %v5597_v30 = vrot.slane %v5581_v18, 9 }
 0x120   : > { %v8145_v9 = vpop.f32.mrf.mxu0  ;;  %v4428_v7 = vrot.slane %v8028_v32, 5  ;;  %v9110_v24 = vcombine.low %v7850_v22, %v7854_v20  ;;  %v9111_v0 = vsel %vm6384_vm4, %v8009_v41, %v7968_v11  ;;  %v8182_v38 = vcombine.low %v3802_v33, %v3812_v29  ;;  %v5582_v41 = vld [vmem:[%s6332_s25 + $0x90] sm:$0xe]  ;;  %v9118_v32 = vld [vmem:[#allocation11_spill] sm:$0xff] }
 0x121   : > { %v8147_v59 = vpop.f32.mrf.mxu1  ;;  %v8180_v3 = vcombine.low %v9111_v0, %v3788_v26  ;;  %v8188_v17 = vcombine.low %v3826_v8, %v3836_v36  ;;  %v3850_v22 = vsel %vm6384_vm4, %v3845_v16, %v8083_v40  ;;  %v3860_v20 = vsel %vm6384_vm4, %v3855_v39, %v3859_v61 }
 0x122   : > { %v5930_v45 = vpop.f32.mrf.mxu0  ;;  %6133 = vmatmul.mubr.msk.bf16.vlgmr.msra.gmra.mxu0 %vm694_vm3, %v9109_v23  ;;  %v3868_v11 = vor.u32 %v3867_v35, %v3864_v54  ;;  %v3878_v33 = vor.u32 %v3877_v6, %v8154_v1  ;;  %v3881_v29 = vshll.u32 %v8166_v44, 16  ;;  %v3886_v18 = vshrl.u32 %v5524_v21, 16 }
 0x123   : > { %v8169_v27 = vpop.f32.mrf.mxu1  ;;  %6136 = vmatprep.mubr.msk.bf16.mxu0 %vm694_vm3, %v9110_v24  ;;  %v3889_v8 = vshll.u32 %v5524_v21, 16  ;;  %v8208_v61 = vsel %vm6650_vm7, %v5597_v30, %v4428_v7  ;;  %v4430_v16 = vrot.slane %v4428_v7, 4  ;;  %v4431_v39 = vrot.slane %v8080_v2, 5 }
 0x124   : > { %v1500_v55 = vpop.f32.mrf.mxu0  ;;  %v5598_v54 = vrot.slane %v5582_v41, 9  ;;  %v4435_v35 = vrot.slane %v8094_v60, 5  ;;  %v3895_v6 = vshll.u32 %v8197_v57, 16  ;;  %v3899_v23 = vshrl.u32 %v8197_v57, 16 }
 0x125   : > { %v5896_v26 = vpop.f32.mrf.mxu1  ;;  %6099 = vmatmul.mubr.msk.bf16.vlgmr.msra.gmra.mxu1 %vm694_vm3, %v7799_v58  ;;  %v8217_v24 = vcombine.low %v3850_v22, %v3860_v20  ;;  %v8219_v30 = vrot.slane %v3868_v11, 4  ;;  %v3879_v2 = vrot.slane %v3878_v33, 4  ;;  %v3883_v0 = vrot.slane %v3881_v29, 5  ;;  %v5527_v20 = vld [vmem:[%s6332_s25 + $0xa8] sm:$0xf] }
 0x126   : > { %v1084_v36 = vadd.f32 %v5896_v26, %v7695_v4  ;;  %v5931_v40 = vpop.f32.mrf.mxu0  ;;  %6102 = vmatprep.mubr.msk.bf16.mxu1 %vm694_vm3, %v7946_v49  ;;  %v3888_v41 = vrot.slane %v3886_v18, 4  ;;  %v3891_v60 = vrot.slane %v3889_v8, 5  ;;  %v4438_v22 = vrot.slane %v8166_v44, 5  ;;  %v8245_v29 = vld [vmem:[%s6332_s25 + $0xac] sm:$0xf] }
 0x127   : > { %v1075_v58 = vpop.f32.mrf.mxu1  ;;  %v3901_v33 = vrot.slane %v3899_v23, 4  ;;  %v9115_v23 = vld [vmem:[#allocation3_spill] sm:$0xff] }
 0x128   : > { %v8214_v4 = vadd.f32 %v5930_v45, %v1084_v36  ;;  %v1076_v49 = vadd.f32 %v1075_v58, %v7719_v14  ;;  %v1503_v21 = vpop.f32.mrf.mxu0  ;;  %v9112_v36 = vcombine.low %v7887_v12, %v7913_v31  ;;  %v8230_v14 = vsel %vm6650_vm7, %v4430_v16, %v4431_v39  ;;  %v5583_v16 = vld [vmem:[%s6332_s25 + $0x9c] sm:$0xe] }
 0x129   : > { %v5897_v7 = vpop.f32.mrf.mxu1  ;;  %v4437_v12 = vrot.slane %v4435_v35, 4  ;;  %v8242_v31 = vrot.slane %v3895_v6, 5  ;;  %v4442_v39 = vrot.slane %v8197_v57, 5  ;;  %v3919_v57 = vshll.u32 %v8245_v29, 16 }
 0x12a   : > { %v8221_v26 = vadd.f32 %v1500_v55, %v1076_v49  ;;  %v1087_v28 = vadd.f32 %v5897_v7, %v7738_v25  ;;  %v5934_v45 = vpop.f32.mrf.mxu0  ;;  %6137 = vmatmul.mubr.msk.bf16.gmra.mxu0 %vm694_vm3, %v9112_v36  ;;  %v9113_v55 = vcombine.low %v7952_v53, %v7956_v34  ;;  %v8240_v25 = vsel %vm6650_vm7, %v5598_v54, %v4435_v35  ;;  %v5526_v34 = vld [vmem:[%s6332_s25 + $0xa4] sm:$0x1]  ;;  %v9114_v54 = vld [vmem:[#allocation15_spill] sm:$0xff] }
 0x12b   : > { %v1078_v11 = vpop.f32.mrf.mxu1  ;;  %v3874_v53 = vsel %vm6384_vm4, %v8219_v30, %v8154_v1  ;;  %v3910_v35 = vshrl.u32 %v5527_v20, 16  ;;  %v9116_v1 = vld [vmem:[#allocation16_spill] sm:$0xff]  ;;  %v3923_v30 = vshrl.u32 %v8245_v29, 16 }
 0x12c   : > { %6140 = vmatprep.mubr.msk.bf16.mxu0 %vm694_vm3, %v9113_v55  ;;  %v8247_v18 = vadd.f32 %v5931_v40, %v1087_v28  ;;  %v1079_v44 = vadd.f32 %v1078_v11, %v7783_v50  ;;  %v1516_v8 = vpop.f32.mrf.mxu0  ;;  %v3884_v28 = vsel %vm6384_vm4, %v3879_v2, %v3883_v0  ;;  %v3892_v40 = vor.u32 %v3891_v60, %v3888_v41  ;;  %v9117_v60 = vld [vmem:[#allocation10_spill] sm:$0xff] }
 0x12d   : > { %v5900_v58 = vpop.f32.mrf.mxu1  ;;  %6103 = vmatmul.mubr.msk.bf16.gmra.mxu1 %vm694_vm3, %v9114_v54  ;;  %v3913_v50 = vshll.u32 %v5527_v20, 16  ;;  %v8270_v11 = vsel %vm6650_vm7, %v4437_v12, %v4438_v22  ;;  %v3902_v2 = vor.u32 %v3901_v33, %v8242_v31  ;;  %v3905_v0 = vshll.u32 %v5526_v34, 16 }
 0x12e   : > { %v8261_v6 = vadd.f32 %v1503_v21, %v1079_v44  ;;  %v1100_v49 = vadd.f32 %v5900_v58, %v9115_v23  ;;  %v5935_v7 = vpop.f32.mrf.mxu0  ;;  %6106 = vmatprep.mubr.msk.bf16.mxu1 %vm694_vm3, %v9116_v1  ;;  %v5599_v21 = vrot.slane %v5583_v16, 9  ;;  %v4444_v44 = vrot.slane %v4442_v39, 4 }
 0x12f   : > { %v1091_v36 = vpop.f32.mrf.mxu1  ;;  %v4445_v58 = vrot.slane %v5526_v34, 5  ;;  %v8278_v1 = vrot.slane %v3892_v40, 4  ;;  %v3912_v22 = vrot.slane %v3910_v35, 4  ;;  %v3915_v12 = vrot.slane %v3913_v50, 5  ;;  %v8288_v34 = vld [vmem:[%s6332_s25 + $0xb0] sm:$0x1] }
 0x130   : > { %v8273_v41 = vadd.f32 %v5934_v45, %v1100_v49  ;;  %v1092_v20 = vadd.f32 %v1091_v36, %v9117_v60  ;;  %v1519_v55 = vpop.f32.mrf.mxu0  ;;  %v8290_v49 = vrot.slane %v3919_v57, 5  ;;  %v3925_v40 = vrot.slane %v3923_v30, 4  ;;  %v9119_v50 = vld [vmem:[#allocation2_spill] sm:$0xff] }
 0x131   : > { %v5901_v54 = vpop.f32.mrf.mxu1  ;;  %v8300_v51 = vrot.slane %v3902_v2, 4  ;;  %v8302_v46 = vrot.slane %v3905_v0, 5  ;;  %v8310_v63 = vsel %vm6650_vm7, %v5599_v21, %v4442_v39  ;;  %v8314_v13 = vsel %vm6650_vm7, %v4444_v44, %v4445_v58  ;;  %v8326_v21 = vld [vmem:[%s6332_s25 + $0xb8] sm:$0xf] }
 0x132   : > { %v8280_v33 = vadd.f32 %v1516_v8, %v1092_v20  ;;  %v1103_v16 = vadd.f32 %v5901_v54, %v9118_v32  ;;  %v5938_v45 = vpop.f32.mrf.mxu0  ;;  %6141 = vmatmul.mubr.msk.bf16.gmra.mxu0 %vm694_vm3, %v5610_v43  ;;  %v8296_v8 = vcombine.low %v3874_v53, %v3884_v28  ;;  %v5584_v43 = vld [vmem:[%s6332_s25 + $0xa8] sm:$0xe]  ;;  %v3916_v2 = vor.u32 %v3915_v12, %v3912_v22  ;;  %v9121_v20 = vld [vmem:[#allocation14_spill] sm:$0xff] }
 0x133   : > { %v1094_v36 = vpop.f32.mrf.mxu1  ;;  %6144 = vmatprep.mubr.msk.bf16.mxu0 %vm694_vm3, %v5611_v5  ;;  %v5530_v5 = vld [vmem:[%s6332_s25 + $0xb4] sm:$0xf]  ;;  %v9120_v28 = vld [vmem:[#allocation19_spill] sm:$0xff]  ;;  %v3929_v0 = vshll.u32 %v8288_v34, 16  ;;  %v4449_v39 = vrot.slane %v8245_v29, 5  ;;  %v3926_v54 = vor.u32 %v3925_v40, %v8290_v49  ;;  %v3908_v29 = vsel %vm6384_vm4, %v8300_v51, %v8302_v46 }
 0x134   : > { %v8305_v35 = vadd.f32 %v5935_v7, %v1103_v16  ;;  %v1095_v57 = vadd.f32 %v1094_v36, %v9119_v50  ;;  %v1532_v30 = vpop.f32.mrf.mxu0  ;;  %v5600_v16 = vrot.slane %v5584_v43, 9  ;;  %v3934_v22 = vshrl.u32 %v5530_v5, 16 }
 0x135   : > { %v5904_v53 = vpop.f32.mrf.mxu1  ;;  %6107 = vmatmul.mubr.msk.bf16.gmra.mxu1 %vm694_vm3, %v9120_v28  ;;  %v3937_v12 = vshll.u32 %v5530_v5, 16  ;;  %v3943_v40 = vshll.u32 %v8326_v21, 16  ;;  %v3947_v43 = vshrl.u32 %v8326_v21, 16  ;;  %v5533_v28 = vld [vmem:[%s6332_s25 + $0xc0] sm:$0xf]  ;;  %v3917_v32 = vrot.slane %v3916_v2, 4 }
 0x136   : > { %v8328_v60 = vadd.f32 %v1519_v55, %v1095_v57  ;;  %v1116_v44 = vadd.f32 %v5904_v53, %v9121_v20  ;;  %v5939_v58 = vpop.f32.mrf.mxu0  ;;  %6110 = vmatprep.mubr.msk.bf16.mxu1 %vm694_vm3, %v8180_v3  ;;  %v9123_v57 = vld [vmem:[#allocation18_spill] sm:$0xff]  ;;  %v3931_v51 = vrot.slane %v3929_v0, 5  ;;  %v4451_v46 = vrot.slane %v4449_v39, 4 }
 0x137   : > { %v1107_v36 = vpop.f32.mrf.mxu1  ;;  %v4452_v55 = vrot.slane %v8288_v34, 5  ;;  %v8356_v7 = vsel %vm6650_vm7, %v5600_v16, %v4449_v39  ;;  %v8359_v2 = vld [vmem:[%s6332_s25 + $0xc4] sm:$0xf]  ;;  %v9127_v34 = vcombine.low %v8138_v19, %v8142_v47  ;;  %v8371_v16 = vrot.slane %v3943_v40, 5 }
 0x138   : > { %v8340_v50 = vadd.f32 %v5938_v45, %v1116_v44  ;;  %v1108_v53 = vadd.f32 %v1107_v36, %v9123_v57  ;;  %v1535_v3 = vpop.f32.mrf.mxu0  ;;  %v9125_v45 = vld [vmem:[#allocation21_spill] sm:$0xff]  ;;  %v9126_v36 = vcombine.low %v8126_v56, %v8130_v52  ;;  %v3927_v57 = vrot.slane %v3926_v54, 4  ;;  %v9128_v54 = vld [vmem:[#allocation23_spill] sm:$0xff] }
 0x139   : > { %v5905_v20 = vpop.f32.mrf.mxu1  ;;  %v3958_v56 = vshrl.u32 %v5533_v28, 16  ;;  %v3961_v52 = vshll.u32 %v5533_v28, 16  ;;  %v3922_v19 = vsel %vm6384_vm4, %v3917_v32, %v8290_v49  ;;  %v8380_v47 = vsel %vm6650_vm7, %v4451_v46, %v4452_v55  ;;  %v5585_v28 = vld [vmem:[%s6332_s25 + $0xb4] sm:$0xe] }
 0x13a   : > { %9122 = vst [vmem:[#allocation15_spill] sm:$0xff] %v8340_v50  ;;  %v8347_v23 = vadd.f32 %v1532_v30, %v1108_v53  ;;  %v1119_v5 = vadd.f32 %v5905_v20, %v9125_v45  ;;  %v5942_v44 = vpop.f32.mrf.mxu0  ;;  %6145 = vmatmul.mubr.msk.bf16.gmra.mxu0 %vm694_vm3, %v9126_v36  ;;  %v8366_v30 = vld [vmem:[%s6332_s25 + $0xbc] sm:$0x1]  ;;  %v3936_v53 = vrot.slane %v3934_v22, 4  ;;  %v3939_v20 = vrot.slane %v3937_v12, 5 }
 0x13b   : > { %v1110_v0 = vpop.f32.mrf.mxu1  ;;  %6148 = vmatprep.mubr.msk.bf16.mxu0 %vm694_vm3, %v9127_v34  ;;  %v3971_v22 = vshrl.u32 %v8359_v2, 16  ;;  %v3953_v49 = vshll.u32 %v8366_v30, 16  ;;  %v4456_v46 = vrot.slane %v8326_v21, 5  ;;  %v9129_v34 = vld [vmem:[#allocation25_spill] sm:$0xff] }
 0x13c   : > { %9124 = vst [vmem:[#allocation3_spill] sm:$0xff] %v8347_v23  ;;  %v8368_v45 = vadd.f32 %v5939_v58, %v1119_v5  ;;  %v1111_v36 = vadd.f32 %v1110_v0, %v9128_v54  ;;  %v1548_v39 = vpop.f32.mrf.mxu0  ;;  %v3949_v23 = vrot.slane %v3947_v43, 4  ;;  %v3967_v58 = vshll.u32 %v8359_v2, 16 }
 0x13d   : > { %v5908_v50 = vpop.f32.mrf.mxu1  ;;  %6111 = vmatmul.mubr.msk.bf16.gmra.mxu1 %vm694_vm3, %v8182_v38  ;;  %v3932_v38 = vsel %vm6384_vm4, %v3927_v57, %v3931_v51  ;;  %v3940_v55 = vor.u32 %v3939_v20, %v3936_v53  ;;  %v3960_v5 = vrot.slane %v3958_v56, 4  ;;  %v3963_v0 = vrot.slane %v3961_v52, 5 }
 0x13e   : > { %v8384_v12 = vadd.f32 %v1535_v3, %v1111_v36  ;;  %v1132_v40 = vadd.f32 %v5908_v50, %v8090_v10  ;;  %v5943_v43 = vpop.f32.mrf.mxu0  ;;  %6114 = vmatprep.mubr.msk.bf16.mxu1 %vm694_vm3, %v8188_v17  ;;  %v9130_v17 = vsel %vm6384_vm4, %v8278_v1, %v8242_v31  ;;  %v3950_v57 = vor.u32 %v3949_v23, %v8371_v16 }
 0x13f   : > { %v1123_v32 = vpop.f32.mrf.mxu1  ;;  %v8402_v51 = vcombine.low %v9130_v17, %v3908_v29  ;;  %v8405_v21 = vcombine.low %v3922_v19, %v3932_v38  ;;  %v8409_v20 = vrot.slane %v3967_v58, 5  ;;  %v3973_v56 = vrot.slane %v3971_v22, 4  ;;  %v5535_v29 = vld [vmem:[%s6332_s25 + $0xc8] sm:$0x1] }
 0x140   : > { %v8394_v3 = vadd.f32 %v5942_v44, %v1132_v40  ;;  %v1124_v10 = vadd.f32 %v1123_v32, %v9129_v34  ;;  %v1551_v50 = vpop.f32.mrf.mxu0  ;;  %v5617_v44 = vcombine.low %v8356_v7, %v8380_v47  ;;  %v9131_v31 = vcombine.low %v8208_v61, %v8230_v14  ;;  %v5536_v7 = vld [vmem:[%s6332_s25 + $0xcc] sm:$0xf]  ;;  %v8430_v14 = vld [vmem:[%s6332_s25 + $0xd0] sm:$0xf]  ;;  %v5586_v32 = vld [vmem:[%s6332_s25 + $0xc0] sm:$0xe] }
 0x141   : > { %v5909_v53 = vpop.f32.mrf.mxu1  ;;  %v8418_v23 = vrot.slane %v3953_v49, 5  ;;  %v5601_v1 = vrot.slane %v5585_v28, 9  ;;  %v9132_v47 = vcombine.low %v8240_v25, %v8270_v11  ;;  %v4459_v58 = vrot.slane %v8366_v30, 5 }
 0x142   : > { %v8411_v52 = vadd.f32 %v1548_v39, %v1124_v10  ;;  %v1135_v54 = vadd.f32 %v5909_v53, %v8113_v48  ;;  %v5946_v36 = vpop.f32.mrf.mxu0  ;;  %6149 = vmatmul.mubr.msk.bf16.gmra.mxu0 %vm694_vm3, %v9131_v31  ;;  %v8426_v39 = vrot.slane %v3940_v55, 4  ;;  %v4458_v48 = vrot.slane %v4456_v46, 4 }
 0x143   : > { %v1126_v19 = vpop.f32.mrf.mxu1  ;;  %6152 = vmatprep.mubr.msk.bf16.mxu0 %vm694_vm3, %v9132_v47  ;;  %v3964_v61 = vor.u32 %v3963_v0, %v3960_v5  ;;  %v8435_v49 = vrot.slane %v3950_v57, 4  ;;  %v4463_v25 = vrot.slane %v8359_v2, 5  ;;  %v3974_v55 = vor.u32 %v3973_v56, %v8409_v20 }
 0x144   : > { %v8432_v22 = vadd.f32 %v5943_v43, %v1135_v54  ;;  %v1127_v40 = vadd.f32 %v1126_v19, %v8145_v9  ;;  %v1564_v38 = vpop.f32.mrf.mxu0  ;;  %v3977_v30 = vshll.u32 %v5535_v29, 16  ;;  %v3982_v28 = vshrl.u32 %v5536_v7, 16  ;;  %v9135_v43 = vld [vmem:[#allocation5_spill] sm:$0xff]  ;;  %v9136_v54 = vld [vmem:[#allocation6_spill] sm:$0xff] }
 0x145   : > { %v5912_v11 = vpop.f32.mrf.mxu1  ;;  %6115 = vmatmul.mubr.msk.bf16.gmra.mxu1 %vm694_vm3, %v8217_v24  ;;  %v3985_v5 = vshll.u32 %v5536_v7, 16  ;;  %v3991_v10 = vshll.u32 %v8430_v14, 16  ;;  %v3995_v2 = vshrl.u32 %v8430_v14, 16  ;;  %v4457_v24 = vsel %vm6650_vm7, %v5601_v1, %v4456_v46  ;;  %v9137_v46 = vld [vmem:[#allocation7_spill] sm:$0xff] }
 0x146   : > { %9133 = vst [vmem:[#allocation16_spill] sm:$0xff] %v8432_v22  ;;  %v8442_v0 = vadd.f32 %v1551_v50, %v1127_v40  ;;  %v1148_v34 = vadd.f32 %v5912_v11, %v9135_v43  ;;  %v5947_v9 = vpop.f32.mrf.mxu0  ;;  %6118 = vmatprep.mubr.msk.bf16.mxu1 %vm694_vm3, %v8296_v8  ;;  %v4460_v57 = vsel %vm6650_vm7, %v4458_v48, %v4459_v58  ;;  %v3965_v53 = vrot.slane %v3964_v61, 4 }
 0x147   : > { %v1139_v17 = vpop.f32.mrf.mxu1  ;;  %v5602_v50 = vrot.slane %v5586_v32, 9  ;;  %v4465_v19 = vrot.slane %v4463_v25, 4  ;;  %v4466_v8 = vrot.slane %v5535_v29, 5  ;;  %v3975_v40 = vrot.slane %v3974_v55, 4  ;;  %v5538_v55 = vld [vmem:[%s6332_s25 + $0xd4] sm:$0x1] }
 0x148   : > { %9134 = vst [vmem:[#allocation10_spill] sm:$0xff] %v8442_v0  ;;  %v8453_v56 = vadd.f32 %v5946_v36, %v1148_v34  ;;  %v1140_v31 = vadd.f32 %v1139_v17, %v9136_v54  ;;  %v1567_v7 = vpop.f32.mrf.mxu0  ;;  %v3979_v11 = vrot.slane %v3977_v30, 5  ;;  %v3984_v43 = vrot.slane %v3982_v28, 4  ;;  %v9139_v30 = vld [vmem:[#allocation8_spill] sm:$0xff] }
 0x149   : > { %v5913_v47 = vpop.f32.mrf.mxu1  ;;  %v3987_v0 = vrot.slane %v3985_v5, 5  ;;  %v9138_v36 = vcombine.low %v8310_v63, %v8314_v13  ;;  %v8463_v58 = vrot.slane %v3991_v10, 5  ;;  %v3997_v29 = vrot.slane %v3995_v2, 4 }
 0x14a   : > { %v8456_v22 = vadd.f32 %v1564_v38, %v1140_v31  ;;  %v1151_v1 = vadd.f32 %v5913_v47, %v9137_v46  ;;  %v5950_v48 = vpop.f32.mrf.mxu0  ;;  %v3946_v38 = vsel %vm6384_vm4, %v8426_v39, %v8371_v16  ;;  %v3956_v32 = vsel %vm6384_vm4, %v8435_v49, %v8418_v23  ;;  %v5587_v16 = vld [vmem:[%s6332_s25 + $0xcc] sm:$0xe] }
 0x14b   : > { %6153 = vmatmul.mubr.msk.bf16.gmra.mxu0 %vm694_vm3, %v9138_v36  ;;  %v1142_v61 = vpop.f32.mrf.mxu1  ;;  %v4470_v63 = vrot.slane %v8430_v14, 5  ;;  %v4467_v34 = vsel %vm6650_vm7, %v4465_v19, %v4466_v8  ;;  %v5618_v23 = vcombine.low %v4457_v24, %v4460_v57  ;;  %v3970_v14 = vsel %vm6384_vm4, %v3965_v53, %v8409_v20  ;;  %v9141_v19 = vld [vmem:[#allocation12_spill] sm:$0xff] }
 0x14c   : > { %6156 = vmatprep.mubr.msk.bf16.mxu0 %vm694_vm3, %v5617_v44  ;;  %v8476_v13 = vadd.f32 %v5947_v9, %v1151_v1  ;;  %v1143_v28 = vadd.f32 %v1142_v61, %v9139_v30  ;;  %v1580_v5 = vpop.f32.mrf.mxu0  ;;  %v4464_v44 = vsel %vm6650_vm7, %v5602_v50, %v4463_v25  ;;  %v3980_v49 = vsel %vm6384_vm4, %v3975_v40, %v3979_v11  ;;  %v9140_v25 = vld [vmem:[#allocation9_spill] sm:$0xff] }
 0x14d   : > { %v5916_v39 = vpop.f32.mrf.mxu1  ;;  %6119 = vmatmul.mubr.msk.bf16.gmra.mxu1 %vm694_vm3, %v8402_v51  ;;  %v3988_v9 = vor.u32 %v3987_v0, %v3984_v43  ;;  %v3998_v50 = vor.u32 %v3997_v29, %v8463_v58  ;;  %v4001_v51 = vshll.u32 %v5538_v55, 16  ;;  %v5619_v57 = vcombine.low %v4464_v44, %v4467_v34 }
 0x14e   : > { %v8491_v10 = vadd.f32 %v1567_v7, %v1143_v28  ;;  %v1164_v2 = vadd.f32 %v5916_v39, %v9140_v25  ;;  %v5951_v17 = vpop.f32.mrf.mxu0  ;;  %6122 = vmatprep.mubr.msk.bf16.mxu1 %vm694_vm3, %v8405_v21  ;;  %v5603_v54 = vrot.slane %v5587_v16, 9  ;;  %v4472_v31 = vrot.slane %v4470_v63, 4  ;;  %v9142_v21 = vld [vmem:[#allocation4_spill] sm:$0xff]  ;;  %v9144_v16 = vld [vmem:[#allocation17_spill] sm:$0xff] }
 0x14f   : > { %v1155_v24 = vpop.f32.mrf.mxu1  ;;  %v4473_v20 = vrot.slane %v5538_v55, 5  ;;  %v5553_v47 = vcombine.low %v3946_v38, %v3956_v32  ;;  %v5554_v40 = vcombine.low %v3970_v14, %v3980_v49  ;;  %v3989_v11 = vrot.slane %v3988_v9, 4  ;;  %v9143_v55 = vld [vmem:[#allocation13_spill] sm:$0xff]  ;;  %v9145_v9 = vld [vmem:[#allocation20_spill] sm:$0xff] }
 0x150   : > { %v8497_v53 = vadd.f32 %v5950_v48, %v1164_v2  ;;  %v1156_v0 = vadd.f32 %v1155_v24, %v9141_v19  ;;  %v1583_v7 = vpop.f32.mrf.mxu0  ;;  %v3999_v36 = vrot.slane %v3998_v50, 4  ;;  %v4003_v29 = vrot.slane %v4001_v51, 5  ;;  %v9146_v51 = vld [vmem:[#allocation22_spill] sm:$0xff] }
 0x151   : > { %v5917_v8 = vpop.f32.mrf.mxu1  ;;  %v4471_v48 = vsel %vm6650_vm7, %v5603_v54, %v4470_v63  ;;  %v4474_v38 = vsel %vm6650_vm7, %v4472_v31, %v4473_v20  ;;  %v3994_v44 = vsel %vm6384_vm4, %v3989_v11, %v8463_v58 }
 0x152   : > { %v8500_v43 = vadd.f32 %v1580_v5, %v1156_v0  ;;  %v1167_v46 = vadd.f32 %v5917_v8, %v9142_v21  ;;  %v5954_v1 = vpop.f32.mrf.mxu0  ;;  %v4004_v62 = vsel %vm6384_vm4, %v3999_v36, %v4003_v29 }
 0x153   : > { %6157 = vmatmul.mubr.msk.bf16.gmra.mxu0 %vm694_vm3, %v5618_v23  ;;  %v1158_v61 = vpop.f32.mrf.mxu1  ;;  %v5620_v23 = vcombine.low %v4471_v48, %v4474_v38  ;;  %v5555_v50 = vcombine.low %v3994_v44, %v4004_v62 }
 0x154   : > { %6160 = vmatprep.mubr.msk.bf16.mxu0 %vm694_vm3, %v5619_v57  ;;  %v8509_v32 = vadd.f32 %v5951_v17, %v1167_v46  ;;  %v1159_v30 = vadd.f32 %v1158_v61, %v9143_v55  ;;  %v1596_v28 = vpop.f32.mrf.mxu0 }
 0x155   : > { %v5920_v5 = vpop.f32.mrf.mxu1  ;;  %6123 = vmatmul.mubr.msk.bf16.gmra.mxu1 %vm694_vm3, %v5553_v47 }
 0x156   : > { %v8516_v34 = vadd.f32 %v1583_v7, %v1159_v30  ;;  %v1180_v39 = vadd.f32 %v5920_v5, %v9144_v16  ;;  %v5955_v63 = vpop.f32.mrf.mxu0  ;;  %6126 = vmatprep.mubr.msk.bf16.mxu1 %vm694_vm3, %v5554_v40 }
 0x157   : > { %v1171_v14 = vpop.f32.mrf.mxu1 }
 0x158   : > { %v8522_v49 = vadd.f32 %v5954_v1, %v1180_v39  ;;  %v1172_v25 = vadd.f32 %v1171_v14, %v9145_v9  ;;  %v1599_v2 = vpop.f32.mrf.mxu0 }
 0x159   : > { %v5921_v17 = vpop.f32.mrf.mxu1 }
 0x15a   : > { %v8525_v58 = vadd.f32 %v1596_v28, %v1172_v25  ;;  %v1183_v24 = vadd.f32 %v5921_v17, %v9146_v51  ;;  %v5958_v57 = vpop.f32.mrf.mxu0 }
 0x15b   : > { %6161 = vmatmul.mubr.msk.bf16.gmra.mxu0 %vm694_vm3, %v5620_v23  ;;  %v1174_v54 = vpop.f32.mrf.mxu1 }
 0x15c   : > { %v8529_v31 = vadd.f32 %v5955_v63, %v1183_v24  ;;  %v1175_v20 = vadd.f32 %v1174_v54, %v9147_v37  ;;  %v1612_v19 = vpop.f32.mrf.mxu0 }
 0x15d   : > { %v5924_v0 = vpop.f32.mrf.mxu1  ;;  %6127 = vmatmul.mubr.msk.bf16.gmra.mxu1 %vm694_vm3, %v5555_v50 }
 0x15e   : > { %v8533_v7 = vadd.f32 %v1599_v2, %v1175_v20  ;;  %v1196_v8 = vadd.f32 %v5924_v0, %v8105_v15  ;;  %v5959_v47 = vpop.f32.mrf.mxu0 }
 0x15f   : > { %v1187_v40 = vpop.f32.mrf.mxu1 }
 0x160   : > { %v8536_v11 = vadd.f32 %v5958_v57, %v1196_v8  ;;  %v1188_v21 = vadd.f32 %v1187_v40, %v8132_v42  ;;  %v1615_v46 = vpop.f32.mrf.mxu0 }
 0x161   : > { %v5925_v1 = vpop.f32.mrf.mxu1 }
 0x162   : > { %v8539_v36 = vadd.f32 %v1612_v19, %v1188_v21  ;;  %v1199_v29 = vadd.f32 %v5925_v1, %v8147_v59  ;;  %v5998_v61 = vpop.f32.mrf.mxu0  ;;  %v9148_v21 = vld [vmem:[#allocation15_spill] sm:$0xff] }
 0x163   : > { %v1190_v48 = vpop.f32.mrf.mxu1 }
 0x164   : > { %v8542_v38 = vadd.f32 %v5959_v47, %v1199_v29  ;;  %v1191_v55 = vadd.f32 %v1190_v48, %v8169_v27  ;;  %v2585_v30 = vpop.f32.mrf.mxu0 }
 0x165   : > { %v5964_v15 = vpop.f32.mrf.mxu1 }
 0x166   : > { %v8545_v28 = vadd.f32 %v1615_v46, %v1191_v55  ;;  %v1988_v5 = vadd.f32 %v5964_v15, %v8214_v4  ;;  %v5999_v44 = vpop.f32.mrf.mxu0 }
 0x167   : > { %v1859_v42 = vpop.f32.mrf.mxu1 }
 0x168   : > { %v8548_v16 = vadd.f32 %v5998_v61, %v1988_v5  ;;  %v1986_v39 = vadd.f32 %v1859_v42, %v8221_v26  ;;  %v2588_v63 = vpop.f32.mrf.mxu0  ;;  %v9149_v61 = vld [vmem:[#allocation3_spill] sm:$0xff] }
 0x169   : > { %v5965_v59 = vpop.f32.mrf.mxu1 }
 0x16a   : > { %v8551_v62 = vadd.f32 %v2585_v30, %v1986_v39  ;;  %v1989_v23 = vadd.f32 %v5965_v59, %v8247_v18  ;;  %v6002_v14 = vpop.f32.mrf.mxu0 }
 0x16b   : > { %v1862_v27 = vpop.f32.mrf.mxu1 }
 0x16c   : > { %v8554_v9 = vadd.f32 %v5999_v44, %v1989_v23  ;;  %v1987_v25 = vadd.f32 %v1862_v27, %v8261_v6  ;;  %v2601_v2 = vpop.f32.mrf.mxu0 }
 0x16d   : > { %v5968_v4 = vpop.f32.mrf.mxu1 }
 0x16e   : > { %v8557_v17 = vadd.f32 %v2588_v63, %v1987_v25  ;;  %v1992_v50 = vadd.f32 %v5968_v4, %v8273_v41  ;;  %v6003_v51 = vpop.f32.mrf.mxu0 }
 0x16f   : > { %v1875_v26 = vpop.f32.mrf.mxu1 }
 0x170   : > { %v8560_v24 = vadd.f32 %v6002_v14, %v1992_v50  ;;  %v1990_v57 = vadd.f32 %v1875_v26, %v8280_v33  ;;  %v2604_v54 = vpop.f32.mrf.mxu0 }
 0x171   : > { %v5969_v18 = vpop.f32.mrf.mxu1 }
 0x172   : > { %v8563_v37 = vadd.f32 %v2601_v2, %v1990_v57  ;;  %v1993_v20 = vadd.f32 %v5969_v18, %v8305_v35  ;;  %v6006_v19 = vpop.f32.mrf.mxu0  ;;  %v9151_v18 = vld [vmem:[#allocation10_spill] sm:$0xff] }
 0x173   : > { %v1878_v6 = vpop.f32.mrf.mxu1 }
 0x174   : > { %v8566_v0 = vadd.f32 %v6003_v51, %v1993_v20  ;;  %v1991_v8 = vadd.f32 %v1878_v6, %v8328_v60  ;;  %v2617_v47 = vpop.f32.mrf.mxu0  ;;  %v9150_v51 = vld [vmem:[#allocation16_spill] sm:$0xff] }
 0x175   : > { %v5972_v41 = vpop.f32.mrf.mxu1 }
 0x176   : > { %v8569_v40 = vadd.f32 %v2604_v54, %v1991_v8  ;;  %v1996_v46 = vadd.f32 %v5972_v41, %v9148_v21  ;;  %v6007_v1 = vpop.f32.mrf.mxu0 }
 0x177   : > { %v1891_v33 = vpop.f32.mrf.mxu1 }
 0x178   : > { %v8572_v29 = vadd.f32 %v6006_v19, %v1996_v46  ;;  %v1994_v48 = vadd.f32 %v1891_v33, %v9149_v61  ;;  %v2620_v55 = vpop.f32.mrf.mxu0 }
 0x179   : > { %v5973_v35 = vpop.f32.mrf.mxu1 }
 0x17a   : > { %v8575_v30 = vadd.f32 %v2617_v47, %v1994_v48  ;;  %v1997_v15 = vadd.f32 %v5973_v35, %v8368_v45  ;;  %v6010_v5 = vpop.f32.mrf.mxu0 }
 0x17b   : > { %v1894_v60 = vpop.f32.mrf.mxu1 }
 0x17c   : > { %v8578_v44 = vadd.f32 %v6007_v1, %v1997_v15  ;;  %v1995_v42 = vadd.f32 %v1894_v60, %v8384_v12  ;;  %v2633_v39 = vpop.f32.mrf.mxu0 }
 0x17d   : > { %v5976_v63 = vpop.f32.mrf.mxu1 }
 0x17e   : > { %v8581_v59 = vadd.f32 %v2620_v55, %v1995_v42  ;;  %v2000_v23 = vadd.f32 %v5976_v63, %v8394_v3  ;;  %v6011_v14 = vpop.f32.mrf.mxu0 }
 0x17f   : > { %v1907_v27 = vpop.f32.mrf.mxu1 }
 0x180   : > { %v8584_v25 = vadd.f32 %v6010_v5, %v2000_v23  ;;  %v1998_v2 = vadd.f32 %v1907_v27, %v8411_v52  ;;  %v2636_v4 = vpop.f32.mrf.mxu0 }
 0x181   : > { %v5977_v45 = vpop.f32.mrf.mxu1 }
 0x182   : > { %v8587_v50 = vadd.f32 %v2633_v39, %v1998_v2  ;;  %v2001_v26 = vadd.f32 %v5977_v45, %v9150_v51  ;;  %v6014_v57 = vpop.f32.mrf.mxu0 }
 0x183   : > { %v1910_v12 = vpop.f32.mrf.mxu1 }
 0x184   : > { %v8590_v54 = vadd.f32 %v6011_v14, %v2001_v26  ;;  %v1999_v20 = vadd.f32 %v1910_v12, %v9151_v18  ;;  %v2649_v19 = vpop.f32.mrf.mxu0 }
 0x185   : > { %v5980_v3 = vpop.f32.mrf.mxu1 }
 0x186   : > { %v8593_v6 = vadd.f32 %v2636_v4, %v1999_v20  ;;  %v2004_v8 = vadd.f32 %v5980_v3, %v8453_v56  ;;  %v6015_v47 = vpop.f32.mrf.mxu0 }
 0x187   : > { %v1923_v52 = vpop.f32.mrf.mxu1 }
 0x188   : > { %v8596_v41 = vadd.f32 %v6014_v57, %v2004_v8  ;;  %v2002_v21 = vadd.f32 %v1923_v52, %v8456_v22  ;;  %v2652_v46 = vpop.f32.mrf.mxu0 }
 0x189   : > { %v5981_v1 = vpop.f32.mrf.mxu1 }
 0x18a   : > { %v8599_v33 = vadd.f32 %v2649_v19, %v2002_v21  ;;  %v2005_v61 = vadd.f32 %v5981_v1, %v8476_v13  ;;  %v6018_v48 = vpop.f32.mrf.mxu0 }
 0x18b   : > { %v1926_v55 = vpop.f32.mrf.mxu1 }
 0x18c   : > { %v8602_v35 = vadd.f32 %v6015_v47, %v2005_v61  ;;  %v2003_v15 = vadd.f32 %v1926_v55, %v8491_v10  ;;  %v2665_v5 = vpop.f32.mrf.mxu0 }
 0x18d   : > { %v5984_v56 = vpop.f32.mrf.mxu1 }
 0x18e   : > { %9152 = vst [vmem:[#allocation11_spill] sm:$0xff] %v8602_v35  ;;  %v8605_v60 = vadd.f32 %v2652_v46, %v2003_v15  ;;  %v2008_v42 = vadd.f32 %v5984_v56, %v8497_v53  ;;  %v6019_v39 = vpop.f32.mrf.mxu0 }
 0x18f   : > { %v1939_v22 = vpop.f32.mrf.mxu1 }
 0x190   : > { %9153 = vst [vmem:[#allocation2_spill] sm:$0xff] %v8605_v60  ;;  %v8608_v63 = vadd.f32 %v6018_v48, %v2008_v42  ;;  %v2006_v23 = vadd.f32 %v1939_v22, %v8500_v43  ;;  %v2668_v14 = vpop.f32.mrf.mxu0 }
 0x191   : > { %v5985_v13 = vpop.f32.mrf.mxu1 }
 0x192   : > { %9154 = vst [vmem:[#allocation19_spill] sm:$0xff] %v8608_v63  ;;  %v8611_v27 = vadd.f32 %v2665_v5, %v2006_v23  ;;  %v2009_v2 = vadd.f32 %v5985_v13, %v8509_v32  ;;  %v6022_v4 = vpop.f32.mrf.mxu0 }
 0x193   : > { %v1942_v10 = vpop.f32.mrf.mxu1 }
 0x194   : > { %9155 = vst [vmem:[#allocation14_spill] sm:$0xff] %v8611_v27  ;;  %v8614_v45 = vadd.f32 %v6019_v39, %v2009_v2  ;;  %v2007_v51 = vadd.f32 %v1942_v10, %v8516_v34  ;;  %v2681_v26 = vpop.f32.mrf.mxu0 }
 0x195   : > { %v5988_v53 = vpop.f32.mrf.mxu1 }
 0x196   : > { %9156 = vst [vmem:[#allocation18_spill] sm:$0xff] %v8614_v45  ;;  %v8617_v57 = vadd.f32 %v2668_v14, %v2007_v51  ;;  %v2012_v12 = vadd.f32 %v5988_v53, %v8522_v49  ;;  %v6023_v18 = vpop.f32.mrf.mxu0 }
 0x197   : > { %v1955_v43 = vpop.f32.mrf.mxu1 }
 0x198   : > { %9157 = vst [vmem:[#allocation21_spill] sm:$0xff] %v8617_v57  ;;  %v8620_v20 = vadd.f32 %v6022_v4, %v2012_v12  ;;  %v2010_v19 = vadd.f32 %v1955_v43, %v8525_v58  ;;  %v2684_v3 = vpop.f32.mrf.mxu0 }
 0x199   : > { %v5989_v32 = vpop.f32.mrf.mxu1 }
 0x19a   : > { %9158 = vst [vmem:[#allocation23_spill] sm:$0xff] %v8620_v20  ;;  %v8623_v8 = vadd.f32 %v2681_v26, %v2010_v19  ;;  %v2013_v47 = vadd.f32 %v5989_v32, %v8529_v31  ;;  %v6026_v52 = vpop.f32.mrf.mxu0 }
 0x19b   : > { %v1958_v34 = vpop.f32.mrf.mxu1 }
 0x19c   : > { %9159 = vst [vmem:[#allocation25_spill] sm:$0xff] %v8623_v8  ;;  %v8626_v21 = vadd.f32 %v6023_v18, %v2013_v47  ;;  %v2011_v46 = vadd.f32 %v1958_v34, %v8533_v7  ;;  %v2697_v1 = vpop.f32.mrf.mxu0 }
 0x19d   : > { %v5992_v49 = vpop.f32.mrf.mxu1 }
 0x19e   : > { %9160 = vst [vmem:[#allocation5_spill] sm:$0xff] %v8626_v21  ;;  %v8629_v61 = vadd.f32 %v2684_v3, %v2011_v46  ;;  %v2016_v48 = vadd.f32 %v5992_v49, %v8536_v11  ;;  %v6027_v55 = vpop.f32.mrf.mxu0 }
 0x19f   : > { %v1971_v58 = vpop.f32.mrf.mxu1 }
 0x1a0   : > { %9161 = vst [vmem:[#allocation6_spill] sm:$0xff] %v8629_v61  ;;  %v8632_v15 = vadd.f32 %v6026_v52, %v2016_v48  ;;  %v2014_v5 = vadd.f32 %v1971_v58, %v8539_v36  ;;  %v2700_v56 = vpop.f32.mrf.mxu0 }
 0x1a1   : > { %v5993_v31 = vpop.f32.mrf.mxu1 }
 0x1a2   : > { %9162 = vst [vmem:[#allocation7_spill] sm:$0xff] %v8632_v15  ;;  %v8635_v42 = vadd.f32 %v2697_v1, %v2014_v5  ;;  %v2017_v39 = vadd.f32 %v5993_v31, %v8542_v38  ;;  %v8638_v22 = vpop.f32.mrf.mxu0 }
 0x1a3   : > { %v1974_v7 = vpop.f32.mrf.mxu1 }
 0x1a4   : > { %9163 = vst [vmem:[#allocation8_spill] sm:$0xff] %v8635_v42  ;;  %v8640_v23 = vadd.f32 %v6027_v55, %v2017_v39  ;;  %v2015_v14 = vadd.f32 %v1974_v7, %v8545_v28  ;;  %v8643_v11 = vpop.f32.mrf.mxu0 }
 0x1a5   : > { %v6032_v13 = vpop.f32.mrf.mxu1 }
 0x1a6   : > { %9164 = vst [vmem:[#allocation9_spill] sm:$0xff] %v8640_v23  ;;  %v8645_v2 = vadd.f32 %v2700_v56, %v2015_v14  ;;  %v8647_v4 = vpop.f32.mrf.mxu0 }
 0x1a7   : > { %v3055_v36 = vpop.f32.mrf.mxu1 }
 0x1a8   : > { %9165 = vst [vmem:[#allocation12_spill] sm:$0xff] %v8645_v2  ;;  %v8649_v10 = vpop.f32.mrf.mxu0 }
 0x1a9   : > { %v6033_v51 = vpop.f32.mrf.mxu1 }
 0x1aa   : > { %v8651_v26 = vpop.f32.mrf.mxu0 }
 0x1ab   : > { %v8653_v38 = vpop.f32.mrf.mxu1 }
 0x1ac   : > { %v8655_v53 = vpop.f32.mrf.mxu0 }
 0x1ad   : > { %v8657_v12 = vpop.f32.mrf.mxu1 }
 0x1ae   : > { %v8659_v28 = vpop.f32.mrf.mxu0 }
 0x1af   : > { %v8661_v18 = vpop.f32.mrf.mxu1 }
 0x1b0   : > { %v8663_v43 = vpop.f32.mrf.mxu0 }
 0x1b1   : > { %v8665_v19 = vpop.f32.mrf.mxu1 }
 0x1b2   : > { %v8667_v3 = vpop.f32.mrf.mxu0 }
 0x1b3   : > { %v8669_v32 = vpop.f32.mrf.mxu1 }
 0x1b4   : > { %v8671_v47 = vpop.f32.mrf.mxu0 }
 0x1b5   : > { %v8673_v52 = vpop.f32.mrf.mxu1 }
 0x1b6   : > { %v8675_v34 = vpop.f32.mrf.mxu0 }
 0x1b7   : > { %v8677_v46 = vpop.f32.mrf.mxu1 }
 0x1b8   : > { %v8679_v1 = vpop.f32.mrf.mxu0 }
 0x1b9   : > { %v8681_v49 = vpop.f32.mrf.mxu1 }
 0x1ba   : > { %v8683_v48 = vpop.f32.mrf.mxu0 }
 0x1bb   : > { %v8685_v55 = vpop.f32.mrf.mxu1 }
 0x1bc   : > { %v8687_v58 = vpop.f32.mrf.mxu0 }
 0x1bd   : > { %v8689_v5 = vpop.f32.mrf.mxu1 }
 0x1be   : > { %v8691_v56 = vpop.f32.mrf.mxu0 }
 0x1bf   : > { %v8693_v31 = vpop.f32.mrf.mxu1 }
 0x1c0   : > { %v8695_v39 = vpop.f32.mrf.mxu0 }
 0x1c1   : > { %v8697_v7 = vpop.f32.mrf.mxu1 }
 0x1c2   : > { %v8699_v14 = vpop.f32.mrf.mxu0 }
 0x1c3   : > { %v8701_v2 = vpop.f32.mrf.mxu1 }
 0x1c4   : > { %v8703_v23 = vpop.f32.mrf.mxu0 }
 0x1c5   : > { %9166 = vst [vmem:[#allocation4_spill] sm:$0xff] %v8703_v23  ;;  %v8705_v42 = vpop.f32.mrf.mxu1 }
 0x1c6   : > { %v8707_v15 = vpop.f32.mrf.mxu0 }
 0x1c7   : > { %9167 = vst [vmem:[#allocation13_spill] sm:$0xff] %v8707_v15  ;;  %v8709_v61 = vpop.f32.mrf.mxu1 }
 0x1c8   : > { %v8711_v21 = vpop.f32.mrf.mxu0 }
 0x1c9   : > { %9168 = vst [vmem:[#allocation17_spill] sm:$0xff] %v8711_v21  ;;  %v8713_v8 = vpop.f32.mrf.mxu1 }
 0x1ca   : > { %9169 = vst [vmem:[#allocation20_spill] sm:$0xff] %v8713_v8  ;;  %v8715_v20 = vpop.f32.mrf.mxu0 }
 0x1cb   : > { %9170 = vst [vmem:[#allocation22_spill] sm:$0xff] %v8715_v20  ;;  %v8717_v57 = vpop.f32.mrf.mxu1 }
 0x1cc   : > { %9171 = vst [vmem:[#allocation24_spill] sm:$0xff] %v8717_v57  ;;  %v8719_v45 = vpop.f32.mrf.mxu0 }
 0x1cd   : > { %9172 = vst [vmem:[#allocation15_spill] sm:$0xff] %v8719_v45  ;;  %v8721_v27 = vpop.f32.mrf.mxu1 }
 0x1ce   : > { %9173 = vst [vmem:[#allocation3_spill] sm:$0xff] %v8721_v27  ;;  %v8723_v63 = vpop.f32.mrf.mxu0 }
 0x1cf   : > { %9174 = vst [vmem:[#allocation16_spill] sm:$0xff] %v8723_v63  ;;  %v8725_v60 = vpop.f32.mrf.mxu1 }
 0x1d0   : > { %9175 = vst [vmem:[#allocation10_spill] sm:$0xff] %v8725_v60  ;;  %v8727_v23 = vpop.f32.mrf.mxu0 }
 0x1d1   : > { %9176 = vst [vmem:[#allocation26_spill] sm:$0xff] %v8727_v23  ;;  %v8729_v15 = vpop.f32.mrf.mxu1 }
 0x1d2   : > { %9177 = vst [vmem:[#allocation27_spill] sm:$0xff] %v8729_v15  ;;  %v8731_v35 = vpop.f32.mrf.mxu0 }
 0x1d3   : > { %9178 = vst [vmem:[#allocation28_spill] sm:$0xff] %v8731_v35  ;;  %v8733_v21 = vpop.f32.mrf.mxu1 }
 0x1d4   : > { %9179 = vst [vmem:[#allocation29_spill] sm:$0xff] %v8733_v21  ;;  %v8735_v8 = vpop.f32.mrf.mxu0 }
 0x1d5   : > { %9180 = vst [vmem:[#allocation30_spill] sm:$0xff] %v8735_v8  ;;  %v8737_v20 = vpop.f32.mrf.mxu1 }
 0x1d6   : > { %9181 = vst [vmem:[#allocation31_spill] sm:$0xff] %v8737_v20  ;;  %v8739_v57 = vpop.f32.mrf.mxu0 }
 0x1d7   : > { %9182 = vst [vmem:[#allocation32_spill] sm:$0xff] %v8739_v57  ;;  %v8741_v45 = vpop.f32.mrf.mxu1  ;;  %v3184_v57 = vadd.f32 %v6032_v13, %v8548_v16  ;;  %v3183_v16 = vadd.f32 %v8653_v38, %v8557_v17 }
 0x1d8   : > { %9183 = vst [vmem:[#allocation33_spill] sm:$0xff] %v8741_v45  ;;  %v8743_v27 = vpop.f32.mrf.mxu0 }
 0x1d9   : > { %9184 = vst [vmem:[#allocation34_spill] sm:$0xff] %v8743_v27  ;;  %v8745_v63 = vpop.f32.mrf.mxu1  ;;  %v3182_v27 = vadd.f32 %v3055_v36, %v8551_v62  ;;  %v8775_v62 = vld [vmem:[%s8976_s2] ss:$0 sm:$0xff] }
 0x1da   : > { %9185 = vst [vmem:[#allocation35_spill] sm:$0xff] %v8745_v63  ;;  %v8747_v60 = vpop.f32.mrf.mxu0 }
 0x1db   : > { %9186 = vst [vmem:[#allocation36_spill] sm:$0xff] %v8747_v60  ;;  %v8749_v23 = vpop.f32.mrf.mxu1 }
 0x1dc   : > { %9187 = vst [vmem:[#allocation37_spill] sm:$0xff] %v8749_v23  ;;  %v8751_v15 = vpop.f32.mrf.mxu0  ;;  %v3543_v23 = vadd.f32 %v8638_v22, %v3184_v57 }
 0x1dd   : > { %9188 = vst [vmem:[#allocation38_spill] sm:$0xff] %v8751_v15  ;;  %v8753_v35 = vpop.f32.mrf.mxu1  ;;  %v3185_v15 = vadd.f32 %v6033_v51, %v8554_v9 }
 0x1de   : > { %9189 = vst [vmem:[#allocation39_spill] sm:$0xff] %v8753_v35  ;;  %v8755_v21 = vpop.f32.mrf.mxu0 }
 0x1df   : > { %9190 = vst [vmem:[#allocation40_spill] sm:$0xff] %v8755_v21  ;;  %v8757_v8 = vpop.f32.mrf.mxu1  ;;  %v3544_v57 = vadd.f32 %v8647_v4, %v3185_v15 }
 0x1e0   : > { %9191 = vst [vmem:[#allocation41_spill] sm:$0xff] %v8757_v8  ;;  %v8760_v20 = vpop.f32.mrf.mxu0  ;;  %v3541_v8 = vadd.f32 %v8643_v11, %v3182_v27  ;;  %v3186_v27 = vadd.f32 %v8661_v18, %v8563_v37  ;;  %v3187_v18 = vadd.f32 %v8669_v32, %v8569_v40  ;;  %v3192_v40 = vadd.f32 %v8673_v52, %v8572_v29 }
 0x1e1   : > { %9192 = vst [vmem:[#allocation42_spill] sm:$0xff] %v8760_v20  ;;  %v8762_v45 = vpop.f32.mrf.mxu1 }
 0x1e2   : > { %9193 = vst [vmem:[#allocation43_spill] sm:$0xff] %v8762_v45  ;;  %v6134_v63 = vpop.f32.mrf.mxu0 }
 0x1e3   : > { %v8765_v60 = vpop.f32.mrf.mxu1 }
 0x1e4   : > { %9194 = vst [vmem:[#allocation44_spill] sm:$0xff] %v8765_v60  ;;  %v4610_v35 = vpop.f32.mrf.mxu0  ;;  %v3188_v60 = vadd.f32 %v8657_v12, %v8560_v24 }
 0x1e5   : > { %v6100_v21 = vpop.f32.mrf.mxu1 }
 0x1e6   : > { %v4269_v13 = vadd.f32 %v6100_v21, %v3543_v23  ;;  %v6135_v20 = vpop.f32.mrf.mxu0  ;;  %v3542_v21 = vadd.f32 %v8649_v10, %v3183_v16  ;;  %v3547_v37 = vadd.f32 %v8651_v26, %v3188_v60  ;;  %v3545_v10 = vadd.f32 %v8655_v53, %v3186_v27 }
 0x1e7   : > { %v4140_v36 = vpop.f32.mrf.mxu1 }
 0x1e8   : > { %v4739_v22 = vadd.f32 %v6134_v63, %v4269_v13  ;;  %v4267_v9 = vadd.f32 %v4140_v36, %v3541_v8  ;;  %v4613_v51 = vpop.f32.mrf.mxu0  ;;  %v3189_v63 = vadd.f32 %v8665_v19, %v8566_v0 }
 0x1e9   : > { %v6101_v17 = vpop.f32.mrf.mxu1 }
 0x1ea   : > { %v4778_v23 = vadd.f32 %v8775_v62, %v4739_v22  ;;  %v4737_v11 = vadd.f32 %v4610_v35, %v4267_v9  ;;  %v4270_v38 = vadd.f32 %v6101_v17, %v3544_v57  ;;  %v6138_v45 = vpop.f32.mrf.mxu0  ;;  %v3548_v26 = vadd.f32 %v8659_v28, %v3189_v63 }
 0x1eb   : > { %v4143_v8 = vpop.f32.mrf.mxu1  ;;  %v3546_v17 = vadd.f32 %v8663_v43, %v3187_v18  ;;  %v3190_v63 = vadd.f32 %v8677_v46, %v8575_v30 }
 0x1ec   : > { %v4810_v15 = vmax.f32 %v4778_v23, 0.0  ;;  %v4776_v4 = vadd.f32 %v8775_v62, %v4737_v11  ;;  %v4740_v24 = vadd.f32 %v6135_v20, %v4270_v38  ;;  %v4268_v12 = vadd.f32 %v4143_v8, %v3542_v21  ;;  %v4626_v13 = vpop.f32.mrf.mxu0 }
 0x1ed   : > { %v6104_v0 = vpop.f32.mrf.mxu1  ;;  %v3551_v38 = vadd.f32 %v8667_v3, %v3192_v40  ;;  %v3193_v8 = vadd.f32 %v8681_v49, %v8578_v44  ;;  %v3191_v3 = vadd.f32 %v8685_v55, %v8581_v59 }
 0x1ee   : > { %v5675_v35 = vpack.c.bf16 %v4810_v15, %v4810_v15  ;;  %v4808_v19 = vmax.f32 %v4776_v4, 0.0  ;;  %v4779_v20 = vadd.f32 %v8775_v62, %v4740_v24  ;;  %v4738_v16 = vadd.f32 %v4613_v51, %v4268_v12  ;;  %v6139_v60 = vpop.f32.mrf.mxu0 }
 0x1ef   : > { %v4273_v53 = vadd.f32 %v6104_v0, %v3547_v37  ;;  %v4156_v32 = vpop.f32.mrf.mxu1  ;;  %v3549_v0 = vadd.f32 %v8671_v47, %v3190_v63 }
 0x1f0   : > { %4971 = vst.msk [vmem:[%s8795_s19 + $0x8] sm:$0xf] %vm4968_vm8, %v5675_v35  ;;  %v5673_v36 = vpack.c.bf16 %v4808_v19, %v4808_v19  ;;  %v4811_v57 = vmax.f32 %v4779_v20, 0.0  ;;  %v4777_v22 = vadd.f32 %v8775_v62, %v4738_v16  ;;  %v4271_v9 = vadd.f32 %v4156_v32, %v3545_v10  ;;  %v4629_v27 = vpop.f32.mrf.mxu0 }
 0x1f1   : > { %v4743_v51 = vadd.f32 %v6138_v45, %v4273_v53  ;;  %v6105_v21 = vpop.f32.mrf.mxu1  ;;  %v3552_v35 = vadd.f32 %v8675_v34, %v3193_v8  ;;  %v3196_v19 = vadd.f32 %v8689_v5, %v8584_v25  ;;  %v3550_v53 = vadd.f32 %v8679_v1, %v3191_v3 }
 0x1f2   : > { %4969 = vst.msk [vmem:[%s8795_s19] sm:$0xf] %vm4968_vm8, %v5673_v36  ;;  %v5676_v28 = vpack.c.bf16 %v4811_v57, %v4811_v57  ;;  %v4809_v23 = vmax.f32 %v4777_v22, 0.0  ;;  %v4741_v29 = vadd.f32 %v4626_v13, %v4271_v9  ;;  %v4274_v52 = vadd.f32 %v6105_v21, %v3548_v26  ;;  %v6142_v11 = vpop.f32.mrf.mxu0 }
 0x1f3   : > { %v4782_v43 = vadd.f32 %v8775_v62, %v4743_v51  ;;  %v4159_v45 = vpop.f32.mrf.mxu1  ;;  %v3194_v32 = vadd.f32 %v8693_v31, %v8587_v50  ;;  %v3555_v9 = vadd.f32 %v8683_v48, %v3196_v19 }
 0x1f4   : > { %4972 = vst.msk [vmem:[%s8795_s19 + $0xc] sm:$0xf] %vm4968_vm8, %v5676_v28  ;;  %v5674_v15 = vpack.c.bf16 %v4809_v23, %v4809_v23  ;;  %v4780_v4 = vadd.f32 %v8775_v62, %v4741_v29  ;;  %v4744_v24 = vadd.f32 %v6139_v60, %v4274_v52  ;;  %v4272_v12 = vadd.f32 %v4159_v45, %v3546_v17  ;;  %v4642_v13 = vpop.f32.mrf.mxu0 }
 0x1f5   : > { %v4814_v37 = vmax.f32 %v4782_v43, 0.0  ;;  %v6108_v10 = vpop.f32.mrf.mxu1  ;;  %v3553_v28 = vadd.f32 %v8687_v58, %v3194_v32  ;;  %v3197_v23 = vadd.f32 %v8697_v7, %v8590_v54  ;;  %v3195_v29 = vadd.f32 %v8701_v2, %v8593_v6 }
 0x1f6   : > { %4970 = vst.msk [vmem:[%s8795_s19 + $0x4] sm:$0xf] %vm4968_vm8, %v5674_v15  ;;  %v4812_v30 = vmax.f32 %v4780_v4, 0.0  ;;  %v4783_v44 = vadd.f32 %v8775_v62, %v4744_v24  ;;  %v4742_v46 = vadd.f32 %v4629_v27, %v4272_v12  ;;  %v4277_v49 = vadd.f32 %v6108_v10, %v3551_v38  ;;  %v6143_v18 = vpop.f32.mrf.mxu0 }
 0x1f7   : > { %v5679_v59 = vpack.c.bf16 %v4814_v37, %v4814_v37  ;;  %v4172_v55 = vpop.f32.mrf.mxu1  ;;  %v3200_v58 = vadd.f32 %v8705_v42, %v8596_v41  ;;  %v3556_v24 = vadd.f32 %v8691_v56, %v3197_v23  ;;  %v3554_v12 = vadd.f32 %v8695_v39, %v3195_v29  ;;  %v9204_v23 = vld [vmem:[#allocation10_spill] sm:$0xff] }
 0x1f8   : > { %v5677_v20 = vpack.c.bf16 %v4812_v30, %v4812_v30  ;;  %v4815_v16 = vmax.f32 %v4783_v44, 0.0  ;;  %v4781_v60 = vadd.f32 %v8775_v62, %v4742_v46  ;;  %v4747_v26 = vadd.f32 %v6142_v11, %v4277_v49  ;;  %v4645_v40 = vpop.f32.mrf.mxu0  ;;  %v9195_v49 = vld [vmem:[#allocation11_spill] sm:$0xff] }
 0x1f9   : > { %4975 = vst.msk [vmem:[%s8795_s19 + $0x18] sm:$0xf] %vm4968_vm8, %v5679_v59  ;;  %v4275_v47 = vadd.f32 %v4172_v55, %v3549_v0  ;;  %v6109_v34 = vpop.f32.mrf.mxu1  ;;  %v3559_v46 = vadd.f32 %v8699_v14, %v3200_v58  ;;  %v9197_v55 = vld [vmem:[#allocation4_spill] sm:$0xff]  ;;  %v9205_v58 = vld [vmem:[#allocation17_spill] sm:$0xff] }
 0x1fa   : > { %4973 = vst.msk [vmem:[%s8795_s19 + $0x10] sm:$0xf] %vm4968_vm8, %v5677_v20  ;;  %v5680_v25 = vpack.c.bf16 %v4815_v16, %v4815_v16  ;;  %v4813_v5 = vmax.f32 %v4781_v60, 0.0  ;;  %v4786_v36 = vadd.f32 %v8775_v62, %v4747_v26  ;;  %v4278_v57 = vadd.f32 %v6109_v34, %v3552_v35  ;;  %v6146_v22 = vpop.f32.mrf.mxu0 }
 0x1fb   : > { %v4745_v27 = vadd.f32 %v4642_v13, %v4275_v47  ;;  %v4175_v1 = vpop.f32.mrf.mxu1  ;;  %v3198_v13 = vadd.f32 %v8709_v61, %v8599_v33  ;;  %v9198_v47 = vld [vmem:[#allocation13_spill] sm:$0xff] }
 0x1fc   : > { %4976 = vst.msk [vmem:[%s8795_s19 + $0x1c] sm:$0xf] %vm4968_vm8, %v5680_v25  ;;  %v5678_v50 = vpack.c.bf16 %v4813_v5, %v4813_v5  ;;  %v4818_v31 = vmax.f32 %v4786_v36, 0.0  ;;  %v4748_v17 = vadd.f32 %v6143_v18, %v4278_v57  ;;  %v4276_v51 = vadd.f32 %v4175_v1, %v3550_v53  ;;  %v4658_v21 = vpop.f32.mrf.mxu0  ;;  %v9196_v18 = vld [vmem:[#allocation20_spill] sm:$0xff]  ;;  %v9199_v25 = vld [vmem:[#allocation2_spill] sm:$0xff]  ;;  %v9201_v57 = vld [vmem:[#allocation19_spill] sm:$0xff] }
 0x1fd   : > { %v4784_v48 = vadd.f32 %v8775_v62, %v4745_v27  ;;  %v6112_v52 = vpop.f32.mrf.mxu1  ;;  %v3201_v0 = vadd.f32 %v9196_v18, %v9195_v49  ;;  %v3557_v20 = vadd.f32 %v9197_v55, %v3198_v13  ;;  %v9200_v5 = vld [vmem:[#allocation24_spill] sm:$0xff] }
 0x1fe   : > { %4974 = vst.msk [vmem:[%s8795_s19 + $0x14] sm:$0xf] %vm4968_vm8, %v5678_v50  ;;  %v5683_v11 = vpack.c.bf16 %v4818_v31, %v4818_v31  ;;  %v4787_v38 = vadd.f32 %v8775_v62, %v4748_v17  ;;  %v4746_v63 = vadd.f32 %v4645_v40, %v4276_v51  ;;  %v4281_v8 = vadd.f32 %v6112_v52, %v3555_v9  ;;  %v6147_v43 = vpop.f32.mrf.mxu0 }
 0x1ff   : > { %v4816_v45 = vmax.f32 %v4784_v48, 0.0  ;;  %v4188_v15 = vpop.f32.mrf.mxu1  ;;  %v3560_v34 = vadd.f32 %v9198_v47, %v3201_v0  ;;  %v3199_v36 = vadd.f32 %v9200_v5, %v9199_v25  ;;  %v9215_v47 = vld [vmem:[#allocation31_spill] sm:$0xff]  ;;  %v9216_v25 = vld [vmem:[#allocation25_spill] sm:$0xff] }
 0x200   : > { %4979 = vst.msk [vmem:[%s8795_s19 + $0x28] sm:$0xf] %vm4968_vm8, %v5683_v11  ;;  %v4819_v54 = vmax.f32 %v4787_v38, 0.0  ;;  %v4785_v6 = vadd.f32 %v8775_v62, %v4746_v63  ;;  %v4751_v2 = vadd.f32 %v6146_v22, %v4281_v8  ;;  %v4279_v7 = vadd.f32 %v4188_v15, %v3553_v28  ;;  %v4661_v4 = vpop.f32.mrf.mxu0  ;;  %v9202_v22 = vld [vmem:[#allocation3_spill] sm:$0xff]  ;;  %v9203_v28 = vld [vmem:[#allocation14_spill] sm:$0xff]  ;;  %v9217_v5 = vld [vmem:[#allocation33_spill] sm:$0xff] }
 0x201   : > { %v5681_v41 = vpack.c.bf16 %v4816_v45, %v4816_v45  ;;  %v6113_v42 = vpop.f32.mrf.mxu1  ;;  %v3204_v9 = vadd.f32 %v9202_v22, %v9201_v57  ;;  %v3202_v29 = vadd.f32 %v9204_v23, %v9203_v28  ;;  %v3558_v45 = vadd.f32 %v9205_v58, %v3199_v36  ;;  %v9206_v15 = vld [vmem:[#allocation22_spill] sm:$0xff] }
 0x202   : > { %v5684_v3 = vpack.c.bf16 %v4819_v54, %v4819_v54  ;;  %v4817_v37 = vmax.f32 %v4785_v6, 0.0  ;;  %v4790_v10 = vadd.f32 %v8775_v62, %v4751_v2  ;;  %v4749_v30 = vadd.f32 %v4658_v21, %v4279_v7  ;;  %v6150_v44 = vpop.f32.mrf.mxu0  ;;  %v9207_v6 = vld [vmem:[#allocation18_spill] sm:$0xff]  ;;  %v9208_v2 = vld [vmem:[#allocation27_spill] sm:$0xff] }
 0x203   : > { %4977 = vst.msk [vmem:[%s8795_s19 + $0x20] sm:$0xf] %vm4968_vm8, %v5681_v41  ;;  %v4282_v56 = vadd.f32 %v6113_v42, %v3556_v24  ;;  %v4191_v39 = vpop.f32.mrf.mxu1  ;;  %v3563_v54 = vadd.f32 %v9206_v15, %v3204_v9  ;;  %v3205_v7 = vadd.f32 %v9208_v2, %v9207_v6  ;;  %v3206_v36 = vadd.f32 %v9217_v5, %v9216_v25  ;;  %v9223_v15 = vld [vmem:[#allocation37_spill] sm:$0xff] }
 0x204   : > { %4980 = vst.msk [vmem:[%s8795_s19 + $0x2c] sm:$0xf] %vm4968_vm8, %v5684_v3  ;;  %v5682_v33 = vpack.c.bf16 %v4817_v37, %v4817_v37  ;;  %v4822_v61 = vmax.f32 %v4790_v10, 0.0  ;;  %v4788_v35 = vadd.f32 %v8775_v62, %v4749_v30  ;;  %v4280_v19 = vadd.f32 %v4191_v39, %v3554_v12  ;;  %v4674_v59 = vpop.f32.mrf.mxu0  ;;  %v9209_v37 = vld [vmem:[#allocation15_spill] sm:$0xff]  ;;  %v9210_v30 = vld [vmem:[#allocation21_spill] sm:$0xff] }
 0x205   : > { %v4752_v16 = vadd.f32 %v6147_v43, %v4282_v56  ;;  %v6116_v14 = vpop.f32.mrf.mxu1  ;;  %v3561_v10 = vadd.f32 %v9209_v37, %v3202_v29  ;;  %v9226_v37 = vld [vmem:[#allocation39_spill] sm:$0xff] }
 0x206   : > { %4978 = vst.msk [vmem:[%s8795_s19 + $0x24] sm:$0xf] %vm4968_vm8, %v5682_v33  ;;  %v5687_v60 = vpack.c.bf16 %v4822_v61, %v4822_v61  ;;  %v4820_v26 = vmax.f32 %v4788_v35, 0.0  ;;  %v4750_v40 = vadd.f32 %v4661_v4, %v4280_v19  ;;  %v4285_v53 = vadd.f32 %v6116_v14, %v3559_v46  ;;  %v6151_v32 = vpop.f32.mrf.mxu0  ;;  %v9212_v35 = vld [vmem:[#allocation16_spill] sm:$0xff] }
 0x207   : > { %v4791_v27 = vadd.f32 %v8775_v62, %v4752_v16  ;;  %v4204_v1 = vpop.f32.mrf.mxu1  ;;  %v3564_v19 = vadd.f32 %v9212_v35, %v3205_v7 }
 0x208   : > { %4983 = vst.msk [vmem:[%s8795_s19 + $0x38] sm:$0xf] %vm4968_vm8, %v5687_v60  ;;  %v5685_v50 = vpack.c.bf16 %v4820_v26, %v4820_v26  ;;  %v4789_v31 = vadd.f32 %v8775_v62, %v4750_v40  ;;  %v4755_v17 = vadd.f32 %v6150_v44, %v4285_v53  ;;  %v4283_v51 = vadd.f32 %v4204_v1, %v3557_v20  ;;  %v4677_v21 = vpop.f32.mrf.mxu0  ;;  %v9211_v44 = vld [vmem:[#allocation29_spill] sm:$0xff]  ;;  %v9213_v40 = vld [vmem:[#allocation26_spill] sm:$0xff] }
 0x209   : > { %v4823_v48 = vmax.f32 %v4791_v27, 0.0  ;;  %v6117_v52 = vpop.f32.mrf.mxu1  ;;  %v3203_v46 = vadd.f32 %v9211_v44, %v9210_v30 }
 0x20a   : > { %4981 = vst.msk [vmem:[%s8795_s19 + $0x30] sm:$0xf] %vm4968_vm8, %v5685_v50  ;;  %v4821_v11 = vmax.f32 %v4789_v31, 0.0  ;;  %v4794_v38 = vadd.f32 %v8775_v62, %v4755_v17  ;;  %v4753_v63 = vadd.f32 %v4674_v59, %v4283_v51  ;;  %v4286_v8 = vadd.f32 %v6117_v52, %v3560_v34  ;;  %v9218_v17 = vld [vmem:[#allocation5_spill] sm:$0xff]  ;;  %v9219_v51 = vld [vmem:[#allocation35_spill] sm:$0xff] }
 0x20b   : > { %v6154_v43 = vpop.f32.mrf.mxu0  ;;  %v5688_v4 = vpack.c.bf16 %v4823_v48, %v4823_v48  ;;  %v4207_v24 = vpop.f32.mrf.mxu1  ;;  %v3562_v53 = vadd.f32 %v9213_v40, %v3203_v46  ;;  %v9230_v40 = vld [vmem:[#allocation41_spill] sm:$0xff] }
 0x20c   : > { %v5686_v12 = vpack.c.bf16 %v4821_v11, %v4821_v11  ;;  %v4826_v13 = vmax.f32 %v4794_v38, 0.0  ;;  %v4792_v41 = vadd.f32 %v8775_v62, %v4753_v63  ;;  %v4756_v42 = vadd.f32 %v6151_v32, %v4286_v8  ;;  %v9214_v32 = vld [vmem:[#allocation23_spill] sm:$0xff]  ;;  %v9220_v63 = vld [vmem:[#allocation28_spill] sm:$0xff] }
 0x20d   : > { %v4690_v3 = vpop.f32.mrf.mxu0  ;;  %4984 = vst.msk [vmem:[%s8795_s19 + $0x3c] sm:$0xf] %vm4968_vm8, %v5688_v4  ;;  %v4284_v49 = vadd.f32 %v4207_v24, %v3558_v45  ;;  %v6120_v18 = vpop.f32.mrf.mxu1  ;;  %v3208_v34 = vadd.f32 %v9215_v47, %v9214_v32  ;;  %v9222_v45 = vld [vmem:[#allocation6_spill] sm:$0xff]  ;;  %v9231_v32 = vld [vmem:[#allocation9_spill] sm:$0xff]  ;;  %v9232_v47 = vld [vmem:[#allocation43_spill] sm:$0xff] }
 0x20e   : > { %4982 = vst.msk [vmem:[%s8795_s19 + $0x34] sm:$0xf] %vm4968_vm8, %v5686_v12  ;;  %v5691_v0 = vpack.c.bf16 %v4826_v13, %v4826_v13  ;;  %v4824_v56 = vmax.f32 %v4792_v41, 0.0  ;;  %v4795_v39 = vadd.f32 %v8775_v62, %v4756_v42  ;;  %v4289_v33 = vadd.f32 %v6120_v18, %v3563_v54  ;;  %v9224_v41 = vld [vmem:[#allocation32_spill] sm:$0xff] }
 0x20f   : > { %v6155_v61 = vpop.f32.mrf.mxu0  ;;  %v4754_v59 = vadd.f32 %v4677_v21, %v4284_v49  ;;  %v4220_v55 = vpop.f32.mrf.mxu1  ;;  %v3209_v21 = vadd.f32 %v9219_v51, %v9218_v17  ;;  %v3567_v8 = vadd.f32 %v9220_v63, %v3208_v34  ;;  %v3207_v54 = vadd.f32 %v9223_v15, %v9222_v45 }
 0x210   : > { %4987 = vst.msk [vmem:[%s8795_s19 + $0x48] sm:$0xf] %vm4968_vm8, %v5691_v0  ;;  %v5689_v20 = vpack.c.bf16 %v4824_v56, %v4824_v56  ;;  %v4827_v16 = vmax.f32 %v4795_v39, 0.0  ;;  %v4759_v14 = vadd.f32 %v6154_v43, %v4289_v33  ;;  %v4287_v60 = vadd.f32 %v4220_v55, %v3561_v10  ;;  %v9221_v43 = vld [vmem:[#allocation30_spill] sm:$0xff] }
 0x211   : > { %v4693_v26 = vpop.f32.mrf.mxu0  ;;  %v4793_v57 = vadd.f32 %v8775_v62, %v4754_v59  ;;  %v6121_v22 = vpop.f32.mrf.mxu1  ;;  %v3565_v58 = vadd.f32 %v9221_v43, %v3206_v36  ;;  %v3568_v42 = vadd.f32 %v9224_v41, %v3209_v21  ;;  %v9227_v39 = vld [vmem:[#allocation34_spill] sm:$0xff]  ;;  %v3213_v34 = vadd.f32 %v9232_v47, %v9231_v32 }
 0x212   : > { %4985 = vst.msk [vmem:[%s8795_s19 + $0x40] sm:$0xf] %vm4968_vm8, %v5689_v20  ;;  %v5692_v9 = vpack.c.bf16 %v4827_v16, %v4827_v16  ;;  %v4798_v27 = vadd.f32 %v8775_v62, %v4759_v14  ;;  %v4757_v1 = vadd.f32 %v4690_v3, %v4287_v60  ;;  %v4290_v50 = vadd.f32 %v6121_v22, %v3564_v19  ;;  %v9225_v3 = vld [vmem:[#allocation7_spill] sm:$0xff]  ;;  %v9228_v14 = vld [vmem:[#allocation36_spill] sm:$0xff] }
 0x213   : > { %v6158_v31 = vpop.f32.mrf.mxu0  ;;  %v4825_v28 = vmax.f32 %v4793_v57, 0.0  ;;  %v4223_v23 = vpop.f32.mrf.mxu1  ;;  %v3212_v10 = vadd.f32 %v9226_v37, %v9225_v3  ;;  %v3566_v33 = vadd.f32 %v9227_v39, %v3207_v54  ;;  %v9237_v54 = vld [vmem:[#allocation42_spill] sm:$0xff] }
 0x214   : > { %4988 = vst.msk [vmem:[%s8795_s19 + $0x4c] sm:$0xf] %vm4968_vm8, %v5692_v9  ;;  %v4830_v29 = vmax.f32 %v4798_v27, 0.0  ;;  %v4796_v48 = vadd.f32 %v8775_v62, %v4757_v1  ;;  %v4760_v52 = vadd.f32 %v6155_v61, %v4290_v50  ;;  %v4288_v11 = vadd.f32 %v4223_v23, %v3562_v53  ;;  %v9233_v27 = vld [vmem:[#allocation12_spill] sm:$0xff] }
 0x215   : > { %v4706_v38 = vpop.f32.mrf.mxu0  ;;  %v5690_v6 = vpack.c.bf16 %v4825_v28, %v4825_v28  ;;  %v6124_v2 = vpop.f32.mrf.mxu1  ;;  %v3571_v60 = vadd.f32 %v9228_v14, %v3212_v10  ;;  %v9234_v1 = vld [vmem:[#allocation44_spill] sm:$0xff] }
 0x216   : > { %v5695_v7 = vpack.c.bf16 %v4830_v29, %v4830_v29  ;;  %v4828_v4 = vmax.f32 %v4796_v48, 0.0  ;;  %v4799_v24 = vadd.f32 %v8775_v62, %v4760_v52  ;;  %v4758_v12 = vadd.f32 %v4693_v26, %v4288_v11  ;;  %v9229_v26 = vld [vmem:[#allocation8_spill] sm:$0xff]  ;;  %v9235_v48 = vld [vmem:[#allocation38_spill] sm:$0xff] }
 0x217   : > { %v6159_v13 = vpop.f32.mrf.mxu0  ;;  %4986 = vst.msk [vmem:[%s8795_s19 + $0x44] sm:$0xf] %vm4968_vm8, %v5690_v6  ;;  %v4293_v30 = vadd.f32 %v6124_v2, %v3567_v8  ;;  %v4236_v44 = vpop.f32.mrf.mxu1  ;;  %v3210_v53 = vadd.f32 %v9230_v40, %v9229_v26  ;;  %v3211_v50 = vadd.f32 %v9234_v1, %v9233_v27  ;;  %v9236_v11 = vld [vmem:[#allocation40_spill] sm:$0xff] }
 0x218   : > { %4991 = vst.msk [vmem:[%s8795_s19 + $0x58] sm:$0xf] %vm4968_vm8, %v5695_v7  ;;  %v5693_v46 = vpack.c.bf16 %v4828_v4, %v4828_v4  ;;  %v4831_v49 = vmax.f32 %v4799_v24, 0.0  ;;  %v4797_v18 = vadd.f32 %v8775_v62, %v4758_v12  ;;  %v4291_v0 = vadd.f32 %v4236_v44, %v3565_v58 }
 0x219   : > { %v4709_v56 = vpop.f32.mrf.mxu0  ;;  %v4763_v61 = vadd.f32 %v6158_v31, %v4293_v30  ;;  %v6125_v35 = vpop.f32.mrf.mxu1  ;;  %v3569_v52 = vadd.f32 %v9235_v48, %v3210_v53  ;;  %v3570_v6 = vadd.f32 %v9237_v54, %v3211_v50 }
 0x21a   : > { %4989 = vst.msk [vmem:[%s8795_s19 + $0x50] sm:$0xf] %vm4968_vm8, %v5693_v46  ;;  %v5696_v19 = vpack.c.bf16 %v4831_v49, %v4831_v49  ;;  %v4829_v59 = vmax.f32 %v4797_v18, 0.0  ;;  %v4761_v55 = vadd.f32 %v4706_v38, %v4291_v0  ;;  %v4294_v20 = vadd.f32 %v6125_v35, %v3568_v42 }
 0x21b   : > { %v6162_v16 = vpop.f32.mrf.mxu0  ;;  %v4802_v25 = vadd.f32 %v8775_v62, %v4763_v61  ;;  %v4239_v5 = vpop.f32.mrf.mxu1  ;;  %v3572_v38 = vadd.f32 %v9236_v11, %v3213_v34 }
 0x21c   : > { %4992 = vst.msk [vmem:[%s8795_s19 + $0x5c] sm:$0xf] %vm4968_vm8, %v5696_v19  ;;  %v5694_v36 = vpack.c.bf16 %v4829_v59, %v4829_v59  ;;  %v4800_v57 = vadd.f32 %v8775_v62, %v4761_v55  ;;  %v4764_v22 = vadd.f32 %v6159_v13, %v4294_v20  ;;  %v4292_v9 = vadd.f32 %v4239_v5, %v3566_v33 }
 0x21d   : > { %v4834_v31 = vmax.f32 %v4802_v25, 0.0  ;;  %v6128_v17 = vpop.f32.mrf.mxu1  ;;  %v4722_v51 = vpop.f32.mrf.mxu0 }
 0x21e   : > { %4990 = vst.msk [vmem:[%s8795_s19 + $0x54] sm:$0xf] %vm4968_vm8, %v5694_v36  ;;  %v4832_v21 = vmax.f32 %v4800_v57, 0.0  ;;  %v4803_v28 = vadd.f32 %v8775_v62, %v4764_v22  ;;  %v4762_v23 = vadd.f32 %v4709_v56, %v4292_v9  ;;  %v4297_v29 = vadd.f32 %v6128_v17, %v3571_v60 }
 0x21f   : > { %v5699_v63 = vpack.c.bf16 %v4834_v31, %v4834_v31  ;;  %v4252_v8 = vpop.f32.mrf.mxu1  ;;  %v6163_v4 = vpop.f32.mrf.mxu0 }
 0x220   : > { %v5697_v43 = vpack.c.bf16 %v4832_v21, %v4832_v21  ;;  %v4835_v58 = vmax.f32 %v4803_v28, 0.0  ;;  %v4801_v45 = vadd.f32 %v8775_v62, %v4762_v23  ;;  %v4767_v15 = vadd.f32 %v6162_v16, %v4297_v29 }
 0x221   : > { %4995 = vst.msk [vmem:[%s8795_s19 + $0x68] sm:$0xf] %vm4968_vm8, %v5699_v63  ;;  %v4295_v2 = vadd.f32 %v4252_v8, %v3569_v52  ;;  %v6129_v7 = vpop.f32.mrf.mxu1  ;;  %v4725_v49 = vpop.f32.mrf.mxu0 }
 0x222   : > { %4993 = vst.msk [vmem:[%s8795_s19 + $0x60] sm:$0xf] %vm4968_vm8, %v5697_v43  ;;  %v5700_v24 = vpack.c.bf16 %v4835_v58, %v4835_v58  ;;  %v4833_v12 = vmax.f32 %v4801_v45, 0.0  ;;  %v4806_v13 = vadd.f32 %v8775_v62, %v4767_v15  ;;  %v4298_v41 = vadd.f32 %v6129_v7, %v3572_v38 }
 0x223   : > { %v4765_v42 = vadd.f32 %v4722_v51, %v4295_v2  ;;  %v4255_v3 = vpop.f32.mrf.mxu1 }
 0x224   : > { %4996 = vst.msk [vmem:[%s8795_s19 + $0x6c] sm:$0xf] %vm4968_vm8, %v5700_v24  ;;  %v5698_v37 = vpack.c.bf16 %v4833_v12, %v4833_v12  ;;  %v4838_v10 = vmax.f32 %v4806_v13, 0.0  ;;  %v4768_v30 = vadd.f32 %v6163_v4, %v4298_v41  ;;  %v4296_v44 = vadd.f32 %v4255_v3, %v3570_v6 }
 0x225   : > { %v4804_v46 = vadd.f32 %v8775_v62, %v4765_v42 }
 0x226   : > { %4994 = vst.msk [vmem:[%s8795_s19 + $0x64] sm:$0xf] %vm4968_vm8, %v5698_v37  ;;  %v5703_v18 = vpack.c.bf16 %v4838_v10, %v4838_v10  ;;  %v4807_v0 = vadd.f32 %v8775_v62, %v4768_v30  ;;  %v4766_v56 = vadd.f32 %v4725_v49, %v4296_v44 }
 0x227   : > { %v4836_v39 = vmax.f32 %v4804_v46, 0.0 }
 0x228   : > { %4999 = vst.msk [vmem:[%s8795_s19 + $0x78] sm:$0xf] %vm4968_vm8, %v5703_v18  ;;  %v4839_v33 = vmax.f32 %v4807_v0, 0.0  ;;  %v4805_v61 = vadd.f32 %v8775_v62, %v4766_v56 }
 0x229   : > { %v5701_v35 = vpack.c.bf16 %v4836_v39, %v4836_v39 }
 0x22a   : > { %v5704_v19 = vpack.c.bf16 %v4839_v33, %v4839_v33  ;;  %v4837_v59 = vmax.f32 %v4805_v61, 0.0 }
 0x22b   : > { %4997 = vst.msk [vmem:[%s8795_s19 + $0x70] sm:$0xf] %vm4968_vm8, %v5701_v35 }
 0x22c   : > { %5000 = vst.msk [vmem:[%s8795_s19 + $0x7c] sm:$0xf] %vm4968_vm8, %v5704_v19  ;;  %v5702_v55 = vpack.c.bf16 %v4837_v59, %v4837_v59 }
 0x22e   : > { %4998 = vst.msk [vmem:[%s8795_s19 + $0x74] sm:$0xf] %vm4968_vm8, %v5702_v55 }
 0x22f PF: > { %s13_s14 = sadd.s32 1, %s6267_s14   ;;  %s9238_s12 = smov %s6263_s13 }
 0x230   : > { %p10_p5 = scmp.ge.s32.totalorder %s13_s14, 4   ;;  %s9239_s13 = smov %s9241_s15 }
 0x232   :  { %12 = sbr.rel (!%p10_p5) target bundleno = 2 (0x2), region = 72 }

</bundles_post_ra>
